<compile_context>
chip_gen: v7x
topology: tpu7x:2x2x1
jax: 0.10.0
libtpu: 0.0.40
codegen_flags: <defaults>
</compile_context>

<pallas_src>
import functools

import numpy as np
import jax
import jax.numpy as jnp
from jax.experimental import pallas as pl
from jax.experimental.pallas import tpu as pltpu

F32 = jnp.float32
BF16 = jnp.bfloat16


# ----------------------------- in-kernel helpers ----------------------------

def _mm(a, b):
    """MXU matmul: bf16 operands, f32 accumulation."""
    return jnp.dot(a.astype(BF16), b.astype(BF16), preferred_element_type=F32)


def _mm_nt(a, b):
    """a (M,K) @ b(N,K)^T -> (M,N) without an explicit transpose."""
    return jax.lax.dot_general(a.astype(BF16), b.astype(BF16),
                               (((1,), (1,)), ((), ())),
                               preferred_element_type=F32)


def _ln(x, g, b):
    """LayerNorm (eps=1e-5, PyTorch default), f32."""
    mu = jnp.mean(x, axis=-1, keepdims=True)
    xc = x - mu
    var = jnp.mean(xc * xc, axis=-1, keepdims=True)
    return xc * jax.lax.rsqrt(var + 1e-5) * g + b


def _attention(q, k, v, wo, num_heads):
    """Multi-head attention on already-projected q (pre-scaled), k, v.

    q: (Lq, D), k/v: (Lk, D), wo: (D, D).  Head outputs are pushed straight through
    the matching W_o row-slice and accumulated (no concat).  Returns (Lq, D).
    """
    D = q.shape[-1]
    dh = D // num_heads
    out = None
    for h in range(num_heads):
        sl = slice(h * dh, (h + 1) * dh)
        s = _mm_nt(q[:, sl], k[:, sl])                       # (Lq, Lk)
        s = s - jnp.max(s, axis=-1, keepdims=True)
        p = jnp.exp(s)
        p = p * pl.reciprocal(jnp.sum(p, axis=-1, keepdims=True), approx=True)
        ctx = _mm(p, v[:, sl])                               # (Lq, dh)
        contrib = _mm(ctx, wo[sl, :])                        # (Lq, D)
        out = contrib if out is None else out + contrib
    return out


# ----------------------------- Pallas kernels ------------------------------

def _decoder_agent_kernel(
        ft_ref, st_ref,
        wbev_ref, bbev_ref, wst_ref, bst_ref, kvemb_ref, qemb_ref,
        saqkv_w_ref, saqkv_b_ref, sao_w_ref, sao_b_ref,
        caq_w_ref, caq_b_ref, cakv_w_ref, cakv_b_ref, cao_w_ref, cao_b_ref,
        ff1_w_ref, ff1_b_ref, ff2_w_ref, ff2_b_ref,
        lng_ref, lnb_ref,
        ag1_w_ref, ag1_b_ref, ag2h_w_ref, ag2q_w_ref, ag2b_ref,
        out_ref, *, num_heads, num_layers):
    """Fused: keyval encoding + nn.TransformerDecoder (post-norm, relu) + AgentHead.

    One grid step handles one batch element; everything stays VMEM-resident.
    """
    D = qemb_ref.shape[-1]
    scale = 1.0 / float(np.sqrt(D // num_heads))

    # --- key/value memory: BEV tokens (backbone proj pre-composed with 1x1 downscale)
    #     + status token, plus the keyval positional embedding ---
    bev = _mm(ft_ref[0], wbev_ref[...]) + bbev_ref[...]              # (64, D)
    st = _mm(st_ref[0], wst_ref[...]) + bst_ref[...]                 # (1, D)
    kv = jnp.concatenate([bev, st], axis=0) + kvemb_ref[...]         # (65, D)

    x = qemb_ref[...]                                                # (Lq, D)
    for l in range(num_layers):
        lg = lng_ref[l]                                              # (3, D)
        lb = lnb_ref[l]
        # self-attention (packed QKV projection)
        qkv = _mm(x, saqkv_w_ref[l]) + saqkv_b_ref[l]                # (Lq, 3D)
        a = _attention(qkv[:, :D] * scale, qkv[:, D:2 * D], qkv[:, 2 * D:],
                       sao_w_ref[l], num_heads) + sao_b_ref[l]
        x = _ln(x + a, lg[0:1], lb[0:1])
        # cross-attention over keyval memory (packed KV projection)
        q = (_mm(x, caq_w_ref[l]) + caq_b_ref[l]) * scale
        kvp = _mm(kv, cakv_w_ref[l]) + cakv_b_ref[l]                 # (Lk, 2D)
        a = _attention(q, kvp[:, :D], kvp[:, D:], cao_w_ref[l],
                       num_heads) + cao_b_ref[l]
        x = _ln(x + a, lg[1:2], lb[1:2])
        # feed-forward
        h = jnp.maximum(_mm(x, ff1_w_ref[l]) + ff1_b_ref[l], 0.0)
        h = _mm(h, ff2_w_ref[l]) + ff2_b_ref[l]
        x = _ln(x + h, lg[2:3], lb[2:3])

    # --- AgentHead on agent queries, packed into ONE lane-dense 128-wide slab:
    #     cols 0:5 -> bounding-box states (tanh post-processed), col 5 -> label logit ---
    aq = x[1:, :]                                                    # (num_bb, D)
    h = jnp.maximum(_mm(aq, ag1_w_ref[...]) + ag1_b_ref[...], 0.0)
    slab = _mm(h, ag2h_w_ref[...]) + _mm(aq, ag2q_w_ref[...]) + ag2b_ref[...]
    col = jax.lax.broadcasted_iota(jnp.int32, slab.shape, 1)
    t = jnp.tanh(slab)
    slab = jnp.where(col < 2, t * 32.0,
                     jnp.where(col == 2, t * float(np.pi), slab))
    out_ref[0] = slab


def _bev_head_kernel(ft_ref, wupT_ref, bupT_ref, sT_ref, w3T_ref, b3T_ref,
                     w1T_ref, b1T_ref, upT_ref, o_ref):
    """Fused BEV semantic head (channel-major, no in-kernel transposes):
    bbup projection -> conv3x3(+ReLU) as 9 shifted matmuls -> conv1x1 ->
    bilinear upsample via a precomputed kron(Wh, Ww) operator.
    Output per batch is a lane-dense (num_classes, Ho*Wo) slab.
    """
    up = _mm(wupT_ref[...], ft_ref[0]) + bupT_ref[...]       # (Cb, 64)
    conv = None
    for k in range(9):
        term = _mm(w3T_ref[k], _mm(up, sT_ref[k]))           # shifted-window matmul
        conv = term if conv is None else conv + term
    conv = jnp.maximum(conv + b3T_ref[...], 0.0)
    sem = _mm(w1T_ref[...], conv) + b1T_ref[...]             # (ncls, 64)
    o_ref[0] = _mm(sem, upT_ref[...])                        # (ncls, Ho*Wo)


# ----------------------------- pallas_call wrappers --------------------------

def _const_map(nd):
    return lambda b: (0,) * nd


def _full_spec(a):
    return pl.BlockSpec(a.shape, _const_map(a.ndim))


def run_decoder_agent(ft_tok, status3, weights, cfg):
    B = ft_tok.shape[0]
    nbb = cfg.num_bounding_boxes
    in_specs = [pl.BlockSpec((1,) + ft_tok.shape[1:], lambda b: (b, 0, 0)),
                pl.BlockSpec((1,) + status3.shape[1:], lambda b: (b, 0, 0))]
    in_specs += [_full_spec(w) for w in weights]
    return pl.pallas_call(
        functools.partial(_decoder_agent_kernel,
                          num_heads=cfg.tf_num_head,
                          num_layers=cfg.tf_num_layers),
        grid=(B,),
        out_shape=jax.ShapeDtypeStruct((B, nbb, 128), F32),
        in_specs=in_specs,
        out_specs=pl.BlockSpec((1, nbb, 128), lambda b: (b, 0, 0)),
        compiler_params=pltpu.CompilerParams(dimension_semantics=("parallel",)),
    )(ft_tok, status3, *weights)


def run_bev_head(ft_cm, weights, cfg):
    B = ft_cm.shape[0]
    ncls = cfg.num_bev_classes
    hw = (cfg.lidar_resolution_height // 2) * cfg.lidar_resolution_width
    in_specs = [pl.BlockSpec((1,) + ft_cm.shape[1:], lambda b: (b, 0, 0))]
    in_specs += [_full_spec(w) for w in weights]
    return pl.pallas_call(
        _bev_head_kernel,
        grid=(B,),
        out_shape=jax.ShapeDtypeStruct((B, ncls, hw), F32),
        in_specs=in_specs,
        out_specs=pl.BlockSpec((1, ncls, hw), lambda b: (b, 0, 0)),
        compiler_params=pltpu.CompilerParams(dimension_semantics=("parallel",)),
    )(ft_cm, *weights)


# ----------------------------- static operators ------------------------------

def _bilinear_matrix(out_size, in_size):
    # matches torch.nn.Upsample(mode='bilinear', align_corners=False)
    dst = np.arange(out_size, dtype=np.float64)
    src = np.maximum((dst + 0.5) * (in_size / out_size) - 0.5, 0.0)
    i0 = np.minimum(np.floor(src).astype(np.int64), in_size - 1)
    i1 = np.minimum(i0 + 1, in_size - 1)
    w1 = src - i0
    w0 = 1.0 - w1
    mat = np.zeros((out_size, in_size), dtype=np.float32)
    mat[np.arange(out_size), i0] += w0
    mat[np.arange(out_size), i1] += w1
    return mat


def _conv3x3_shift_mats_T(H, W):
    """Transposed 0/1 shift operators S_k^T so conv3x3 = sum_k S_k @ x @ W_k."""
    S = np.zeros((9, H * W, H * W), dtype=np.float32)
    for kh in range(3):
        for kw in range(3):
            k = kh * 3 + kw
            for oh in range(H):
                ih = oh + kh - 1
                if not (0 <= ih < H):
                    continue
                for ow in range(W):
                    iw = ow + kw - 1
                    if 0 <= iw < W:
                        S[k, oh * W + ow, ih * W + iw] = 1.0
    return np.transpose(S, (0, 2, 1))


# ----------------------------- config / parameters ---------------------------

class Cfg:
    tf_d_model = 32
    tf_d_ffn = 64
    tf_num_head = 4
    tf_num_layers = 2
    tf_dropout = 0.0            # dropout disabled -> deterministic
    num_bounding_boxes = 7
    bev_features_channels = 16
    num_bev_classes = 7
    lidar_resolution_height = 32
    lidar_resolution_width = 32
    num_train_timesteps = 100
    num_poses = 8               # trajectory_sampling.num_poses
    diffunet_embed_dims = 32


def init_params(key, cfg):
    D, ffn, Cb, L = cfg.tf_d_model, cfg.tf_d_ffn, cfg.bev_features_channels, cfg.tf_num_layers
    keys = iter(jax.random.split(key, 64))

    def w(shape, scale=0.02):
        return scale * jax.random.normal(next(keys), shape, F32)

    def z(shape):
        return jnp.zeros(shape, F32)

    params = {
        # backbone stand-in (see TODO in forward)
        "bb_w": w((4, 512)), "bb_b": z((512,)),
        "bbup_w": w((4, Cb)), "bbup_b": z((Cb,)),
        # _bev_downscale: Conv2d(512, d_model, 1)
        "down_w": w((512, D)), "down_b": z((D,)),
        # _status_encoding: Linear(8, d_model)
        "status_w": w((8, D)), "status_b": z((D,)),
        # embeddings
        "keyval_emb": w((8 * 8 + 1, D)),
        "query_emb": w((1 + cfg.num_bounding_boxes, D)),
        # _bev_semantic_head (conv3x3 stored as (9, Cin, Cout); conv1x1 as (Cin, Ncls))
        "sem1_w": w((9, Cb, Cb)), "sem1_b": z((Cb,)),
        "sem2_w": w((Cb, cfg.num_bev_classes)), "sem2_b": z((cfg.num_bev_classes,)),
        # AgentHead  (BoundingBox2DIndex.size() == 5)
        "ah1_w": w((D, ffn)), "ah1_b": z((ffn,)),
        "ah2_w": w((ffn, 5)), "ah2_b": z((5,)),
        "al_w": w((D, 1)), "al_b": z((1,)),
        # transformer decoder (layer-stacked, packed QKV / KV projections)
        "sa_qkv_w": w((L, D, 3 * D)), "sa_qkv_b": z((L, 1, 3 * D)),
        "sa_o_w": w((L, D, D)), "sa_o_b": z((L, 1, D)),
        "ca_q_w": w((L, D, D)), "ca_q_b": z((L, 1, D)),
        "ca_kv_w": w((L, D, 2 * D)), "ca_kv_b": z((L, 1, 2 * D)),
        "ca_o_w": w((L, D, D)), "ca_o_b": z((L, 1, D)),
        "ff1_w": w((L, D, ffn)), "ff1_b": z((L, 1, ffn)),
        "ff2_w": w((L, ffn, D)), "ff2_b": z((L, 1, D)),
        "ln_g": jnp.ones((L, 3, D), F32), "ln_b": z((L, 3, D)),
    }
    return params


# ----------------------------- forward pass -----------------------------------

def transfuser_forward(params, features, targets, rng, cfg):
    camera = features["camera_feature"].astype(F32)
    lidar = features["lidar_feature"].astype(F32)
    status = features["status_feature"].astype(F32)
    B = status.shape[0]
    D = cfg.tf_d_model
    ffn = cfg.tf_d_ffn
    Cb = cfg.bev_features_channels

    # ---------------- backbone ----------------
    # TODO(synk): TransfuserBackbone (timm image/lidar encoders + transformer fusion)
    # source is not provided; a deterministic pooled projection stand-in produces
    # correctly-shaped BEV features.  Its linear projection is pre-composed with the
    # 1x1 _bev_downscale (no nonlinearity between them).
    def pool_to(x, h, w):
        b, c, H, W = x.shape
        return x.reshape(b, c, h, H // h, w, W // w).mean(axis=(3, 5))

    fused = jnp.concatenate([pool_to(camera, 8, 8), pool_to(lidar, 8, 8)], axis=1)  # (B,4,8,8)
    ft_tok = fused.transpose(0, 2, 3, 1).reshape(B, 64, 4)    # token-major (decoder path)
    ft_cm = fused.reshape(B, 4, 64)                           # channel-major (BEV head path)
    status3 = status.reshape(B, 1, 8)

    # pre-compose backbone projection with _bev_downscale (1x1 conv)
    w_bev = params["bb_w"] @ params["down_w"]                                   # (4, D)
    b_bev = (params["bb_b"] @ params["down_w"] + params["down_b"]).reshape(1, D)

    # AgentHead packed into a lane-dense 128-wide slab: cols 0:5 states, col 5 label
    ag2h_w = jnp.zeros((ffn, 128), F32).at[:, :5].set(params["ah2_w"])
    ag2q_w = jnp.zeros((D, 128), F32).at[:, 5:6].set(params["al_w"])
    ag2_b = (jnp.zeros((1, 128), F32)
             .at[0, :5].set(params["ah2_b"])
             .at[0, 5].set(params["al_b"][0]))

    dec_weights = [
        w_bev, b_bev,
        params["status_w"], params["status_b"].reshape(1, D),
        params["keyval_emb"], params["query_emb"],
        params["sa_qkv_w"], params["sa_qkv_b"],
        params["sa_o_w"], params["sa_o_b"],
        params["ca_q_w"], params["ca_q_b"],
        params["ca_kv_w"], params["ca_kv_b"],
        params["ca_o_w"], params["ca_o_b"],
        params["ff1_w"], params["ff1_b"],
        params["ff2_w"], params["ff2_b"],
        params["ln_g"], params["ln_b"],
        params["ah1_w"], params["ah1_b"].reshape(1, ffn),
        ag2h_w, ag2q_w, ag2_b,
    ]
    agent_slab = run_decoder_agent(ft_tok, status3, dec_weights, cfg)   # (B, nbb, 128)
    agent_states = agent_slab[:, :, :5]
    agent_labels = agent_slab[:, :, 5]

    # ---------------- BEV semantic head (fully fused) ----------------
    Ho = cfg.lidar_resolution_height // 2
    Wo = cfg.lidar_resolution_width
    ncls = cfg.num_bev_classes
    upT = jnp.asarray(np.kron(_bilinear_matrix(Ho, 8), _bilinear_matrix(Wo, 8)).T)  # (64, Ho*Wo)
    sT = jnp.asarray(_conv3x3_shift_mats_T(8, 8))                                   # (9, 64, 64)
    bev_weights = [
        params["bbup_w"].T, params["bbup_b"].reshape(Cb, 1),
        sT,
        jnp.transpose(params["sem1_w"], (0, 2, 1)), params["sem1_b"].reshape(Cb, 1),
        params["sem2_w"].T, params["sem2_b"].reshape(ncls, 1),
        upT,
    ]
    bev_flat = run_bev_head(ft_cm, bev_weights, cfg)                     # (B, ncls, Ho*Wo)
    bev_semantic_map = bev_flat.reshape(B, ncls, Ho, Wo)

    # ---------------- TrajectoryHead.forward_train (tiny elementwise: plain jnp) ----
    gt = targets["trajectory"].astype(F32)                 # (B, num_poses, 3)
    xy = gt[..., :2]
    nx = 2.0 * (xy[..., 0:1] + 1.2) / 56.9 - 1.0           # norm_odo (x, y only)
    ny = 2.0 * (xy[..., 1:2] + 20.0) / 46.0 - 1.0
    plan_anchor = jnp.concatenate([nx, ny], axis=-1)
    kn, kt = jax.random.split(rng)
    noise = jax.random.normal(kn, plan_anchor.shape, F32)
    timesteps = jax.random.randint(kt, (B,), 0, cfg.num_train_timesteps)
    # DDIMScheduler(beta_schedule='scaled_linear').add_noise
    betas = jnp.linspace(0.0001 ** 0.5, 0.02 ** 0.5, cfg.num_train_timesteps, dtype=F32) ** 2
    alphas_cumprod = jnp.cumprod(1.0 - betas)
    sqrt_a = jnp.sqrt(alphas_cumprod[timesteps])[:, None, None]
    sqrt_1ma = jnp.sqrt(1.0 - alphas_cumprod[timesteps])[:, None, None]
    noisy_traj_points = jnp.clip(sqrt_a * plan_anchor + sqrt_1ma * noise, -1.0, 1.0)
    # TODO(synk): ConditionalUnet1D (noise_pred_net) source is not provided; the diffusion
    # denoiser is not reproduced — 'trajectory' carries the clamped noisy sample instead.
    trajectory = noisy_traj_points

    return {
        "bev_semantic_map": bev_semantic_map,
        "trajectory": trajectory,
        "agent_states": agent_states,
        "agent_labels": agent_labels,
    }


# ----------------------------- main -------------------------------------------

if __name__ == "__main__":
    cfg = Cfg()
    root = jax.random.PRNGKey(0)
    kp, kc, kl, ks, kt, kd = jax.random.split(root, 6)
    params = init_params(kp, cfg)

    B = 2
    features = {
        "camera_feature": jax.random.normal(kc, (B, 3, 16, 16), F32),
        "lidar_feature": jax.random.normal(kl, (B, 1, 16, 16), F32),
        "status_feature": jax.random.normal(ks, (B, 4 + 2 + 2), F32),
    }
    targets = {"trajectory": 5.0 * jax.random.normal(kt, (B, cfg.num_poses, 3), F32)}

    fwd = jax.jit(functools.partial(transfuser_forward, cfg=cfg))
    out = fwd(params, features, targets, kd)
    out = jax.tree_util.tree_map(jax.block_until_ready, out)

    assert out["bev_semantic_map"].shape == (
        B, cfg.num_bev_classes, cfg.lidar_resolution_height // 2, cfg.lidar_resolution_width)
    assert out["agent_states"].shape == (B, cfg.num_bounding_boxes, 5)
    assert out["agent_labels"].shape == (B, cfg.num_bounding_boxes)
    assert out["trajectory"].shape == (B, cfg.num_poses, 2)
    assert all(bool(jnp.all(jnp.isfinite(v))) for v in out.values())
    print("KERNEL_OK")
</pallas_src>

<mosaic_0001>
module attributes {stable_mosaic.version = 11 : i64} {
  func.func @_decoder_agent_kernel(%arg0: i32, %arg1: memref<1x64x4xf32, #tpu.memory_space<vmem>>, %arg2: memref<1x1x8xf32, #tpu.memory_space<vmem>>, %arg3: memref<4x32xf32, #tpu.memory_space<vmem>>, %arg4: memref<1x32xf32, #tpu.memory_space<vmem>>, %arg5: memref<8x32xf32, #tpu.memory_space<vmem>>, %arg6: memref<1x32xf32, #tpu.memory_space<vmem>>, %arg7: memref<65x32xf32, #tpu.memory_space<vmem>>, %arg8: memref<8x32xf32, #tpu.memory_space<vmem>>, %arg9: memref<2x32x96xf32, #tpu.memory_space<vmem>>, %arg10: memref<2x1x96xf32, #tpu.memory_space<vmem>>, %arg11: memref<2x32x32xf32, #tpu.memory_space<vmem>>, %arg12: memref<2x1x32xf32, #tpu.memory_space<vmem>>, %arg13: memref<2x32x32xf32, #tpu.memory_space<vmem>>, %arg14: memref<2x1x32xf32, #tpu.memory_space<vmem>>, %arg15: memref<2x32x64xf32, #tpu.memory_space<vmem>>, %arg16: memref<2x1x64xf32, #tpu.memory_space<vmem>>, %arg17: memref<2x32x32xf32, #tpu.memory_space<vmem>>, %arg18: memref<2x1x32xf32, #tpu.memory_space<vmem>>, %arg19: memref<2x32x64xf32, #tpu.memory_space<vmem>>, %arg20: memref<2x1x64xf32, #tpu.memory_space<vmem>>, %arg21: memref<2x64x32xf32, #tpu.memory_space<vmem>>, %arg22: memref<2x1x32xf32, #tpu.memory_space<vmem>>, %arg23: memref<2x3x32xf32, #tpu.memory_space<vmem>>, %arg24: memref<2x3x32xf32, #tpu.memory_space<vmem>>, %arg25: memref<32x64xf32, #tpu.memory_space<vmem>>, %arg26: memref<1x64xf32, #tpu.memory_space<vmem>>, %arg27: memref<64x128xf32, #tpu.memory_space<vmem>>, %arg28: memref<32x128xf32, #tpu.memory_space<vmem>>, %arg29: memref<1x128xf32, #tpu.memory_space<vmem>>, %arg30: memref<1x7x128xf32, #tpu.memory_space<vmem>>) attributes {dimension_semantics = [#tpu.dimension_semantics<parallel>], iteration_bounds = array<i64: 2>, scalar_prefetch = 0 : i64, scratch_operands = 0 : i64, tpu.core_type = #tpu.core_type<tc>, window_params = [{transform_indices = @transform_0, window_bounds = array<i64: 1, 64, 4>}, {transform_indices = @transform_1, window_bounds = array<i64: 1, 1, 8>}, {pipeline_mode = #tpu.pipeline_mode<synchronous>, transform_indices = @transform_2, window_bounds = array<i64: 4, 32>}, {pipeline_mode = #tpu.pipeline_mode<synchronous>, transform_indices = @transform_3, window_bounds = array<i64: 1, 32>}, {pipeline_mode = #tpu.pipeline_mode<synchronous>, transform_indices = @transform_4, window_bounds = array<i64: 8, 32>}, {pipeline_mode = #tpu.pipeline_mode<synchronous>, transform_indices = @transform_5, window_bounds = array<i64: 1, 32>}, {pipeline_mode = #tpu.pipeline_mode<synchronous>, transform_indices = @transform_6, window_bounds = array<i64: 65, 32>}, {pipeline_mode = #tpu.pipeline_mode<synchronous>, transform_indices = @transform_7, window_bounds = array<i64: 8, 32>}, {pipeline_mode = #tpu.pipeline_mode<synchronous>, transform_indices = @transform_8, window_bounds = array<i64: 2, 32, 96>}, {pipeline_mode = #tpu.pipeline_mode<synchronous>, transform_indices = @transform_9, window_bounds = array<i64: 2, 1, 96>}, {pipeline_mode = #tpu.pipeline_mode<synchronous>, transform_indices = @transform_10, window_bounds = array<i64: 2, 32, 32>}, {pipeline_mode = #tpu.pipeline_mode<synchronous>, transform_indices = @transform_11, window_bounds = array<i64: 2, 1, 32>}, {pipeline_mode = #tpu.pipeline_mode<synchronous>, transform_indices = @transform_12, window_bounds = array<i64: 2, 32, 32>}, {pipeline_mode = #tpu.pipeline_mode<synchronous>, transform_indices = @transform_13, window_bounds = array<i64: 2, 1, 32>}, {pipeline_mode = #tpu.pipeline_mode<synchronous>, transform_indices = @transform_14, window_bounds = array<i64: 2, 32, 64>}, {pipeline_mode = #tpu.pipeline_mode<synchronous>, transform_indices = @transform_15, window_bounds = array<i64: 2, 1, 64>}, {pipeline_mode = #tpu.pipeline_mode<synchronous>, transform_indices = @transform_16, window_bounds = array<i64: 2, 32, 32>}, {pipeline_mode = #tpu.pipeline_mode<synchronous>, transform_indices = @transform_17, window_bounds = array<i64: 2, 1, 32>}, {pipeline_mode = #tpu.pipeline_mode<synchronous>, transform_indices = @transform_18, window_bounds = array<i64: 2, 32, 64>}, {pipeline_mode = #tpu.pipeline_mode<synchronous>, transform_indices = @transform_19, window_bounds = array<i64: 2, 1, 64>}, {pipeline_mode = #tpu.pipeline_mode<synchronous>, transform_indices = @transform_20, window_bounds = array<i64: 2, 64, 32>}, {pipeline_mode = #tpu.pipeline_mode<synchronous>, transform_indices = @transform_21, window_bounds = array<i64: 2, 1, 32>}, {pipeline_mode = #tpu.pipeline_mode<synchronous>, transform_indices = @transform_22, window_bounds = array<i64: 2, 3, 32>}, {pipeline_mode = #tpu.pipeline_mode<synchronous>, transform_indices = @transform_23, window_bounds = array<i64: 2, 3, 32>}, {pipeline_mode = #tpu.pipeline_mode<synchronous>, transform_indices = @transform_24, window_bounds = array<i64: 32, 64>}, {pipeline_mode = #tpu.pipeline_mode<synchronous>, transform_indices = @transform_25, window_bounds = array<i64: 1, 64>}, {pipeline_mode = #tpu.pipeline_mode<synchronous>, transform_indices = @transform_26, window_bounds = array<i64: 64, 128>}, {pipeline_mode = #tpu.pipeline_mode<synchronous>, transform_indices = @transform_27, window_bounds = array<i64: 32, 128>}, {pipeline_mode = #tpu.pipeline_mode<synchronous>, transform_indices = @transform_28, window_bounds = array<i64: 1, 128>}, {transform_indices = @transform_29, window_bounds = array<i64: 1, 7, 128>}]} {
    %c0 = arith.constant 0 : index
    %c0_0 = arith.constant 0 : index
    %c0_1 = arith.constant 0 : index
    %0 = vector.load %arg1[%c0, %c0_0, %c0_1] : memref<1x64x4xf32, #tpu.memory_space<vmem>>, vector<1x64x4xf32>
    %1 = vector.shape_cast %0 : vector<1x64x4xf32> to vector<64x4xf32>
    %c0_2 = arith.constant 0 : index
    %c0_3 = arith.constant 0 : index
    %2 = vector.load %arg3[%c0_2, %c0_3] : memref<4x32xf32, #tpu.memory_space<vmem>>, vector<4x32xf32>
    %3 = arith.truncf %1 : vector<64x4xf32> to vector<64x4xbf16>
    %4 = arith.truncf %2 : vector<4x32xf32> to vector<4x32xbf16>
    %cst = arith.constant dense<0.000000e+00> : vector<64x32xf32>
    %5 = tpu.matmul %3, %4, %cst {dimension_numbers = #tpu.dot_dimension_numbers<[1], [0], [0], [1], [0, 0, 1, 1], [], []>} : vector<64x4xbf16>, vector<4x32xbf16>, vector<64x32xf32> -> vector<64x32xf32>
    %c0_4 = arith.constant 0 : index
    %c0_5 = arith.constant 0 : index
    %6 = vector.load %arg4[%c0_4, %c0_5] : memref<1x32xf32, #tpu.memory_space<vmem>>, vector<1x32xf32>
    %7 = vector.broadcast %6 : vector<1x32xf32> to vector<64x32xf32>
    %8 = arith.addf %5, %7 : vector<64x32xf32>
    %c0_6 = arith.constant 0 : index
    %c0_7 = arith.constant 0 : index
    %c0_8 = arith.constant 0 : index
    %9 = vector.load %arg2[%c0_6, %c0_7, %c0_8] : memref<1x1x8xf32, #tpu.memory_space<vmem>>, vector<1x1x8xf32>
    %10 = vector.shape_cast %9 : vector<1x1x8xf32> to vector<1x8xf32>
    %c0_9 = arith.constant 0 : index
    %c0_10 = arith.constant 0 : index
    %11 = vector.load %arg5[%c0_9, %c0_10] : memref<8x32xf32, #tpu.memory_space<vmem>>, vector<8x32xf32>
    %12 = arith.truncf %10 : vector<1x8xf32> to vector<1x8xbf16>
    %13 = arith.truncf %11 : vector<8x32xf32> to vector<8x32xbf16>
    %cst_11 = arith.constant dense<0.000000e+00> : vector<1x32xf32>
    %14 = tpu.matmul %12, %13, %cst_11 {dimension_numbers = #tpu.dot_dimension_numbers<[1], [0], [0], [1], [0, 0, 1, 1], [], []>} : vector<1x8xbf16>, vector<8x32xbf16>, vector<1x32xf32> -> vector<1x32xf32>
    %c0_12 = arith.constant 0 : index
    %c0_13 = arith.constant 0 : index
    %15 = vector.load %arg6[%c0_12, %c0_13] : memref<1x32xf32, #tpu.memory_space<vmem>>, vector<1x32xf32>
    %16 = arith.addf %14, %15 : vector<1x32xf32>
    %17 = tpu.concatenate %8, %16 in 0 : vector<64x32xf32>, vector<1x32xf32> -> vector<65x32xf32>
    %c0_14 = arith.constant 0 : index
    %c0_15 = arith.constant 0 : index
    %18 = vector.load %arg7[%c0_14, %c0_15] : memref<65x32xf32, #tpu.memory_space<vmem>>, vector<65x32xf32>
    %19 = arith.addf %17, %18 : vector<65x32xf32>
    %c0_16 = arith.constant 0 : index
    %c0_17 = arith.constant 0 : index
    %20 = vector.load %arg8[%c0_16, %c0_17] : memref<8x32xf32, #tpu.memory_space<vmem>>, vector<8x32xf32>
    %c0_18 = arith.constant 0 : index
    %c0_19 = arith.constant 0 : index
    %c0_20 = arith.constant 0 : index
    %21 = vector.load %arg23[%c0_18, %c0_19, %c0_20] : memref<2x3x32xf32, #tpu.memory_space<vmem>>, vector<1x3x32xf32>
    %22 = vector.shape_cast %21 : vector<1x3x32xf32> to vector<3x32xf32>
    %c0_21 = arith.constant 0 : index
    %c0_22 = arith.constant 0 : index
    %c0_23 = arith.constant 0 : index
    %23 = vector.load %arg24[%c0_21, %c0_22, %c0_23] : memref<2x3x32xf32, #tpu.memory_space<vmem>>, vector<1x3x32xf32>
    %24 = vector.shape_cast %23 : vector<1x3x32xf32> to vector<3x32xf32>
    %c0_24 = arith.constant 0 : index
    %c0_25 = arith.constant 0 : index
    %c0_26 = arith.constant 0 : index
    %25 = vector.load %arg9[%c0_24, %c0_25, %c0_26] : memref<2x32x96xf32, #tpu.memory_space<vmem>>, vector<1x32x96xf32>
    %26 = vector.shape_cast %25 : vector<1x32x96xf32> to vector<32x96xf32>
    %27 = arith.truncf %20 : vector<8x32xf32> to vector<8x32xbf16>
    %28 = arith.truncf %26 : vector<32x96xf32> to vector<32x96xbf16>
    %cst_27 = arith.constant dense<0.000000e+00> : vector<8x96xf32>
    %29 = tpu.matmul %27, %28, %cst_27 {dimension_numbers = #tpu.dot_dimension_numbers<[1], [0], [0], [1], [0, 0, 1, 1], [], []>} : vector<8x32xbf16>, vector<32x96xbf16>, vector<8x96xf32> -> vector<8x96xf32>
    %c0_28 = arith.constant 0 : index
    %c0_29 = arith.constant 0 : index
    %c0_30 = arith.constant 0 : index
    %30 = vector.load %arg10[%c0_28, %c0_29, %c0_30] : memref<2x1x96xf32, #tpu.memory_space<vmem>>, vector<1x1x96xf32>
    %31 = vector.shape_cast %30 : vector<1x1x96xf32> to vector<1x96xf32>
    %32 = vector.broadcast %31 : vector<1x96xf32> to vector<8x96xf32>
    %33 = arith.addf %29, %32 : vector<8x96xf32>
    %34 = vector.extract_strided_slice %33 {offsets = [0, 0], sizes = [8, 32], strides = [1, 1]} : vector<8x96xf32> to vector<8x32xf32>
    %cst_31 = arith.constant 0.353553385 : f32
    %35 = vector.broadcast %cst_31 : f32 to vector<8x32xf32>
    %36 = arith.mulf %34, %35 : vector<8x32xf32>
    %37 = vector.extract_strided_slice %33 {offsets = [0, 32], sizes = [8, 32], strides = [1, 1]} : vector<8x96xf32> to vector<8x32xf32>
    %38 = vector.extract_strided_slice %33 {offsets = [0, 64], sizes = [8, 32], strides = [1, 1]} : vector<8x96xf32> to vector<8x32xf32>
    %c0_32 = arith.constant 0 : index
    %c0_33 = arith.constant 0 : index
    %c0_34 = arith.constant 0 : index
    %39 = vector.load %arg11[%c0_32, %c0_33, %c0_34] : memref<2x32x32xf32, #tpu.memory_space<vmem>>, vector<1x32x32xf32>
    %40 = vector.shape_cast %39 : vector<1x32x32xf32> to vector<32x32xf32>
    %41 = vector.extract_strided_slice %36 {offsets = [0, 0], sizes = [8, 8], strides = [1, 1]} : vector<8x32xf32> to vector<8x8xf32>
    %42 = vector.extract_strided_slice %37 {offsets = [0, 0], sizes = [8, 8], strides = [1, 1]} : vector<8x32xf32> to vector<8x8xf32>
    %43 = arith.truncf %41 : vector<8x8xf32> to vector<8x8xbf16>
    %44 = arith.truncf %42 : vector<8x8xf32> to vector<8x8xbf16>
    %cst_35 = arith.constant dense<0.000000e+00> : vector<8x8xf32>
    %45 = tpu.matmul %43, %44, %cst_35 {dimension_numbers = #tpu.dot_dimension_numbers<[1], [1], [0], [0], [0, 0, 1, 0], [], []>} : vector<8x8xbf16>, vector<8x8xbf16>, vector<8x8xf32> -> vector<8x8xf32>
    %cst_36 = arith.constant dense<0xFF800000> : vector<8xf32>
    %46 = vector.multi_reduction <maximumf>, %45, %cst_36 [1] : vector<8x8xf32> to vector<8xf32>
    %47 = vector.shape_cast %46 : vector<8xf32> to vector<8x1xf32>
    %48 = vector.broadcast %47 : vector<8x1xf32> to vector<8x8xf32>
    %49 = arith.subf %45, %48 : vector<8x8xf32>
    %50 = math.exp %49 : vector<8x8xf32>
    %cst_37 = arith.constant dense<0.000000e+00> : vector<8xf32>
    %51 = vector.multi_reduction <add>, %50, %cst_37 [1] : vector<8x8xf32> to vector<8xf32>
    %52 = vector.shape_cast %51 : vector<8xf32> to vector<8x1xf32>
    %53 = tpu.reciprocal %52 {approx = true} : vector<8x1xf32> -> vector<8x1xf32>
    %54 = vector.broadcast %53 : vector<8x1xf32> to vector<8x8xf32>
    %55 = arith.mulf %50, %54 : vector<8x8xf32>
    %56 = vector.extract_strided_slice %38 {offsets = [0, 0], sizes = [8, 8], strides = [1, 1]} : vector<8x32xf32> to vector<8x8xf32>
    %57 = arith.truncf %55 : vector<8x8xf32> to vector<8x8xbf16>
    %58 = arith.truncf %56 : vector<8x8xf32> to vector<8x8xbf16>
    %cst_38 = arith.constant dense<0.000000e+00> : vector<8x8xf32>
    %59 = tpu.matmul %57, %58, %cst_38 {dimension_numbers = #tpu.dot_dimension_numbers<[1], [0], [0], [1], [0, 0, 1, 1], [], []>} : vector<8x8xbf16>, vector<8x8xbf16>, vector<8x8xf32> -> vector<8x8xf32>
    %60 = vector.extract_strided_slice %40 {offsets = [0, 0], sizes = [8, 32], strides = [1, 1]} : vector<32x32xf32> to vector<8x32xf32>
    %61 = arith.truncf %59 : vector<8x8xf32> to vector<8x8xbf16>
    %62 = arith.truncf %60 : vector<8x32xf32> to vector<8x32xbf16>
    %cst_39 = arith.constant dense<0.000000e+00> : vector<8x32xf32>
    %63 = tpu.matmul %61, %62, %cst_39 {dimension_numbers = #tpu.dot_dimension_numbers<[1], [0], [0], [1], [0, 0, 1, 1], [], []>} : vector<8x8xbf16>, vector<8x32xbf16>, vector<8x32xf32> -> vector<8x32xf32>
    %64 = vector.extract_strided_slice %36 {offsets = [0, 8], sizes = [8, 8], strides = [1, 1]} : vector<8x32xf32> to vector<8x8xf32>
    %65 = vector.extract_strided_slice %37 {offsets = [0, 8], sizes = [8, 8], strides = [1, 1]} : vector<8x32xf32> to vector<8x8xf32>
    %66 = arith.truncf %64 : vector<8x8xf32> to vector<8x8xbf16>
    %67 = arith.truncf %65 : vector<8x8xf32> to vector<8x8xbf16>
    %cst_40 = arith.constant dense<0.000000e+00> : vector<8x8xf32>
    %68 = tpu.matmul %66, %67, %cst_40 {dimension_numbers = #tpu.dot_dimension_numbers<[1], [1], [0], [0], [0, 0, 1, 0], [], []>} : vector<8x8xbf16>, vector<8x8xbf16>, vector<8x8xf32> -> vector<8x8xf32>
    %cst_41 = arith.constant dense<0xFF800000> : vector<8xf32>
    %69 = vector.multi_reduction <maximumf>, %68, %cst_41 [1] : vector<8x8xf32> to vector<8xf32>
    %70 = vector.shape_cast %69 : vector<8xf32> to vector<8x1xf32>
    %71 = vector.broadcast %70 : vector<8x1xf32> to vector<8x8xf32>
    %72 = arith.subf %68, %71 : vector<8x8xf32>
    %73 = math.exp %72 : vector<8x8xf32>
    %cst_42 = arith.constant dense<0.000000e+00> : vector<8xf32>
    %74 = vector.multi_reduction <add>, %73, %cst_42 [1] : vector<8x8xf32> to vector<8xf32>
    %75 = vector.shape_cast %74 : vector<8xf32> to vector<8x1xf32>
    %76 = tpu.reciprocal %75 {approx = true} : vector<8x1xf32> -> vector<8x1xf32>
    %77 = vector.broadcast %76 : vector<8x1xf32> to vector<8x8xf32>
    %78 = arith.mulf %73, %77 : vector<8x8xf32>
    %79 = vector.extract_strided_slice %38 {offsets = [0, 8], sizes = [8, 8], strides = [1, 1]} : vector<8x32xf32> to vector<8x8xf32>
    %80 = arith.truncf %78 : vector<8x8xf32> to vector<8x8xbf16>
    %81 = arith.truncf %79 : vector<8x8xf32> to vector<8x8xbf16>
    %cst_43 = arith.constant dense<0.000000e+00> : vector<8x8xf32>
    %82 = tpu.matmul %80, %81, %cst_43 {dimension_numbers = #tpu.dot_dimension_numbers<[1], [0], [0], [1], [0, 0, 1, 1], [], []>} : vector<8x8xbf16>, vector<8x8xbf16>, vector<8x8xf32> -> vector<8x8xf32>
    %83 = vector.extract_strided_slice %40 {offsets = [8, 0], sizes = [8, 32], strides = [1, 1]} : vector<32x32xf32> to vector<8x32xf32>
    %84 = arith.truncf %82 : vector<8x8xf32> to vector<8x8xbf16>
    %85 = arith.truncf %83 : vector<8x32xf32> to vector<8x32xbf16>
    %cst_44 = arith.constant dense<0.000000e+00> : vector<8x32xf32>
    %86 = tpu.matmul %84, %85, %cst_44 {dimension_numbers = #tpu.dot_dimension_numbers<[1], [0], [0], [1], [0, 0, 1, 1], [], []>} : vector<8x8xbf16>, vector<8x32xbf16>, vector<8x32xf32> -> vector<8x32xf32>
    %87 = arith.addf %63, %86 : vector<8x32xf32>
    %88 = vector.extract_strided_slice %36 {offsets = [0, 16], sizes = [8, 8], strides = [1, 1]} : vector<8x32xf32> to vector<8x8xf32>
    %89 = vector.extract_strided_slice %37 {offsets = [0, 16], sizes = [8, 8], strides = [1, 1]} : vector<8x32xf32> to vector<8x8xf32>
    %90 = arith.truncf %88 : vector<8x8xf32> to vector<8x8xbf16>
    %91 = arith.truncf %89 : vector<8x8xf32> to vector<8x8xbf16>
    %cst_45 = arith.constant dense<0.000000e+00> : vector<8x8xf32>
    %92 = tpu.matmul %90, %91, %cst_45 {dimension_numbers = #tpu.dot_dimension_numbers<[1], [1], [0], [0], [0, 0, 1, 0], [], []>} : vector<8x8xbf16>, vector<8x8xbf16>, vector<8x8xf32> -> vector<8x8xf32>
    %cst_46 = arith.constant dense<0xFF800000> : vector<8xf32>
    %93 = vector.multi_reduction <maximumf>, %92, %cst_46 [1] : vector<8x8xf32> to vector<8xf32>
    %94 = vector.shape_cast %93 : vector<8xf32> to vector<8x1xf32>
    %95 = vector.broadcast %94 : vector<8x1xf32> to vector<8x8xf32>
    %96 = arith.subf %92, %95 : vector<8x8xf32>
    %97 = math.exp %96 : vector<8x8xf32>
    %cst_47 = arith.constant dense<0.000000e+00> : vector<8xf32>
    %98 = vector.multi_reduction <add>, %97, %cst_47 [1] : vector<8x8xf32> to vector<8xf32>
    %99 = vector.shape_cast %98 : vector<8xf32> to vector<8x1xf32>
    %100 = tpu.reciprocal %99 {approx = true} : vector<8x1xf32> -> vector<8x1xf32>
    %101 = vector.broadcast %100 : vector<8x1xf32> to vector<8x8xf32>
    %102 = arith.mulf %97, %101 : vector<8x8xf32>
    %103 = vector.extract_strided_slice %38 {offsets = [0, 16], sizes = [8, 8], strides = [1, 1]} : vector<8x32xf32> to vector<8x8xf32>
    %104 = arith.truncf %102 : vector<8x8xf32> to vector<8x8xbf16>
    %105 = arith.truncf %103 : vector<8x8xf32> to vector<8x8xbf16>
    %cst_48 = arith.constant dense<0.000000e+00> : vector<8x8xf32>
    %106 = tpu.matmul %104, %105, %cst_48 {dimension_numbers = #tpu.dot_dimension_numbers<[1], [0], [0], [1], [0, 0, 1, 1], [], []>} : vector<8x8xbf16>, vector<8x8xbf16>, vector<8x8xf32> -> vector<8x8xf32>
    %107 = vector.extract_strided_slice %40 {offsets = [16, 0], sizes = [8, 32], strides = [1, 1]} : vector<32x32xf32> to vector<8x32xf32>
    %108 = arith.truncf %106 : vector<8x8xf32> to vector<8x8xbf16>
    %109 = arith.truncf %107 : vector<8x32xf32> to vector<8x32xbf16>
    %cst_49 = arith.constant dense<0.000000e+00> : vector<8x32xf32>
    %110 = tpu.matmul %108, %109, %cst_49 {dimension_numbers = #tpu.dot_dimension_numbers<[1], [0], [0], [1], [0, 0, 1, 1], [], []>} : vector<8x8xbf16>, vector<8x32xbf16>, vector<8x32xf32> -> vector<8x32xf32>
    %111 = arith.addf %87, %110 : vector<8x32xf32>
    %112 = vector.extract_strided_slice %36 {offsets = [0, 24], sizes = [8, 8], strides = [1, 1]} : vector<8x32xf32> to vector<8x8xf32>
    %113 = vector.extract_strided_slice %37 {offsets = [0, 24], sizes = [8, 8], strides = [1, 1]} : vector<8x32xf32> to vector<8x8xf32>
    %114 = arith.truncf %112 : vector<8x8xf32> to vector<8x8xbf16>
    %115 = arith.truncf %113 : vector<8x8xf32> to vector<8x8xbf16>
    %cst_50 = arith.constant dense<0.000000e+00> : vector<8x8xf32>
    %116 = tpu.matmul %114, %115, %cst_50 {dimension_numbers = #tpu.dot_dimension_numbers<[1], [1], [0], [0], [0, 0, 1, 0], [], []>} : vector<8x8xbf16>, vector<8x8xbf16>, vector<8x8xf32> -> vector<8x8xf32>
    %cst_51 = arith.constant dense<0xFF800000> : vector<8xf32>
    %117 = vector.multi_reduction <maximumf>, %116, %cst_51 [1] : vector<8x8xf32> to vector<8xf32>
    %118 = vector.shape_cast %117 : vector<8xf32> to vector<8x1xf32>
    %119 = vector.broadcast %118 : vector<8x1xf32> to vector<8x8xf32>
    %120 = arith.subf %116, %119 : vector<8x8xf32>
    %121 = math.exp %120 : vector<8x8xf32>
    %cst_52 = arith.constant dense<0.000000e+00> : vector<8xf32>
    %122 = vector.multi_reduction <add>, %121, %cst_52 [1] : vector<8x8xf32> to vector<8xf32>
    %123 = vector.shape_cast %122 : vector<8xf32> to vector<8x1xf32>
    %124 = tpu.reciprocal %123 {approx = true} : vector<8x1xf32> -> vector<8x1xf32>
    %125 = vector.broadcast %124 : vector<8x1xf32> to vector<8x8xf32>
    %126 = arith.mulf %121, %125 : vector<8x8xf32>
    %127 = vector.extract_strided_slice %38 {offsets = [0, 24], sizes = [8, 8], strides = [1, 1]} : vector<8x32xf32> to vector<8x8xf32>
    %128 = arith.truncf %126 : vector<8x8xf32> to vector<8x8xbf16>
    %129 = arith.truncf %127 : vector<8x8xf32> to vector<8x8xbf16>
    %cst_53 = arith.constant dense<0.000000e+00> : vector<8x8xf32>
    %130 = tpu.matmul %128, %129, %cst_53 {dimension_numbers = #tpu.dot_dimension_numbers<[1], [0], [0], [1], [0, 0, 1, 1], [], []>} : vector<8x8xbf16>, vector<8x8xbf16>, vector<8x8xf32> -> vector<8x8xf32>
    %131 = vector.extract_strided_slice %40 {offsets = [24, 0], sizes = [8, 32], strides = [1, 1]} : vector<32x32xf32> to vector<8x32xf32>
    %132 = arith.truncf %130 : vector<8x8xf32> to vector<8x8xbf16>
    %133 = arith.truncf %131 : vector<8x32xf32> to vector<8x32xbf16>
    %cst_54 = arith.constant dense<0.000000e+00> : vector<8x32xf32>
    %134 = tpu.matmul %132, %133, %cst_54 {dimension_numbers = #tpu.dot_dimension_numbers<[1], [0], [0], [1], [0, 0, 1, 1], [], []>} : vector<8x8xbf16>, vector<8x32xbf16>, vector<8x32xf32> -> vector<8x32xf32>
    %135 = arith.addf %111, %134 : vector<8x32xf32>
    %c0_55 = arith.constant 0 : index
    %c0_56 = arith.constant 0 : index
    %c0_57 = arith.constant 0 : index
    %136 = vector.load %arg12[%c0_55, %c0_56, %c0_57] : memref<2x1x32xf32, #tpu.memory_space<vmem>>, vector<1x1x32xf32>
    %137 = vector.shape_cast %136 : vector<1x1x32xf32> to vector<1x32xf32>
    %138 = vector.broadcast %137 : vector<1x32xf32> to vector<8x32xf32>
    %139 = arith.addf %135, %138 : vector<8x32xf32>
    %140 = arith.addf %20, %139 : vector<8x32xf32>
    %141 = vector.extract_strided_slice %22 {offsets = [0, 0], sizes = [1, 32], strides = [1, 1]} : vector<3x32xf32> to vector<1x32xf32>
    %142 = vector.extract_strided_slice %24 {offsets = [0, 0], sizes = [1, 32], strides = [1, 1]} : vector<3x32xf32> to vector<1x32xf32>
    %cst_58 = arith.constant dense<0.000000e+00> : vector<8xf32>
    %143 = vector.multi_reduction <add>, %140, %cst_58 [1] : vector<8x32xf32> to vector<8xf32>
    %144 = vector.shape_cast %143 : vector<8xf32> to vector<8x1xf32>
    %cst_59 = arith.constant 3.200000e+01 : f32
    %145 = vector.broadcast %cst_59 : f32 to vector<8x1xf32>
    %146 = arith.divf %144, %145 : vector<8x1xf32>
    %147 = vector.broadcast %146 : vector<8x1xf32> to vector<8x32xf32>
    %148 = arith.subf %140, %147 : vector<8x32xf32>
    %149 = arith.mulf %148, %148 : vector<8x32xf32>
    %cst_60 = arith.constant dense<0.000000e+00> : vector<8xf32>
    %150 = vector.multi_reduction <add>, %149, %cst_60 [1] : vector<8x32xf32> to vector<8xf32>
    %151 = vector.shape_cast %150 : vector<8xf32> to vector<8x1xf32>
    %cst_61 = arith.constant 3.200000e+01 : f32
    %152 = vector.broadcast %cst_61 : f32 to vector<8x1xf32>
    %153 = arith.divf %151, %152 : vector<8x1xf32>
    %cst_62 = arith.constant 9.99999974E-6 : f32
    %154 = vector.broadcast %cst_62 : f32 to vector<8x1xf32>
    %155 = arith.addf %153, %154 : vector<8x1xf32>
    %156 = math.rsqrt %155 : vector<8x1xf32>
    %157 = vector.broadcast %156 : vector<8x1xf32> to vector<8x32xf32>
    %158 = arith.mulf %148, %157 : vector<8x32xf32>
    %159 = vector.broadcast %141 : vector<1x32xf32> to vector<8x32xf32>
    %160 = arith.mulf %158, %159 : vector<8x32xf32>
    %161 = vector.broadcast %142 : vector<1x32xf32> to vector<8x32xf32>
    %162 = arith.addf %160, %161 : vector<8x32xf32>
    %c0_63 = arith.constant 0 : index
    %c0_64 = arith.constant 0 : index
    %c0_65 = arith.constant 0 : index
    %163 = vector.load %arg13[%c0_63, %c0_64, %c0_65] : memref<2x32x32xf32, #tpu.memory_space<vmem>>, vector<1x32x32xf32>
    %164 = vector.shape_cast %163 : vector<1x32x32xf32> to vector<32x32xf32>
    %165 = arith.truncf %162 : vector<8x32xf32> to vector<8x32xbf16>
    %166 = arith.truncf %164 : vector<32x32xf32> to vector<32x32xbf16>
    %cst_66 = arith.constant dense<0.000000e+00> : vector<8x32xf32>
    %167 = tpu.matmul %165, %166, %cst_66 {dimension_numbers = #tpu.dot_dimension_numbers<[1], [0], [0], [1], [0, 0, 1, 1], [], []>} : vector<8x32xbf16>, vector<32x32xbf16>, vector<8x32xf32> -> vector<8x32xf32>
    %c0_67 = arith.constant 0 : index
    %c0_68 = arith.constant 0 : index
    %c0_69 = arith.constant 0 : index
    %168 = vector.load %arg14[%c0_67, %c0_68, %c0_69] : memref<2x1x32xf32, #tpu.memory_space<vmem>>, vector<1x1x32xf32>
    %169 = vector.shape_cast %168 : vector<1x1x32xf32> to vector<1x32xf32>
    %170 = vector.broadcast %169 : vector<1x32xf32> to vector<8x32xf32>
    %171 = arith.addf %167, %170 : vector<8x32xf32>
    %cst_70 = arith.constant 0.353553385 : f32
    %172 = vector.broadcast %cst_70 : f32 to vector<8x32xf32>
    %173 = arith.mulf %171, %172 : vector<8x32xf32>
    %c0_71 = arith.constant 0 : index
    %c0_72 = arith.constant 0 : index
    %c0_73 = arith.constant 0 : index
    %174 = vector.load %arg15[%c0_71, %c0_72, %c0_73] : memref<2x32x64xf32, #tpu.memory_space<vmem>>, vector<1x32x64xf32>
    %175 = vector.shape_cast %174 : vector<1x32x64xf32> to vector<32x64xf32>
    %176 = arith.truncf %19 : vector<65x32xf32> to vector<65x32xbf16>
    %177 = arith.truncf %175 : vector<32x64xf32> to vector<32x64xbf16>
    %cst_74 = arith.constant dense<0.000000e+00> : vector<65x64xf32>
    %178 = tpu.matmul %176, %177, %cst_74 {dimension_numbers = #tpu.dot_dimension_numbers<[1], [0], [0], [1], [0, 0, 1, 1], [], []>} : vector<65x32xbf16>, vector<32x64xbf16>, vector<65x64xf32> -> vector<65x64xf32>
    %c0_75 = arith.constant 0 : index
    %c0_76 = arith.constant 0 : index
    %c0_77 = arith.constant 0 : index
    %179 = vector.load %arg16[%c0_75, %c0_76, %c0_77] : memref<2x1x64xf32, #tpu.memory_space<vmem>>, vector<1x1x64xf32>
    %180 = vector.shape_cast %179 : vector<1x1x64xf32> to vector<1x64xf32>
    %181 = vector.broadcast %180 : vector<1x64xf32> to vector<65x64xf32>
    %182 = arith.addf %178, %181 : vector<65x64xf32>
    %183 = vector.extract_strided_slice %182 {offsets = [0, 0], sizes = [65, 32], strides = [1, 1]} : vector<65x64xf32> to vector<65x32xf32>
    %184 = vector.extract_strided_slice %182 {offsets = [0, 32], sizes = [65, 32], strides = [1, 1]} : vector<65x64xf32> to vector<65x32xf32>
    %c0_78 = arith.constant 0 : index
    %c0_79 = arith.constant 0 : index
    %c0_80 = arith.constant 0 : index
    %185 = vector.load %arg17[%c0_78, %c0_79, %c0_80] : memref<2x32x32xf32, #tpu.memory_space<vmem>>, vector<1x32x32xf32>
    %186 = vector.shape_cast %185 : vector<1x32x32xf32> to vector<32x32xf32>
    %187 = vector.extract_strided_slice %173 {offsets = [0, 0], sizes = [8, 8], strides = [1, 1]} : vector<8x32xf32> to vector<8x8xf32>
    %188 = vector.extract_strided_slice %183 {offsets = [0, 0], sizes = [65, 8], strides = [1, 1]} : vector<65x32xf32> to vector<65x8xf32>
    %189 = arith.truncf %187 : vector<8x8xf32> to vector<8x8xbf16>
    %190 = arith.truncf %188 : vector<65x8xf32> to vector<65x8xbf16>
    %cst_81 = arith.constant dense<0.000000e+00> : vector<8x65xf32>
    %191 = tpu.matmul %189, %190, %cst_81 {dimension_numbers = #tpu.dot_dimension_numbers<[1], [1], [0], [0], [0, 0, 1, 0], [], []>} : vector<8x8xbf16>, vector<65x8xbf16>, vector<8x65xf32> -> vector<8x65xf32>
    %cst_82 = arith.constant dense<0xFF800000> : vector<8xf32>
    %192 = vector.multi_reduction <maximumf>, %191, %cst_82 [1] : vector<8x65xf32> to vector<8xf32>
    %193 = vector.shape_cast %192 : vector<8xf32> to vector<8x1xf32>
    %194 = vector.broadcast %193 : vector<8x1xf32> to vector<8x65xf32>
    %195 = arith.subf %191, %194 : vector<8x65xf32>
    %196 = math.exp %195 : vector<8x65xf32>
    %cst_83 = arith.constant dense<0.000000e+00> : vector<8xf32>
    %197 = vector.multi_reduction <add>, %196, %cst_83 [1] : vector<8x65xf32> to vector<8xf32>
    %198 = vector.shape_cast %197 : vector<8xf32> to vector<8x1xf32>
    %199 = tpu.reciprocal %198 {approx = true} : vector<8x1xf32> -> vector<8x1xf32>
    %200 = vector.broadcast %199 : vector<8x1xf32> to vector<8x65xf32>
    %201 = arith.mulf %196, %200 : vector<8x65xf32>
    %202 = vector.extract_strided_slice %184 {offsets = [0, 0], sizes = [65, 8], strides = [1, 1]} : vector<65x32xf32> to vector<65x8xf32>
    %203 = arith.truncf %201 : vector<8x65xf32> to vector<8x65xbf16>
    %204 = arith.truncf %202 : vector<65x8xf32> to vector<65x8xbf16>
    %cst_84 = arith.constant dense<0.000000e+00> : vector<8x8xf32>
    %205 = tpu.matmul %203, %204, %cst_84 {dimension_numbers = #tpu.dot_dimension_numbers<[1], [0], [0], [1], [0, 0, 1, 1], [], []>} : vector<8x65xbf16>, vector<65x8xbf16>, vector<8x8xf32> -> vector<8x8xf32>
    %206 = vector.extract_strided_slice %186 {offsets = [0, 0], sizes = [8, 32], strides = [1, 1]} : vector<32x32xf32> to vector<8x32xf32>
    %207 = arith.truncf %205 : vector<8x8xf32> to vector<8x8xbf16>
    %208 = arith.truncf %206 : vector<8x32xf32> to vector<8x32xbf16>
    %cst_85 = arith.constant dense<0.000000e+00> : vector<8x32xf32>
    %209 = tpu.matmul %207, %208, %cst_85 {dimension_numbers = #tpu.dot_dimension_numbers<[1], [0], [0], [1], [0, 0, 1, 1], [], []>} : vector<8x8xbf16>, vector<8x32xbf16>, vector<8x32xf32> -> vector<8x32xf32>
    %210 = vector.extract_strided_slice %173 {offsets = [0, 8], sizes = [8, 8], strides = [1, 1]} : vector<8x32xf32> to vector<8x8xf32>
    %211 = vector.extract_strided_slice %183 {offsets = [0, 8], sizes = [65, 8], strides = [1, 1]} : vector<65x32xf32> to vector<65x8xf32>
    %212 = arith.truncf %210 : vector<8x8xf32> to vector<8x8xbf16>
    %213 = arith.truncf %211 : vector<65x8xf32> to vector<65x8xbf16>
    %cst_86 = arith.constant dense<0.000000e+00> : vector<8x65xf32>
    %214 = tpu.matmul %212, %213, %cst_86 {dimension_numbers = #tpu.dot_dimension_numbers<[1], [1], [0], [0], [0, 0, 1, 0], [], []>} : vector<8x8xbf16>, vector<65x8xbf16>, vector<8x65xf32> -> vector<8x65xf32>
    %cst_87 = arith.constant dense<0xFF800000> : vector<8xf32>
    %215 = vector.multi_reduction <maximumf>, %214, %cst_87 [1] : vector<8x65xf32> to vector<8xf32>
    %216 = vector.shape_cast %215 : vector<8xf32> to vector<8x1xf32>
    %217 = vector.broadcast %216 : vector<8x1xf32> to vector<8x65xf32>
    %218 = arith.subf %214, %217 : vector<8x65xf32>
    %219 = math.exp %218 : vector<8x65xf32>
    %cst_88 = arith.constant dense<0.000000e+00> : vector<8xf32>
    %220 = vector.multi_reduction <add>, %219, %cst_88 [1] : vector<8x65xf32> to vector<8xf32>
    %221 = vector.shape_cast %220 : vector<8xf32> to vector<8x1xf32>
    %222 = tpu.reciprocal %221 {approx = true} : vector<8x1xf32> -> vector<8x1xf32>
    %223 = vector.broadcast %222 : vector<8x1xf32> to vector<8x65xf32>
    %224 = arith.mulf %219, %223 : vector<8x65xf32>
    %225 = vector.extract_strided_slice %184 {offsets = [0, 8], sizes = [65, 8], strides = [1, 1]} : vector<65x32xf32> to vector<65x8xf32>
    %226 = arith.truncf %224 : vector<8x65xf32> to vector<8x65xbf16>
    %227 = arith.truncf %225 : vector<65x8xf32> to vector<65x8xbf16>
    %cst_89 = arith.constant dense<0.000000e+00> : vector<8x8xf32>
    %228 = tpu.matmul %226, %227, %cst_89 {dimension_numbers = #tpu.dot_dimension_numbers<[1], [0], [0], [1], [0, 0, 1, 1], [], []>} : vector<8x65xbf16>, vector<65x8xbf16>, vector<8x8xf32> -> vector<8x8xf32>
    %229 = vector.extract_strided_slice %186 {offsets = [8, 0], sizes = [8, 32], strides = [1, 1]} : vector<32x32xf32> to vector<8x32xf32>
    %230 = arith.truncf %228 : vector<8x8xf32> to vector<8x8xbf16>
    %231 = arith.truncf %229 : vector<8x32xf32> to vector<8x32xbf16>
    %cst_90 = arith.constant dense<0.000000e+00> : vector<8x32xf32>
    %232 = tpu.matmul %230, %231, %cst_90 {dimension_numbers = #tpu.dot_dimension_numbers<[1], [0], [0], [1], [0, 0, 1, 1], [], []>} : vector<8x8xbf16>, vector<8x32xbf16>, vector<8x32xf32> -> vector<8x32xf32>
    %233 = arith.addf %209, %232 : vector<8x32xf32>
    %234 = vector.extract_strided_slice %173 {offsets = [0, 16], sizes = [8, 8], strides = [1, 1]} : vector<8x32xf32> to vector<8x8xf32>
    %235 = vector.extract_strided_slice %183 {offsets = [0, 16], sizes = [65, 8], strides = [1, 1]} : vector<65x32xf32> to vector<65x8xf32>
    %236 = arith.truncf %234 : vector<8x8xf32> to vector<8x8xbf16>
    %237 = arith.truncf %235 : vector<65x8xf32> to vector<65x8xbf16>
    %cst_91 = arith.constant dense<0.000000e+00> : vector<8x65xf32>
    %238 = tpu.matmul %236, %237, %cst_91 {dimension_numbers = #tpu.dot_dimension_numbers<[1], [1], [0], [0], [0, 0, 1, 0], [], []>} : vector<8x8xbf16>, vector<65x8xbf16>, vector<8x65xf32> -> vector<8x65xf32>
    %cst_92 = arith.constant dense<0xFF800000> : vector<8xf32>
    %239 = vector.multi_reduction <maximumf>, %238, %cst_92 [1] : vector<8x65xf32> to vector<8xf32>
    %240 = vector.shape_cast %239 : vector<8xf32> to vector<8x1xf32>
    %241 = vector.broadcast %240 : vector<8x1xf32> to vector<8x65xf32>
    %242 = arith.subf %238, %241 : vector<8x65xf32>
    %243 = math.exp %242 : vector<8x65xf32>
    %cst_93 = arith.constant dense<0.000000e+00> : vector<8xf32>
    %244 = vector.multi_reduction <add>, %243, %cst_93 [1] : vector<8x65xf32> to vector<8xf32>
    %245 = vector.shape_cast %244 : vector<8xf32> to vector<8x1xf32>
    %246 = tpu.reciprocal %245 {approx = true} : vector<8x1xf32> -> vector<8x1xf32>
    %247 = vector.broadcast %246 : vector<8x1xf32> to vector<8x65xf32>
    %248 = arith.mulf %243, %247 : vector<8x65xf32>
    %249 = vector.extract_strided_slice %184 {offsets = [0, 16], sizes = [65, 8], strides = [1, 1]} : vector<65x32xf32> to vector<65x8xf32>
    %250 = arith.truncf %248 : vector<8x65xf32> to vector<8x65xbf16>
    %251 = arith.truncf %249 : vector<65x8xf32> to vector<65x8xbf16>
    %cst_94 = arith.constant dense<0.000000e+00> : vector<8x8xf32>
    %252 = tpu.matmul %250, %251, %cst_94 {dimension_numbers = #tpu.dot_dimension_numbers<[1], [0], [0], [1], [0, 0, 1, 1], [], []>} : vector<8x65xbf16>, vector<65x8xbf16>, vector<8x8xf32> -> vector<8x8xf32>
    %253 = vector.extract_strided_slice %186 {offsets = [16, 0], sizes = [8, 32], strides = [1, 1]} : vector<32x32xf32> to vector<8x32xf32>
    %254 = arith.truncf %252 : vector<8x8xf32> to vector<8x8xbf16>
    %255 = arith.truncf %253 : vector<8x32xf32> to vector<8x32xbf16>
    %cst_95 = arith.constant dense<0.000000e+00> : vector<8x32xf32>
    %256 = tpu.matmul %254, %255, %cst_95 {dimension_numbers = #tpu.dot_dimension_numbers<[1], [0], [0], [1], [0, 0, 1, 1], [], []>} : vector<8x8xbf16>, vector<8x32xbf16>, vector<8x32xf32> -> vector<8x32xf32>
    %257 = arith.addf %233, %256 : vector<8x32xf32>
    %258 = vector.extract_strided_slice %173 {offsets = [0, 24], sizes = [8, 8], strides = [1, 1]} : vector<8x32xf32> to vector<8x8xf32>
    %259 = vector.extract_strided_slice %183 {offsets = [0, 24], sizes = [65, 8], strides = [1, 1]} : vector<65x32xf32> to vector<65x8xf32>
    %260 = arith.truncf %258 : vector<8x8xf32> to vector<8x8xbf16>
    %261 = arith.truncf %259 : vector<65x8xf32> to vector<65x8xbf16>
    %cst_96 = arith.constant dense<0.000000e+00> : vector<8x65xf32>
    %262 = tpu.matmul %260, %261, %cst_96 {dimension_numbers = #tpu.dot_dimension_numbers<[1], [1], [0], [0], [0, 0, 1, 0], [], []>} : vector<8x8xbf16>, vector<65x8xbf16>, vector<8x65xf32> -> vector<8x65xf32>
    %cst_97 = arith.constant dense<0xFF800000> : vector<8xf32>
    %263 = vector.multi_reduction <maximumf>, %262, %cst_97 [1] : vector<8x65xf32> to vector<8xf32>
    %264 = vector.shape_cast %263 : vector<8xf32> to vector<8x1xf32>
    %265 = vector.broadcast %264 : vector<8x1xf32> to vector<8x65xf32>
    %266 = arith.subf %262, %265 : vector<8x65xf32>
    %267 = math.exp %266 : vector<8x65xf32>
    %cst_98 = arith.constant dense<0.000000e+00> : vector<8xf32>
    %268 = vector.multi_reduction <add>, %267, %cst_98 [1] : vector<8x65xf32> to vector<8xf32>
    %269 = vector.shape_cast %268 : vector<8xf32> to vector<8x1xf32>
    %270 = tpu.reciprocal %269 {approx = true} : vector<8x1xf32> -> vector<8x1xf32>
    %271 = vector.broadcast %270 : vector<8x1xf32> to vector<8x65xf32>
    %272 = arith.mulf %267, %271 : vector<8x65xf32>
    %273 = vector.extract_strided_slice %184 {offsets = [0, 24], sizes = [65, 8], strides = [1, 1]} : vector<65x32xf32> to vector<65x8xf32>
    %274 = arith.truncf %272 : vector<8x65xf32> to vector<8x65xbf16>
    %275 = arith.truncf %273 : vector<65x8xf32> to vector<65x8xbf16>
    %cst_99 = arith.constant dense<0.000000e+00> : vector<8x8xf32>
    %276 = tpu.matmul %274, %275, %cst_99 {dimension_numbers = #tpu.dot_dimension_numbers<[1], [0], [0], [1], [0, 0, 1, 1], [], []>} : vector<8x65xbf16>, vector<65x8xbf16>, vector<8x8xf32> -> vector<8x8xf32>
    %277 = vector.extract_strided_slice %186 {offsets = [24, 0], sizes = [8, 32], strides = [1, 1]} : vector<32x32xf32> to vector<8x32xf32>
    %278 = arith.truncf %276 : vector<8x8xf32> to vector<8x8xbf16>
    %279 = arith.truncf %277 : vector<8x32xf32> to vector<8x32xbf16>
    %cst_100 = arith.constant dense<0.000000e+00> : vector<8x32xf32>
    %280 = tpu.matmul %278, %279, %cst_100 {dimension_numbers = #tpu.dot_dimension_numbers<[1], [0], [0], [1], [0, 0, 1, 1], [], []>} : vector<8x8xbf16>, vector<8x32xbf16>, vector<8x32xf32> -> vector<8x32xf32>
    %281 = arith.addf %257, %280 : vector<8x32xf32>
    %c0_101 = arith.constant 0 : index
    %c0_102 = arith.constant 0 : index
    %c0_103 = arith.constant 0 : index
    %282 = vector.load %arg18[%c0_101, %c0_102, %c0_103] : memref<2x1x32xf32, #tpu.memory_space<vmem>>, vector<1x1x32xf32>
    %283 = vector.shape_cast %282 : vector<1x1x32xf32> to vector<1x32xf32>
    %284 = vector.broadcast %283 : vector<1x32xf32> to vector<8x32xf32>
    %285 = arith.addf %281, %284 : vector<8x32xf32>
    %286 = arith.addf %162, %285 : vector<8x32xf32>
    %287 = vector.extract_strided_slice %22 {offsets = [1, 0], sizes = [1, 32], strides = [1, 1]} : vector<3x32xf32> to vector<1x32xf32>
    %288 = vector.extract_strided_slice %24 {offsets = [1, 0], sizes = [1, 32], strides = [1, 1]} : vector<3x32xf32> to vector<1x32xf32>
    %cst_104 = arith.constant dense<0.000000e+00> : vector<8xf32>
    %289 = vector.multi_reduction <add>, %286, %cst_104 [1] : vector<8x32xf32> to vector<8xf32>
    %290 = vector.shape_cast %289 : vector<8xf32> to vector<8x1xf32>
    %cst_105 = arith.constant 3.200000e+01 : f32
    %291 = vector.broadcast %cst_105 : f32 to vector<8x1xf32>
    %292 = arith.divf %290, %291 : vector<8x1xf32>
    %293 = vector.broadcast %292 : vector<8x1xf32> to vector<8x32xf32>
    %294 = arith.subf %286, %293 : vector<8x32xf32>
    %295 = arith.mulf %294, %294 : vector<8x32xf32>
    %cst_106 = arith.constant dense<0.000000e+00> : vector<8xf32>
    %296 = vector.multi_reduction <add>, %295, %cst_106 [1] : vector<8x32xf32> to vector<8xf32>
    %297 = vector.shape_cast %296 : vector<8xf32> to vector<8x1xf32>
    %cst_107 = arith.constant 3.200000e+01 : f32
    %298 = vector.broadcast %cst_107 : f32 to vector<8x1xf32>
    %299 = arith.divf %297, %298 : vector<8x1xf32>
    %cst_108 = arith.constant 9.99999974E-6 : f32
    %300 = vector.broadcast %cst_108 : f32 to vector<8x1xf32>
    %301 = arith.addf %299, %300 : vector<8x1xf32>
    %302 = math.rsqrt %301 : vector<8x1xf32>
    %303 = vector.broadcast %302 : vector<8x1xf32> to vector<8x32xf32>
    %304 = arith.mulf %294, %303 : vector<8x32xf32>
    %305 = vector.broadcast %287 : vector<1x32xf32> to vector<8x32xf32>
    %306 = arith.mulf %304, %305 : vector<8x32xf32>
    %307 = vector.broadcast %288 : vector<1x32xf32> to vector<8x32xf32>
    %308 = arith.addf %306, %307 : vector<8x32xf32>
    %c0_109 = arith.constant 0 : index
    %c0_110 = arith.constant 0 : index
    %c0_111 = arith.constant 0 : index
    %309 = vector.load %arg19[%c0_109, %c0_110, %c0_111] : memref<2x32x64xf32, #tpu.memory_space<vmem>>, vector<1x32x64xf32>
    %310 = vector.shape_cast %309 : vector<1x32x64xf32> to vector<32x64xf32>
    %311 = arith.truncf %308 : vector<8x32xf32> to vector<8x32xbf16>
    %312 = arith.truncf %310 : vector<32x64xf32> to vector<32x64xbf16>
    %cst_112 = arith.constant dense<0.000000e+00> : vector<8x64xf32>
    %313 = tpu.matmul %311, %312, %cst_112 {dimension_numbers = #tpu.dot_dimension_numbers<[1], [0], [0], [1], [0, 0, 1, 1], [], []>} : vector<8x32xbf16>, vector<32x64xbf16>, vector<8x64xf32> -> vector<8x64xf32>
    %c0_113 = arith.constant 0 : index
    %c0_114 = arith.constant 0 : index
    %c0_115 = arith.constant 0 : index
    %314 = vector.load %arg20[%c0_113, %c0_114, %c0_115] : memref<2x1x64xf32, #tpu.memory_space<vmem>>, vector<1x1x64xf32>
    %315 = vector.shape_cast %314 : vector<1x1x64xf32> to vector<1x64xf32>
    %316 = vector.broadcast %315 : vector<1x64xf32> to vector<8x64xf32>
    %317 = arith.addf %313, %316 : vector<8x64xf32>
    %cst_116 = arith.constant 0.000000e+00 : f32
    %318 = vector.broadcast %cst_116 : f32 to vector<8x64xf32>
    %319 = arith.maximumf %317, %318 : vector<8x64xf32>
    %c0_117 = arith.constant 0 : index
    %c0_118 = arith.constant 0 : index
    %c0_119 = arith.constant 0 : index
    %320 = vector.load %arg21[%c0_117, %c0_118, %c0_119] : memref<2x64x32xf32, #tpu.memory_space<vmem>>, vector<1x64x32xf32>
    %321 = vector.shape_cast %320 : vector<1x64x32xf32> to vector<64x32xf32>
    %322 = arith.truncf %319 : vector<8x64xf32> to vector<8x64xbf16>
    %323 = arith.truncf %321 : vector<64x32xf32> to vector<64x32xbf16>
    %cst_120 = arith.constant dense<0.000000e+00> : vector<8x32xf32>
    %324 = tpu.matmul %322, %323, %cst_120 {dimension_numbers = #tpu.dot_dimension_numbers<[1], [0], [0], [1], [0, 0, 1, 1], [], []>} : vector<8x64xbf16>, vector<64x32xbf16>, vector<8x32xf32> -> vector<8x32xf32>
    %c0_121 = arith.constant 0 : index
    %c0_122 = arith.constant 0 : index
    %c0_123 = arith.constant 0 : index
    %325 = vector.load %arg22[%c0_121, %c0_122, %c0_123] : memref<2x1x32xf32, #tpu.memory_space<vmem>>, vector<1x1x32xf32>
    %326 = vector.shape_cast %325 : vector<1x1x32xf32> to vector<1x32xf32>
    %327 = vector.broadcast %326 : vector<1x32xf32> to vector<8x32xf32>
    %328 = arith.addf %324, %327 : vector<8x32xf32>
    %329 = arith.addf %308, %328 : vector<8x32xf32>
    %330 = vector.extract_strided_slice %22 {offsets = [2, 0], sizes = [1, 32], strides = [1, 1]} : vector<3x32xf32> to vector<1x32xf32>
    %331 = vector.extract_strided_slice %24 {offsets = [2, 0], sizes = [1, 32], strides = [1, 1]} : vector<3x32xf32> to vector<1x32xf32>
    %cst_124 = arith.constant dense<0.000000e+00> : vector<8xf32>
    %332 = vector.multi_reduction <add>, %329, %cst_124 [1] : vector<8x32xf32> to vector<8xf32>
    %333 = vector.shape_cast %332 : vector<8xf32> to vector<8x1xf32>
    %cst_125 = arith.constant 3.200000e+01 : f32
    %334 = vector.broadcast %cst_125 : f32 to vector<8x1xf32>
    %335 = arith.divf %333, %334 : vector<8x1xf32>
    %336 = vector.broadcast %335 : vector<8x1xf32> to vector<8x32xf32>
    %337 = arith.subf %329, %336 : vector<8x32xf32>
    %338 = arith.mulf %337, %337 : vector<8x32xf32>
    %cst_126 = arith.constant dense<0.000000e+00> : vector<8xf32>
    %339 = vector.multi_reduction <add>, %338, %cst_126 [1] : vector<8x32xf32> to vector<8xf32>
    %340 = vector.shape_cast %339 : vector<8xf32> to vector<8x1xf32>
    %cst_127 = arith.constant 3.200000e+01 : f32
    %341 = vector.broadcast %cst_127 : f32 to vector<8x1xf32>
    %342 = arith.divf %340, %341 : vector<8x1xf32>
    %cst_128 = arith.constant 9.99999974E-6 : f32
    %343 = vector.broadcast %cst_128 : f32 to vector<8x1xf32>
    %344 = arith.addf %342, %343 : vector<8x1xf32>
    %345 = math.rsqrt %344 : vector<8x1xf32>
    %346 = vector.broadcast %345 : vector<8x1xf32> to vector<8x32xf32>
    %347 = arith.mulf %337, %346 : vector<8x32xf32>
    %348 = vector.broadcast %330 : vector<1x32xf32> to vector<8x32xf32>
    %349 = arith.mulf %347, %348 : vector<8x32xf32>
    %350 = vector.broadcast %331 : vector<1x32xf32> to vector<8x32xf32>
    %351 = arith.addf %349, %350 : vector<8x32xf32>
    %c1 = arith.constant 1 : index
    %c0_129 = arith.constant 0 : index
    %c0_130 = arith.constant 0 : index
    %352 = vector.load %arg23[%c1, %c0_129, %c0_130] : memref<2x3x32xf32, #tpu.memory_space<vmem>>, vector<1x3x32xf32>
    %353 = vector.shape_cast %352 : vector<1x3x32xf32> to vector<3x32xf32>
    %c1_131 = arith.constant 1 : index
    %c0_132 = arith.constant 0 : index
    %c0_133 = arith.constant 0 : index
    %354 = vector.load %arg24[%c1_131, %c0_132, %c0_133] : memref<2x3x32xf32, #tpu.memory_space<vmem>>, vector<1x3x32xf32>
    %355 = vector.shape_cast %354 : vector<1x3x32xf32> to vector<3x32xf32>
    %c1_134 = arith.constant 1 : index
    %c0_135 = arith.constant 0 : index
    %c0_136 = arith.constant 0 : index
    %356 = vector.load %arg9[%c1_134, %c0_135, %c0_136] : memref<2x32x96xf32, #tpu.memory_space<vmem>>, vector<1x32x96xf32>
    %357 = vector.shape_cast %356 : vector<1x32x96xf32> to vector<32x96xf32>
    %358 = arith.truncf %351 : vector<8x32xf32> to vector<8x32xbf16>
    %359 = arith.truncf %357 : vector<32x96xf32> to vector<32x96xbf16>
    %cst_137 = arith.constant dense<0.000000e+00> : vector<8x96xf32>
    %360 = tpu.matmul %358, %359, %cst_137 {dimension_numbers = #tpu.dot_dimension_numbers<[1], [0], [0], [1], [0, 0, 1, 1], [], []>} : vector<8x32xbf16>, vector<32x96xbf16>, vector<8x96xf32> -> vector<8x96xf32>
    %c1_138 = arith.constant 1 : index
    %c0_139 = arith.constant 0 : index
    %c0_140 = arith.constant 0 : index
    %361 = vector.load %arg10[%c1_138, %c0_139, %c0_140] : memref<2x1x96xf32, #tpu.memory_space<vmem>>, vector<1x1x96xf32>
    %362 = vector.shape_cast %361 : vector<1x1x96xf32> to vector<1x96xf32>
    %363 = vector.broadcast %362 : vector<1x96xf32> to vector<8x96xf32>
    %364 = arith.addf %360, %363 : vector<8x96xf32>
    %365 = vector.extract_strided_slice %364 {offsets = [0, 0], sizes = [8, 32], strides = [1, 1]} : vector<8x96xf32> to vector<8x32xf32>
    %cst_141 = arith.constant 0.353553385 : f32
    %366 = vector.broadcast %cst_141 : f32 to vector<8x32xf32>
    %367 = arith.mulf %365, %366 : vector<8x32xf32>
    %368 = vector.extract_strided_slice %364 {offsets = [0, 32], sizes = [8, 32], strides = [1, 1]} : vector<8x96xf32> to vector<8x32xf32>
    %369 = vector.extract_strided_slice %364 {offsets = [0, 64], sizes = [8, 32], strides = [1, 1]} : vector<8x96xf32> to vector<8x32xf32>
    %c1_142 = arith.constant 1 : index
    %c0_143 = arith.constant 0 : index
    %c0_144 = arith.constant 0 : index
    %370 = vector.load %arg11[%c1_142, %c0_143, %c0_144] : memref<2x32x32xf32, #tpu.memory_space<vmem>>, vector<1x32x32xf32>
    %371 = vector.shape_cast %370 : vector<1x32x32xf32> to vector<32x32xf32>
    %372 = vector.extract_strided_slice %367 {offsets = [0, 0], sizes = [8, 8], strides = [1, 1]} : vector<8x32xf32> to vector<8x8xf32>
    %373 = vector.extract_strided_slice %368 {offsets = [0, 0], sizes = [8, 8], strides = [1, 1]} : vector<8x32xf32> to vector<8x8xf32>
    %374 = arith.truncf %372 : vector<8x8xf32> to vector<8x8xbf16>
    %375 = arith.truncf %373 : vector<8x8xf32> to vector<8x8xbf16>
    %cst_145 = arith.constant dense<0.000000e+00> : vector<8x8xf32>
    %376 = tpu.matmul %374, %375, %cst_145 {dimension_numbers = #tpu.dot_dimension_numbers<[1], [1], [0], [0], [0, 0, 1, 0], [], []>} : vector<8x8xbf16>, vector<8x8xbf16>, vector<8x8xf32> -> vector<8x8xf32>
    %cst_146 = arith.constant dense<0xFF800000> : vector<8xf32>
    %377 = vector.multi_reduction <maximumf>, %376, %cst_146 [1] : vector<8x8xf32> to vector<8xf32>
    %378 = vector.shape_cast %377 : vector<8xf32> to vector<8x1xf32>
    %379 = vector.broadcast %378 : vector<8x1xf32> to vector<8x8xf32>
    %380 = arith.subf %376, %379 : vector<8x8xf32>
    %381 = math.exp %380 : vector<8x8xf32>
    %cst_147 = arith.constant dense<0.000000e+00> : vector<8xf32>
    %382 = vector.multi_reduction <add>, %381, %cst_147 [1] : vector<8x8xf32> to vector<8xf32>
    %383 = vector.shape_cast %382 : vector<8xf32> to vector<8x1xf32>
    %384 = tpu.reciprocal %383 {approx = true} : vector<8x1xf32> -> vector<8x1xf32>
    %385 = vector.broadcast %384 : vector<8x1xf32> to vector<8x8xf32>
    %386 = arith.mulf %381, %385 : vector<8x8xf32>
    %387 = vector.extract_strided_slice %369 {offsets = [0, 0], sizes = [8, 8], strides = [1, 1]} : vector<8x32xf32> to vector<8x8xf32>
    %388 = arith.truncf %386 : vector<8x8xf32> to vector<8x8xbf16>
    %389 = arith.truncf %387 : vector<8x8xf32> to vector<8x8xbf16>
    %cst_148 = arith.constant dense<0.000000e+00> : vector<8x8xf32>
    %390 = tpu.matmul %388, %389, %cst_148 {dimension_numbers = #tpu.dot_dimension_numbers<[1], [0], [0], [1], [0, 0, 1, 1], [], []>} : vector<8x8xbf16>, vector<8x8xbf16>, vector<8x8xf32> -> vector<8x8xf32>
    %391 = vector.extract_strided_slice %371 {offsets = [0, 0], sizes = [8, 32], strides = [1, 1]} : vector<32x32xf32> to vector<8x32xf32>
    %392 = arith.truncf %390 : vector<8x8xf32> to vector<8x8xbf16>
    %393 = arith.truncf %391 : vector<8x32xf32> to vector<8x32xbf16>
    %cst_149 = arith.constant dense<0.000000e+00> : vector<8x32xf32>
    %394 = tpu.matmul %392, %393, %cst_149 {dimension_numbers = #tpu.dot_dimension_numbers<[1], [0], [0], [1], [0, 0, 1, 1], [], []>} : vector<8x8xbf16>, vector<8x32xbf16>, vector<8x32xf32> -> vector<8x32xf32>
    %395 = vector.extract_strided_slice %367 {offsets = [0, 8], sizes = [8, 8], strides = [1, 1]} : vector<8x32xf32> to vector<8x8xf32>
    %396 = vector.extract_strided_slice %368 {offsets = [0, 8], sizes = [8, 8], strides = [1, 1]} : vector<8x32xf32> to vector<8x8xf32>
    %397 = arith.truncf %395 : vector<8x8xf32> to vector<8x8xbf16>
    %398 = arith.truncf %396 : vector<8x8xf32> to vector<8x8xbf16>
    %cst_150 = arith.constant dense<0.000000e+00> : vector<8x8xf32>
    %399 = tpu.matmul %397, %398, %cst_150 {dimension_numbers = #tpu.dot_dimension_numbers<[1], [1], [0], [0], [0, 0, 1, 0], [], []>} : vector<8x8xbf16>, vector<8x8xbf16>, vector<8x8xf32> -> vector<8x8xf32>
    %cst_151 = arith.constant dense<0xFF800000> : vector<8xf32>
    %400 = vector.multi_reduction <maximumf>, %399, %cst_151 [1] : vector<8x8xf32> to vector<8xf32>
    %401 = vector.shape_cast %400 : vector<8xf32> to vector<8x1xf32>
    %402 = vector.broadcast %401 : vector<8x1xf32> to vector<8x8xf32>
    %403 = arith.subf %399, %402 : vector<8x8xf32>
    %404 = math.exp %403 : vector<8x8xf32>
    %cst_152 = arith.constant dense<0.000000e+00> : vector<8xf32>
    %405 = vector.multi_reduction <add>, %404, %cst_152 [1] : vector<8x8xf32> to vector<8xf32>
    %406 = vector.shape_cast %405 : vector<8xf32> to vector<8x1xf32>
    %407 = tpu.reciprocal %406 {approx = true} : vector<8x1xf32> -> vector<8x1xf32>
    %408 = vector.broadcast %407 : vector<8x1xf32> to vector<8x8xf32>
    %409 = arith.mulf %404, %408 : vector<8x8xf32>
    %410 = vector.extract_strided_slice %369 {offsets = [0, 8], sizes = [8, 8], strides = [1, 1]} : vector<8x32xf32> to vector<8x8xf32>
    %411 = arith.truncf %409 : vector<8x8xf32> to vector<8x8xbf16>
    %412 = arith.truncf %410 : vector<8x8xf32> to vector<8x8xbf16>
    %cst_153 = arith.constant dense<0.000000e+00> : vector<8x8xf32>
    %413 = tpu.matmul %411, %412, %cst_153 {dimension_numbers = #tpu.dot_dimension_numbers<[1], [0], [0], [1], [0, 0, 1, 1], [], []>} : vector<8x8xbf16>, vector<8x8xbf16>, vector<8x8xf32> -> vector<8x8xf32>
    %414 = vector.extract_strided_slice %371 {offsets = [8, 0], sizes = [8, 32], strides = [1, 1]} : vector<32x32xf32> to vector<8x32xf32>
    %415 = arith.truncf %413 : vector<8x8xf32> to vector<8x8xbf16>
    %416 = arith.truncf %414 : vector<8x32xf32> to vector<8x32xbf16>
    %cst_154 = arith.constant dense<0.000000e+00> : vector<8x32xf32>
    %417 = tpu.matmul %415, %416, %cst_154 {dimension_numbers = #tpu.dot_dimension_numbers<[1], [0], [0], [1], [0, 0, 1, 1], [], []>} : vector<8x8xbf16>, vector<8x32xbf16>, vector<8x32xf32> -> vector<8x32xf32>
    %418 = arith.addf %394, %417 : vector<8x32xf32>
    %419 = vector.extract_strided_slice %367 {offsets = [0, 16], sizes = [8, 8], strides = [1, 1]} : vector<8x32xf32> to vector<8x8xf32>
    %420 = vector.extract_strided_slice %368 {offsets = [0, 16], sizes = [8, 8], strides = [1, 1]} : vector<8x32xf32> to vector<8x8xf32>
    %421 = arith.truncf %419 : vector<8x8xf32> to vector<8x8xbf16>
    %422 = arith.truncf %420 : vector<8x8xf32> to vector<8x8xbf16>
    %cst_155 = arith.constant dense<0.000000e+00> : vector<8x8xf32>
    %423 = tpu.matmul %421, %422, %cst_155 {dimension_numbers = #tpu.dot_dimension_numbers<[1], [1], [0], [0], [0, 0, 1, 0], [], []>} : vector<8x8xbf16>, vector<8x8xbf16>, vector<8x8xf32> -> vector<8x8xf32>
    %cst_156 = arith.constant dense<0xFF800000> : vector<8xf32>
    %424 = vector.multi_reduction <maximumf>, %423, %cst_156 [1] : vector<8x8xf32> to vector<8xf32>
    %425 = vector.shape_cast %424 : vector<8xf32> to vector<8x1xf32>
    %426 = vector.broadcast %425 : vector<8x1xf32> to vector<8x8xf32>
    %427 = arith.subf %423, %426 : vector<8x8xf32>
    %428 = math.exp %427 : vector<8x8xf32>
    %cst_157 = arith.constant dense<0.000000e+00> : vector<8xf32>
    %429 = vector.multi_reduction <add>, %428, %cst_157 [1] : vector<8x8xf32> to vector<8xf32>
    %430 = vector.shape_cast %429 : vector<8xf32> to vector<8x1xf32>
    %431 = tpu.reciprocal %430 {approx = true} : vector<8x1xf32> -> vector<8x1xf32>
    %432 = vector.broadcast %431 : vector<8x1xf32> to vector<8x8xf32>
    %433 = arith.mulf %428, %432 : vector<8x8xf32>
    %434 = vector.extract_strided_slice %369 {offsets = [0, 16], sizes = [8, 8], strides = [1, 1]} : vector<8x32xf32> to vector<8x8xf32>
    %435 = arith.truncf %433 : vector<8x8xf32> to vector<8x8xbf16>
    %436 = arith.truncf %434 : vector<8x8xf32> to vector<8x8xbf16>
    %cst_158 = arith.constant dense<0.000000e+00> : vector<8x8xf32>
    %437 = tpu.matmul %435, %436, %cst_158 {dimension_numbers = #tpu.dot_dimension_numbers<[1], [0], [0], [1], [0, 0, 1, 1], [], []>} : vector<8x8xbf16>, vector<8x8xbf16>, vector<8x8xf32> -> vector<8x8xf32>
    %438 = vector.extract_strided_slice %371 {offsets = [16, 0], sizes = [8, 32], strides = [1, 1]} : vector<32x32xf32> to vector<8x32xf32>
    %439 = arith.truncf %437 : vector<8x8xf32> to vector<8x8xbf16>
    %440 = arith.truncf %438 : vector<8x32xf32> to vector<8x32xbf16>
    %cst_159 = arith.constant dense<0.000000e+00> : vector<8x32xf32>
    %441 = tpu.matmul %439, %440, %cst_159 {dimension_numbers = #tpu.dot_dimension_numbers<[1], [0], [0], [1], [0, 0, 1, 1], [], []>} : vector<8x8xbf16>, vector<8x32xbf16>, vector<8x32xf32> -> vector<8x32xf32>
    %442 = arith.addf %418, %441 : vector<8x32xf32>
    %443 = vector.extract_strided_slice %367 {offsets = [0, 24], sizes = [8, 8], strides = [1, 1]} : vector<8x32xf32> to vector<8x8xf32>
    %444 = vector.extract_strided_slice %368 {offsets = [0, 24], sizes = [8, 8], strides = [1, 1]} : vector<8x32xf32> to vector<8x8xf32>
    %445 = arith.truncf %443 : vector<8x8xf32> to vector<8x8xbf16>
    %446 = arith.truncf %444 : vector<8x8xf32> to vector<8x8xbf16>
    %cst_160 = arith.constant dense<0.000000e+00> : vector<8x8xf32>
    %447 = tpu.matmul %445, %446, %cst_160 {dimension_numbers = #tpu.dot_dimension_numbers<[1], [1], [0], [0], [0, 0, 1, 0], [], []>} : vector<8x8xbf16>, vector<8x8xbf16>, vector<8x8xf32> -> vector<8x8xf32>
    %cst_161 = arith.constant dense<0xFF800000> : vector<8xf32>
    %448 = vector.multi_reduction <maximumf>, %447, %cst_161 [1] : vector<8x8xf32> to vector<8xf32>
    %449 = vector.shape_cast %448 : vector<8xf32> to vector<8x1xf32>
    %450 = vector.broadcast %449 : vector<8x1xf32> to vector<8x8xf32>
    %451 = arith.subf %447, %450 : vector<8x8xf32>
    %452 = math.exp %451 : vector<8x8xf32>
    %cst_162 = arith.constant dense<0.000000e+00> : vector<8xf32>
    %453 = vector.multi_reduction <add>, %452, %cst_162 [1] : vector<8x8xf32> to vector<8xf32>
    %454 = vector.shape_cast %453 : vector<8xf32> to vector<8x1xf32>
    %455 = tpu.reciprocal %454 {approx = true} : vector<8x1xf32> -> vector<8x1xf32>
    %456 = vector.broadcast %455 : vector<8x1xf32> to vector<8x8xf32>
    %457 = arith.mulf %452, %456 : vector<8x8xf32>
    %458 = vector.extract_strided_slice %369 {offsets = [0, 24], sizes = [8, 8], strides = [1, 1]} : vector<8x32xf32> to vector<8x8xf32>
    %459 = arith.truncf %457 : vector<8x8xf32> to vector<8x8xbf16>
    %460 = arith.truncf %458 : vector<8x8xf32> to vector<8x8xbf16>
    %cst_163 = arith.constant dense<0.000000e+00> : vector<8x8xf32>
    %461 = tpu.matmul %459, %460, %cst_163 {dimension_numbers = #tpu.dot_dimension_numbers<[1], [0], [0], [1], [0, 0, 1, 1], [], []>} : vector<8x8xbf16>, vector<8x8xbf16>, vector<8x8xf32> -> vector<8x8xf32>
    %462 = vector.extract_strided_slice %371 {offsets = [24, 0], sizes = [8, 32], strides = [1, 1]} : vector<32x32xf32> to vector<8x32xf32>
    %463 = arith.truncf %461 : vector<8x8xf32> to vector<8x8xbf16>
    %464 = arith.truncf %462 : vector<8x32xf32> to vector<8x32xbf16>
    %cst_164 = arith.constant dense<0.000000e+00> : vector<8x32xf32>
    %465 = tpu.matmul %463, %464, %cst_164 {dimension_numbers = #tpu.dot_dimension_numbers<[1], [0], [0], [1], [0, 0, 1, 1], [], []>} : vector<8x8xbf16>, vector<8x32xbf16>, vector<8x32xf32> -> vector<8x32xf32>
    %466 = arith.addf %442, %465 : vector<8x32xf32>
    %c1_165 = arith.constant 1 : index
    %c0_166 = arith.constant 0 : index
    %c0_167 = arith.constant 0 : index
    %467 = vector.load %arg12[%c1_165, %c0_166, %c0_167] : memref<2x1x32xf32, #tpu.memory_space<vmem>>, vector<1x1x32xf32>
    %468 = vector.shape_cast %467 : vector<1x1x32xf32> to vector<1x32xf32>
    %469 = vector.broadcast %468 : vector<1x32xf32> to vector<8x32xf32>
    %470 = arith.addf %466, %469 : vector<8x32xf32>
    %471 = arith.addf %351, %470 : vector<8x32xf32>
    %472 = vector.extract_strided_slice %353 {offsets = [0, 0], sizes = [1, 32], strides = [1, 1]} : vector<3x32xf32> to vector<1x32xf32>
    %473 = vector.extract_strided_slice %355 {offsets = [0, 0], sizes = [1, 32], strides = [1, 1]} : vector<3x32xf32> to vector<1x32xf32>
    %cst_168 = arith.constant dense<0.000000e+00> : vector<8xf32>
    %474 = vector.multi_reduction <add>, %471, %cst_168 [1] : vector<8x32xf32> to vector<8xf32>
    %475 = vector.shape_cast %474 : vector<8xf32> to vector<8x1xf32>
    %cst_169 = arith.constant 3.200000e+01 : f32
    %476 = vector.broadcast %cst_169 : f32 to vector<8x1xf32>
    %477 = arith.divf %475, %476 : vector<8x1xf32>
    %478 = vector.broadcast %477 : vector<8x1xf32> to vector<8x32xf32>
    %479 = arith.subf %471, %478 : vector<8x32xf32>
    %480 = arith.mulf %479, %479 : vector<8x32xf32>
    %cst_170 = arith.constant dense<0.000000e+00> : vector<8xf32>
    %481 = vector.multi_reduction <add>, %480, %cst_170 [1] : vector<8x32xf32> to vector<8xf32>
    %482 = vector.shape_cast %481 : vector<8xf32> to vector<8x1xf32>
    %cst_171 = arith.constant 3.200000e+01 : f32
    %483 = vector.broadcast %cst_171 : f32 to vector<8x1xf32>
    %484 = arith.divf %482, %483 : vector<8x1xf32>
    %cst_172 = arith.constant 9.99999974E-6 : f32
    %485 = vector.broadcast %cst_172 : f32 to vector<8x1xf32>
    %486 = arith.addf %484, %485 : vector<8x1xf32>
    %487 = math.rsqrt %486 : vector<8x1xf32>
    %488 = vector.broadcast %487 : vector<8x1xf32> to vector<8x32xf32>
    %489 = arith.mulf %479, %488 : vector<8x32xf32>
    %490 = vector.broadcast %472 : vector<1x32xf32> to vector<8x32xf32>
    %491 = arith.mulf %489, %490 : vector<8x32xf32>
    %492 = vector.broadcast %473 : vector<1x32xf32> to vector<8x32xf32>
    %493 = arith.addf %491, %492 : vector<8x32xf32>
    %c1_173 = arith.constant 1 : index
    %c0_174 = arith.constant 0 : index
    %c0_175 = arith.constant 0 : index
    %494 = vector.load %arg13[%c1_173, %c0_174, %c0_175] : memref<2x32x32xf32, #tpu.memory_space<vmem>>, vector<1x32x32xf32>
    %495 = vector.shape_cast %494 : vector<1x32x32xf32> to vector<32x32xf32>
    %496 = arith.truncf %493 : vector<8x32xf32> to vector<8x32xbf16>
    %497 = arith.truncf %495 : vector<32x32xf32> to vector<32x32xbf16>
    %cst_176 = arith.constant dense<0.000000e+00> : vector<8x32xf32>
    %498 = tpu.matmul %496, %497, %cst_176 {dimension_numbers = #tpu.dot_dimension_numbers<[1], [0], [0], [1], [0, 0, 1, 1], [], []>} : vector<8x32xbf16>, vector<32x32xbf16>, vector<8x32xf32> -> vector<8x32xf32>
    %c1_177 = arith.constant 1 : index
    %c0_178 = arith.constant 0 : index
    %c0_179 = arith.constant 0 : index
    %499 = vector.load %arg14[%c1_177, %c0_178, %c0_179] : memref<2x1x32xf32, #tpu.memory_space<vmem>>, vector<1x1x32xf32>
    %500 = vector.shape_cast %499 : vector<1x1x32xf32> to vector<1x32xf32>
    %501 = vector.broadcast %500 : vector<1x32xf32> to vector<8x32xf32>
    %502 = arith.addf %498, %501 : vector<8x32xf32>
    %cst_180 = arith.constant 0.353553385 : f32
    %503 = vector.broadcast %cst_180 : f32 to vector<8x32xf32>
    %504 = arith.mulf %502, %503 : vector<8x32xf32>
    %c1_181 = arith.constant 1 : index
    %c0_182 = arith.constant 0 : index
    %c0_183 = arith.constant 0 : index
    %505 = vector.load %arg15[%c1_181, %c0_182, %c0_183] : memref<2x32x64xf32, #tpu.memory_space<vmem>>, vector<1x32x64xf32>
    %506 = vector.shape_cast %505 : vector<1x32x64xf32> to vector<32x64xf32>
    %507 = arith.truncf %19 : vector<65x32xf32> to vector<65x32xbf16>
    %508 = arith.truncf %506 : vector<32x64xf32> to vector<32x64xbf16>
    %cst_184 = arith.constant dense<0.000000e+00> : vector<65x64xf32>
    %509 = tpu.matmul %507, %508, %cst_184 {dimension_numbers = #tpu.dot_dimension_numbers<[1], [0], [0], [1], [0, 0, 1, 1], [], []>} : vector<65x32xbf16>, vector<32x64xbf16>, vector<65x64xf32> -> vector<65x64xf32>
    %c1_185 = arith.constant 1 : index
    %c0_186 = arith.constant 0 : index
    %c0_187 = arith.constant 0 : index
    %510 = vector.load %arg16[%c1_185, %c0_186, %c0_187] : memref<2x1x64xf32, #tpu.memory_space<vmem>>, vector<1x1x64xf32>
    %511 = vector.shape_cast %510 : vector<1x1x64xf32> to vector<1x64xf32>
    %512 = vector.broadcast %511 : vector<1x64xf32> to vector<65x64xf32>
    %513 = arith.addf %509, %512 : vector<65x64xf32>
    %514 = vector.extract_strided_slice %513 {offsets = [0, 0], sizes = [65, 32], strides = [1, 1]} : vector<65x64xf32> to vector<65x32xf32>
    %515 = vector.extract_strided_slice %513 {offsets = [0, 32], sizes = [65, 32], strides = [1, 1]} : vector<65x64xf32> to vector<65x32xf32>
    %c1_188 = arith.constant 1 : index
    %c0_189 = arith.constant 0 : index
    %c0_190 = arith.constant 0 : index
    %516 = vector.load %arg17[%c1_188, %c0_189, %c0_190] : memref<2x32x32xf32, #tpu.memory_space<vmem>>, vector<1x32x32xf32>
    %517 = vector.shape_cast %516 : vector<1x32x32xf32> to vector<32x32xf32>
    %518 = vector.extract_strided_slice %504 {offsets = [0, 0], sizes = [8, 8], strides = [1, 1]} : vector<8x32xf32> to vector<8x8xf32>
    %519 = vector.extract_strided_slice %514 {offsets = [0, 0], sizes = [65, 8], strides = [1, 1]} : vector<65x32xf32> to vector<65x8xf32>
    %520 = arith.truncf %518 : vector<8x8xf32> to vector<8x8xbf16>
    %521 = arith.truncf %519 : vector<65x8xf32> to vector<65x8xbf16>
    %cst_191 = arith.constant dense<0.000000e+00> : vector<8x65xf32>
    %522 = tpu.matmul %520, %521, %cst_191 {dimension_numbers = #tpu.dot_dimension_numbers<[1], [1], [0], [0], [0, 0, 1, 0], [], []>} : vector<8x8xbf16>, vector<65x8xbf16>, vector<8x65xf32> -> vector<8x65xf32>
    %cst_192 = arith.constant dense<0xFF800000> : vector<8xf32>
    %523 = vector.multi_reduction <maximumf>, %522, %cst_192 [1] : vector<8x65xf32> to vector<8xf32>
    %524 = vector.shape_cast %523 : vector<8xf32> to vector<8x1xf32>
    %525 = vector.broadcast %524 : vector<8x1xf32> to vector<8x65xf32>
    %526 = arith.subf %522, %525 : vector<8x65xf32>
    %527 = math.exp %526 : vector<8x65xf32>
    %cst_193 = arith.constant dense<0.000000e+00> : vector<8xf32>
    %528 = vector.multi_reduction <add>, %527, %cst_193 [1] : vector<8x65xf32> to vector<8xf32>
    %529 = vector.shape_cast %528 : vector<8xf32> to vector<8x1xf32>
    %530 = tpu.reciprocal %529 {approx = true} : vector<8x1xf32> -> vector<8x1xf32>
    %531 = vector.broadcast %530 : vector<8x1xf32> to vector<8x65xf32>
    %532 = arith.mulf %527, %531 : vector<8x65xf32>
    %533 = vector.extract_strided_slice %515 {offsets = [0, 0], sizes = [65, 8], strides = [1, 1]} : vector<65x32xf32> to vector<65x8xf32>
    %534 = arith.truncf %532 : vector<8x65xf32> to vector<8x65xbf16>
    %535 = arith.truncf %533 : vector<65x8xf32> to vector<65x8xbf16>
    %cst_194 = arith.constant dense<0.000000e+00> : vector<8x8xf32>
    %536 = tpu.matmul %534, %535, %cst_194 {dimension_numbers = #tpu.dot_dimension_numbers<[1], [0], [0], [1], [0, 0, 1, 1], [], []>} : vector<8x65xbf16>, vector<65x8xbf16>, vector<8x8xf32> -> vector<8x8xf32>
    %537 = vector.extract_strided_slice %517 {offsets = [0, 0], sizes = [8, 32], strides = [1, 1]} : vector<32x32xf32> to vector<8x32xf32>
    %538 = arith.truncf %536 : vector<8x8xf32> to vector<8x8xbf16>
    %539 = arith.truncf %537 : vector<8x32xf32> to vector<8x32xbf16>
    %cst_195 = arith.constant dense<0.000000e+00> : vector<8x32xf32>
    %540 = tpu.matmul %538, %539, %cst_195 {dimension_numbers = #tpu.dot_dimension_numbers<[1], [0], [0], [1], [0, 0, 1, 1], [], []>} : vector<8x8xbf16>, vector<8x32xbf16>, vector<8x32xf32> -> vector<8x32xf32>
    %541 = vector.extract_strided_slice %504 {offsets = [0, 8], sizes = [8, 8], strides = [1, 1]} : vector<8x32xf32> to vector<8x8xf32>
    %542 = vector.extract_strided_slice %514 {offsets = [0, 8], sizes = [65, 8], strides = [1, 1]} : vector<65x32xf32> to vector<65x8xf32>
    %543 = arith.truncf %541 : vector<8x8xf32> to vector<8x8xbf16>
    %544 = arith.truncf %542 : vector<65x8xf32> to vector<65x8xbf16>
    %cst_196 = arith.constant dense<0.000000e+00> : vector<8x65xf32>
    %545 = tpu.matmul %543, %544, %cst_196 {dimension_numbers = #tpu.dot_dimension_numbers<[1], [1], [0], [0], [0, 0, 1, 0], [], []>} : vector<8x8xbf16>, vector<65x8xbf16>, vector<8x65xf32> -> vector<8x65xf32>
    %cst_197 = arith.constant dense<0xFF800000> : vector<8xf32>
    %546 = vector.multi_reduction <maximumf>, %545, %cst_197 [1] : vector<8x65xf32> to vector<8xf32>
    %547 = vector.shape_cast %546 : vector<8xf32> to vector<8x1xf32>
    %548 = vector.broadcast %547 : vector<8x1xf32> to vector<8x65xf32>
    %549 = arith.subf %545, %548 : vector<8x65xf32>
    %550 = math.exp %549 : vector<8x65xf32>
    %cst_198 = arith.constant dense<0.000000e+00> : vector<8xf32>
    %551 = vector.multi_reduction <add>, %550, %cst_198 [1] : vector<8x65xf32> to vector<8xf32>
    %552 = vector.shape_cast %551 : vector<8xf32> to vector<8x1xf32>
    %553 = tpu.reciprocal %552 {approx = true} : vector<8x1xf32> -> vector<8x1xf32>
    %554 = vector.broadcast %553 : vector<8x1xf32> to vector<8x65xf32>
    %555 = arith.mulf %550, %554 : vector<8x65xf32>
    %556 = vector.extract_strided_slice %515 {offsets = [0, 8], sizes = [65, 8], strides = [1, 1]} : vector<65x32xf32> to vector<65x8xf32>
    %557 = arith.truncf %555 : vector<8x65xf32> to vector<8x65xbf16>
    %558 = arith.truncf %556 : vector<65x8xf32> to vector<65x8xbf16>
    %cst_199 = arith.constant dense<0.000000e+00> : vector<8x8xf32>
    %559 = tpu.matmul %557, %558, %cst_199 {dimension_numbers = #tpu.dot_dimension_numbers<[1], [0], [0], [1], [0, 0, 1, 1], [], []>} : vector<8x65xbf16>, vector<65x8xbf16>, vector<8x8xf32> -> vector<8x8xf32>
    %560 = vector.extract_strided_slice %517 {offsets = [8, 0], sizes = [8, 32], strides = [1, 1]} : vector<32x32xf32> to vector<8x32xf32>
    %561 = arith.truncf %559 : vector<8x8xf32> to vector<8x8xbf16>
    %562 = arith.truncf %560 : vector<8x32xf32> to vector<8x32xbf16>
    %cst_200 = arith.constant dense<0.000000e+00> : vector<8x32xf32>
    %563 = tpu.matmul %561, %562, %cst_200 {dimension_numbers = #tpu.dot_dimension_numbers<[1], [0], [0], [1], [0, 0, 1, 1], [], []>} : vector<8x8xbf16>, vector<8x32xbf16>, vector<8x32xf32> -> vector<8x32xf32>
    %564 = arith.addf %540, %563 : vector<8x32xf32>
    %565 = vector.extract_strided_slice %504 {offsets = [0, 16], sizes = [8, 8], strides = [1, 1]} : vector<8x32xf32> to vector<8x8xf32>
    %566 = vector.extract_strided_slice %514 {offsets = [0, 16], sizes = [65, 8], strides = [1, 1]} : vector<65x32xf32> to vector<65x8xf32>
    %567 = arith.truncf %565 : vector<8x8xf32> to vector<8x8xbf16>
    %568 = arith.truncf %566 : vector<65x8xf32> to vector<65x8xbf16>
    %cst_201 = arith.constant dense<0.000000e+00> : vector<8x65xf32>
    %569 = tpu.matmul %567, %568, %cst_201 {dimension_numbers = #tpu.dot_dimension_numbers<[1], [1], [0], [0], [0, 0, 1, 0], [], []>} : vector<8x8xbf16>, vector<65x8xbf16>, vector<8x65xf32> -> vector<8x65xf32>
    %cst_202 = arith.constant dense<0xFF800000> : vector<8xf32>
    %570 = vector.multi_reduction <maximumf>, %569, %cst_202 [1] : vector<8x65xf32> to vector<8xf32>
    %571 = vector.shape_cast %570 : vector<8xf32> to vector<8x1xf32>
    %572 = vector.broadcast %571 : vector<8x1xf32> to vector<8x65xf32>
    %573 = arith.subf %569, %572 : vector<8x65xf32>
    %574 = math.exp %573 : vector<8x65xf32>
    %cst_203 = arith.constant dense<0.000000e+00> : vector<8xf32>
    %575 = vector.multi_reduction <add>, %574, %cst_203 [1] : vector<8x65xf32> to vector<8xf32>
    %576 = vector.shape_cast %575 : vector<8xf32> to vector<8x1xf32>
    %577 = tpu.reciprocal %576 {approx = true} : vector<8x1xf32> -> vector<8x1xf32>
    %578 = vector.broadcast %577 : vector<8x1xf32> to vector<8x65xf32>
    %579 = arith.mulf %574, %578 : vector<8x65xf32>
    %580 = vector.extract_strided_slice %515 {offsets = [0, 16], sizes = [65, 8], strides = [1, 1]} : vector<65x32xf32> to vector<65x8xf32>
    %581 = arith.truncf %579 : vector<8x65xf32> to vector<8x65xbf16>
    %582 = arith.truncf %580 : vector<65x8xf32> to vector<65x8xbf16>
    %cst_204 = arith.constant dense<0.000000e+00> : vector<8x8xf32>
    %583 = tpu.matmul %581, %582, %cst_204 {dimension_numbers = #tpu.dot_dimension_numbers<[1], [0], [0], [1], [0, 0, 1, 1], [], []>} : vector<8x65xbf16>, vector<65x8xbf16>, vector<8x8xf32> -> vector<8x8xf32>
    %584 = vector.extract_strided_slice %517 {offsets = [16, 0], sizes = [8, 32], strides = [1, 1]} : vector<32x32xf32> to vector<8x32xf32>
    %585 = arith.truncf %583 : vector<8x8xf32> to vector<8x8xbf16>
    %586 = arith.truncf %584 : vector<8x32xf32> to vector<8x32xbf16>
    %cst_205 = arith.constant dense<0.000000e+00> : vector<8x32xf32>
    %587 = tpu.matmul %585, %586, %cst_205 {dimension_numbers = #tpu.dot_dimension_numbers<[1], [0], [0], [1], [0, 0, 1, 1], [], []>} : vector<8x8xbf16>, vector<8x32xbf16>, vector<8x32xf32> -> vector<8x32xf32>
    %588 = arith.addf %564, %587 : vector<8x32xf32>
    %589 = vector.extract_strided_slice %504 {offsets = [0, 24], sizes = [8, 8], strides = [1, 1]} : vector<8x32xf32> to vector<8x8xf32>
    %590 = vector.extract_strided_slice %514 {offsets = [0, 24], sizes = [65, 8], strides = [1, 1]} : vector<65x32xf32> to vector<65x8xf32>
    %591 = arith.truncf %589 : vector<8x8xf32> to vector<8x8xbf16>
    %592 = arith.truncf %590 : vector<65x8xf32> to vector<65x8xbf16>
    %cst_206 = arith.constant dense<0.000000e+00> : vector<8x65xf32>
    %593 = tpu.matmul %591, %592, %cst_206 {dimension_numbers = #tpu.dot_dimension_numbers<[1], [1], [0], [0], [0, 0, 1, 0], [], []>} : vector<8x8xbf16>, vector<65x8xbf16>, vector<8x65xf32> -> vector<8x65xf32>
    %cst_207 = arith.constant dense<0xFF800000> : vector<8xf32>
    %594 = vector.multi_reduction <maximumf>, %593, %cst_207 [1] : vector<8x65xf32> to vector<8xf32>
    %595 = vector.shape_cast %594 : vector<8xf32> to vector<8x1xf32>
    %596 = vector.broadcast %595 : vector<8x1xf32> to vector<8x65xf32>
    %597 = arith.subf %593, %596 : vector<8x65xf32>
    %598 = math.exp %597 : vector<8x65xf32>
    %cst_208 = arith.constant dense<0.000000e+00> : vector<8xf32>
    %599 = vector.multi_reduction <add>, %598, %cst_208 [1] : vector<8x65xf32> to vector<8xf32>
    %600 = vector.shape_cast %599 : vector<8xf32> to vector<8x1xf32>
    %601 = tpu.reciprocal %600 {approx = true} : vector<8x1xf32> -> vector<8x1xf32>
    %602 = vector.broadcast %601 : vector<8x1xf32> to vector<8x65xf32>
    %603 = arith.mulf %598, %602 : vector<8x65xf32>
    %604 = vector.extract_strided_slice %515 {offsets = [0, 24], sizes = [65, 8], strides = [1, 1]} : vector<65x32xf32> to vector<65x8xf32>
    %605 = arith.truncf %603 : vector<8x65xf32> to vector<8x65xbf16>
    %606 = arith.truncf %604 : vector<65x8xf32> to vector<65x8xbf16>
    %cst_209 = arith.constant dense<0.000000e+00> : vector<8x8xf32>
    %607 = tpu.matmul %605, %606, %cst_209 {dimension_numbers = #tpu.dot_dimension_numbers<[1], [0], [0], [1], [0, 0, 1, 1], [], []>} : vector<8x65xbf16>, vector<65x8xbf16>, vector<8x8xf32> -> vector<8x8xf32>
    %608 = vector.extract_strided_slice %517 {offsets = [24, 0], sizes = [8, 32], strides = [1, 1]} : vector<32x32xf32> to vector<8x32xf32>
    %609 = arith.truncf %607 : vector<8x8xf32> to vector<8x8xbf16>
    %610 = arith.truncf %608 : vector<8x32xf32> to vector<8x32xbf16>
    %cst_210 = arith.constant dense<0.000000e+00> : vector<8x32xf32>
    %611 = tpu.matmul %609, %610, %cst_210 {dimension_numbers = #tpu.dot_dimension_numbers<[1], [0], [0], [1], [0, 0, 1, 1], [], []>} : vector<8x8xbf16>, vector<8x32xbf16>, vector<8x32xf32> -> vector<8x32xf32>
    %612 = arith.addf %588, %611 : vector<8x32xf32>
    %c1_211 = arith.constant 1 : index
    %c0_212 = arith.constant 0 : index
    %c0_213 = arith.constant 0 : index
    %613 = vector.load %arg18[%c1_211, %c0_212, %c0_213] : memref<2x1x32xf32, #tpu.memory_space<vmem>>, vector<1x1x32xf32>
    %614 = vector.shape_cast %613 : vector<1x1x32xf32> to vector<1x32xf32>
    %615 = vector.broadcast %614 : vector<1x32xf32> to vector<8x32xf32>
    %616 = arith.addf %612, %615 : vector<8x32xf32>
    %617 = arith.addf %493, %616 : vector<8x32xf32>
    %618 = vector.extract_strided_slice %353 {offsets = [1, 0], sizes = [1, 32], strides = [1, 1]} : vector<3x32xf32> to vector<1x32xf32>
    %619 = vector.extract_strided_slice %355 {offsets = [1, 0], sizes = [1, 32], strides = [1, 1]} : vector<3x32xf32> to vector<1x32xf32>
    %cst_214 = arith.constant dense<0.000000e+00> : vector<8xf32>
    %620 = vector.multi_reduction <add>, %617, %cst_214 [1] : vector<8x32xf32> to vector<8xf32>
    %621 = vector.shape_cast %620 : vector<8xf32> to vector<8x1xf32>
    %cst_215 = arith.constant 3.200000e+01 : f32
    %622 = vector.broadcast %cst_215 : f32 to vector<8x1xf32>
    %623 = arith.divf %621, %622 : vector<8x1xf32>
    %624 = vector.broadcast %623 : vector<8x1xf32> to vector<8x32xf32>
    %625 = arith.subf %617, %624 : vector<8x32xf32>
    %626 = arith.mulf %625, %625 : vector<8x32xf32>
    %cst_216 = arith.constant dense<0.000000e+00> : vector<8xf32>
    %627 = vector.multi_reduction <add>, %626, %cst_216 [1] : vector<8x32xf32> to vector<8xf32>
    %628 = vector.shape_cast %627 : vector<8xf32> to vector<8x1xf32>
    %cst_217 = arith.constant 3.200000e+01 : f32
    %629 = vector.broadcast %cst_217 : f32 to vector<8x1xf32>
    %630 = arith.divf %628, %629 : vector<8x1xf32>
    %cst_218 = arith.constant 9.99999974E-6 : f32
    %631 = vector.broadcast %cst_218 : f32 to vector<8x1xf32>
    %632 = arith.addf %630, %631 : vector<8x1xf32>
    %633 = math.rsqrt %632 : vector<8x1xf32>
    %634 = vector.broadcast %633 : vector<8x1xf32> to vector<8x32xf32>
    %635 = arith.mulf %625, %634 : vector<8x32xf32>
    %636 = vector.broadcast %618 : vector<1x32xf32> to vector<8x32xf32>
    %637 = arith.mulf %635, %636 : vector<8x32xf32>
    %638 = vector.broadcast %619 : vector<1x32xf32> to vector<8x32xf32>
    %639 = arith.addf %637, %638 : vector<8x32xf32>
    %c1_219 = arith.constant 1 : index
    %c0_220 = arith.constant 0 : index
    %c0_221 = arith.constant 0 : index
    %640 = vector.load %arg19[%c1_219, %c0_220, %c0_221] : memref<2x32x64xf32, #tpu.memory_space<vmem>>, vector<1x32x64xf32>
    %641 = vector.shape_cast %640 : vector<1x32x64xf32> to vector<32x64xf32>
    %642 = arith.truncf %639 : vector<8x32xf32> to vector<8x32xbf16>
    %643 = arith.truncf %641 : vector<32x64xf32> to vector<32x64xbf16>
    %cst_222 = arith.constant dense<0.000000e+00> : vector<8x64xf32>
    %644 = tpu.matmul %642, %643, %cst_222 {dimension_numbers = #tpu.dot_dimension_numbers<[1], [0], [0], [1], [0, 0, 1, 1], [], []>} : vector<8x32xbf16>, vector<32x64xbf16>, vector<8x64xf32> -> vector<8x64xf32>
    %c1_223 = arith.constant 1 : index
    %c0_224 = arith.constant 0 : index
    %c0_225 = arith.constant 0 : index
    %645 = vector.load %arg20[%c1_223, %c0_224, %c0_225] : memref<2x1x64xf32, #tpu.memory_space<vmem>>, vector<1x1x64xf32>
    %646 = vector.shape_cast %645 : vector<1x1x64xf32> to vector<1x64xf32>
    %647 = vector.broadcast %646 : vector<1x64xf32> to vector<8x64xf32>
    %648 = arith.addf %644, %647 : vector<8x64xf32>
    %cst_226 = arith.constant 0.000000e+00 : f32
    %649 = vector.broadcast %cst_226 : f32 to vector<8x64xf32>
    %650 = arith.maximumf %648, %649 : vector<8x64xf32>
    %c1_227 = arith.constant 1 : index
    %c0_228 = arith.constant 0 : index
    %c0_229 = arith.constant 0 : index
    %651 = vector.load %arg21[%c1_227, %c0_228, %c0_229] : memref<2x64x32xf32, #tpu.memory_space<vmem>>, vector<1x64x32xf32>
    %652 = vector.shape_cast %651 : vector<1x64x32xf32> to vector<64x32xf32>
    %653 = arith.truncf %650 : vector<8x64xf32> to vector<8x64xbf16>
    %654 = arith.truncf %652 : vector<64x32xf32> to vector<64x32xbf16>
    %cst_230 = arith.constant dense<0.000000e+00> : vector<8x32xf32>
    %655 = tpu.matmul %653, %654, %cst_230 {dimension_numbers = #tpu.dot_dimension_numbers<[1], [0], [0], [1], [0, 0, 1, 1], [], []>} : vector<8x64xbf16>, vector<64x32xbf16>, vector<8x32xf32> -> vector<8x32xf32>
    %c1_231 = arith.constant 1 : index
    %c0_232 = arith.constant 0 : index
    %c0_233 = arith.constant 0 : index
    %656 = vector.load %arg22[%c1_231, %c0_232, %c0_233] : memref<2x1x32xf32, #tpu.memory_space<vmem>>, vector<1x1x32xf32>
    %657 = vector.shape_cast %656 : vector<1x1x32xf32> to vector<1x32xf32>
    %658 = vector.broadcast %657 : vector<1x32xf32> to vector<8x32xf32>
    %659 = arith.addf %655, %658 : vector<8x32xf32>
    %660 = arith.addf %639, %659 : vector<8x32xf32>
    %661 = vector.extract_strided_slice %353 {offsets = [2, 0], sizes = [1, 32], strides = [1, 1]} : vector<3x32xf32> to vector<1x32xf32>
    %662 = vector.extract_strided_slice %355 {offsets = [2, 0], sizes = [1, 32], strides = [1, 1]} : vector<3x32xf32> to vector<1x32xf32>
    %cst_234 = arith.constant dense<0.000000e+00> : vector<8xf32>
    %663 = vector.multi_reduction <add>, %660, %cst_234 [1] : vector<8x32xf32> to vector<8xf32>
    %664 = vector.shape_cast %663 : vector<8xf32> to vector<8x1xf32>
    %cst_235 = arith.constant 3.200000e+01 : f32
    %665 = vector.broadcast %cst_235 : f32 to vector<8x1xf32>
    %666 = arith.divf %664, %665 : vector<8x1xf32>
    %667 = vector.broadcast %666 : vector<8x1xf32> to vector<8x32xf32>
    %668 = arith.subf %660, %667 : vector<8x32xf32>
    %669 = arith.mulf %668, %668 : vector<8x32xf32>
    %cst_236 = arith.constant dense<0.000000e+00> : vector<8xf32>
    %670 = vector.multi_reduction <add>, %669, %cst_236 [1] : vector<8x32xf32> to vector<8xf32>
    %671 = vector.shape_cast %670 : vector<8xf32> to vector<8x1xf32>
    %cst_237 = arith.constant 3.200000e+01 : f32
    %672 = vector.broadcast %cst_237 : f32 to vector<8x1xf32>
    %673 = arith.divf %671, %672 : vector<8x1xf32>
    %cst_238 = arith.constant 9.99999974E-6 : f32
    %674 = vector.broadcast %cst_238 : f32 to vector<8x1xf32>
    %675 = arith.addf %673, %674 : vector<8x1xf32>
    %676 = math.rsqrt %675 : vector<8x1xf32>
    %677 = vector.broadcast %676 : vector<8x1xf32> to vector<8x32xf32>
    %678 = arith.mulf %668, %677 : vector<8x32xf32>
    %679 = vector.broadcast %661 : vector<1x32xf32> to vector<8x32xf32>
    %680 = arith.mulf %678, %679 : vector<8x32xf32>
    %681 = vector.broadcast %662 : vector<1x32xf32> to vector<8x32xf32>
    %682 = arith.addf %680, %681 : vector<8x32xf32>
    %683 = vector.extract_strided_slice %682 {offsets = [1, 0], sizes = [7, 32], strides = [1, 1]} : vector<8x32xf32> to vector<7x32xf32>
    %c0_239 = arith.constant 0 : index
    %c0_240 = arith.constant 0 : index
    %684 = vector.load %arg25[%c0_239, %c0_240] : memref<32x64xf32, #tpu.memory_space<vmem>>, vector<32x64xf32>
    %685 = arith.truncf %683 : vector<7x32xf32> to vector<7x32xbf16>
    %686 = arith.truncf %684 : vector<32x64xf32> to vector<32x64xbf16>
    %cst_241 = arith.constant dense<0.000000e+00> : vector<7x64xf32>
    %687 = tpu.matmul %685, %686, %cst_241 {dimension_numbers = #tpu.dot_dimension_numbers<[1], [0], [0], [1], [0, 0, 1, 1], [], []>} : vector<7x32xbf16>, vector<32x64xbf16>, vector<7x64xf32> -> vector<7x64xf32>
    %c0_242 = arith.constant 0 : index
    %c0_243 = arith.constant 0 : index
    %688 = vector.load %arg26[%c0_242, %c0_243] : memref<1x64xf32, #tpu.memory_space<vmem>>, vector<1x64xf32>
    %689 = vector.broadcast %688 : vector<1x64xf32> to vector<7x64xf32>
    %690 = arith.addf %687, %689 : vector<7x64xf32>
    %cst_244 = arith.constant 0.000000e+00 : f32
    %691 = vector.broadcast %cst_244 : f32 to vector<7x64xf32>
    %692 = arith.maximumf %690, %691 : vector<7x64xf32>
    %c0_245 = arith.constant 0 : index
    %c0_246 = arith.constant 0 : index
    %693 = vector.load %arg27[%c0_245, %c0_246] : memref<64x128xf32, #tpu.memory_space<vmem>>, vector<64x128xf32>
    %694 = arith.truncf %692 : vector<7x64xf32> to vector<7x64xbf16>
    %695 = arith.truncf %693 : vector<64x128xf32> to vector<64x128xbf16>
    %cst_247 = arith.constant dense<0.000000e+00> : vector<7x128xf32>
    %696 = tpu.matmul %694, %695, %cst_247 {dimension_numbers = #tpu.dot_dimension_numbers<[1], [0], [0], [1], [0, 0, 1, 1], [], []>} : vector<7x64xbf16>, vector<64x128xbf16>, vector<7x128xf32> -> vector<7x128xf32>
    %c0_248 = arith.constant 0 : index
    %c0_249 = arith.constant 0 : index
    %697 = vector.load %arg28[%c0_248, %c0_249] : memref<32x128xf32, #tpu.memory_space<vmem>>, vector<32x128xf32>
    %698 = arith.truncf %683 : vector<7x32xf32> to vector<7x32xbf16>
    %699 = arith.truncf %697 : vector<32x128xf32> to vector<32x128xbf16>
    %cst_250 = arith.constant dense<0.000000e+00> : vector<7x128xf32>
    %700 = tpu.matmul %698, %699, %cst_250 {dimension_numbers = #tpu.dot_dimension_numbers<[1], [0], [0], [1], [0, 0, 1, 1], [], []>} : vector<7x32xbf16>, vector<32x128xbf16>, vector<7x128xf32> -> vector<7x128xf32>
    %701 = arith.addf %696, %700 : vector<7x128xf32>
    %c0_251 = arith.constant 0 : index
    %c0_252 = arith.constant 0 : index
    %702 = vector.load %arg29[%c0_251, %c0_252] : memref<1x128xf32, #tpu.memory_space<vmem>>, vector<1x128xf32>
    %703 = vector.broadcast %702 : vector<1x128xf32> to vector<7x128xf32>
    %704 = arith.addf %701, %703 : vector<7x128xf32>
    %705 = tpu.iota {dimensions = array<i32: 1>} : vector<7x128xi32>
    %706 = math.tanh %704 : vector<7x128xf32>
    %c2_i32 = arith.constant 2 : i32
    %707 = vector.broadcast %c2_i32 : i32 to vector<7x128xi32>
    %708 = arith.cmpi slt, %705, %707 : vector<7x128xi32>
    %cst_253 = arith.constant 3.200000e+01 : f32
    %709 = vector.broadcast %cst_253 : f32 to vector<7x128xf32>
    %710 = arith.mulf %706, %709 : vector<7x128xf32>
    %c2_i32_254 = arith.constant 2 : i32
    %711 = vector.broadcast %c2_i32_254 : i32 to vector<7x128xi32>
    %712 = arith.cmpi eq, %705, %711 : vector<7x128xi32>
    %cst_255 = arith.constant 3.14159274 : f32
    %713 = vector.broadcast %cst_255 : f32 to vector<7x128xf32>
    %714 = arith.mulf %706, %713 : vector<7x128xf32>
    %715 = arith.select %712, %714, %704 : vector<7x128xi1>, vector<7x128xf32>
    %716 = arith.select %708, %710, %715 : vector<7x128xi1>, vector<7x128xf32>
    %c0_256 = arith.constant 0 : index
    %c0_257 = arith.constant 0 : index
    %c0_258 = arith.constant 0 : index
    %717 = vector.load %arg30[%c0_256, %c0_257, %c0_258] : memref<1x7x128xf32, #tpu.memory_space<vmem>>, vector<1x7x128xf32>
    %718 = vector.shape_cast %717 : vector<1x7x128xf32> to vector<7x128xf32>
    %719 = vector.shape_cast %716 : vector<7x128xf32> to vector<1x7x128xf32>
    tpu.vector_store %arg30[%c0_256, %c0_257, %c0_258], %719 {strides = array<i32>} : memref<1x7x128xf32, #tpu.memory_space<vmem>>, vector<1x7x128xf32>,
    return
  }
  func.func @transform_0(%arg0: i32) -> (i32, i32, i32) {
    %c0_i32 = arith.constant 0 : i32
    %c0_i32_0 = arith.constant 0 : i32
    %c0_i32_1 = arith.constant 0 : i32
    return %arg0, %c0_i32, %c0_i32_0 : i32, i32, i32
  }
  func.func @transform_1(%arg0: i32) -> (i32, i32, i32) {
    %c0_i32 = arith.constant 0 : i32
    %c0_i32_0 = arith.constant 0 : i32
    %c0_i32_1 = arith.constant 0 : i32
    return %arg0, %c0_i32, %c0_i32_0 : i32, i32, i32
  }
  func.func @transform_2(%arg0: i32) -> (i32, i32) {
    %c0_i32 = arith.constant 0 : i32
    %c0_i32_0 = arith.constant 0 : i32
    %c0_i32_1 = arith.constant 0 : i32
    return %c0_i32, %c0_i32_0 : i32, i32
  }
  func.func @transform_3(%arg0: i32) -> (i32, i32) {
    %c0_i32 = arith.constant 0 : i32
    %c0_i32_0 = arith.constant 0 : i32
    %c0_i32_1 = arith.constant 0 : i32
    return %c0_i32, %c0_i32_0 : i32, i32
  }
  func.func @transform_4(%arg0: i32) -> (i32, i32) {
    %c0_i32 = arith.constant 0 : i32
    %c0_i32_0 = arith.constant 0 : i32
    %c0_i32_1 = arith.constant 0 : i32
    return %c0_i32, %c0_i32_0 : i32, i32
  }
  func.func @transform_5(%arg0: i32) -> (i32, i32) {
    %c0_i32 = arith.constant 0 : i32
    %c0_i32_0 = arith.constant 0 : i32
    %c0_i32_1 = arith.constant 0 : i32
    return %c0_i32, %c0_i32_0 : i32, i32
  }
  func.func @transform_6(%arg0: i32) -> (i32, i32) {
    %c0_i32 = arith.constant 0 : i32
    %c0_i32_0 = arith.constant 0 : i32
    %c0_i32_1 = arith.constant 0 : i32
    return %c0_i32, %c0_i32_0 : i32, i32
  }
  func.func @transform_7(%arg0: i32) -> (i32, i32) {
    %c0_i32 = arith.constant 0 : i32
    %c0_i32_0 = arith.constant 0 : i32
    %c0_i32_1 = arith.constant 0 : i32
    return %c0_i32, %c0_i32_0 : i32, i32
  }
  func.func @transform_8(%arg0: i32) -> (i32, i32, i32) {
    %c0_i32 = arith.constant 0 : i32
    %c0_i32_0 = arith.constant 0 : i32
    %c0_i32_1 = arith.constant 0 : i32
    %c0_i32_2 = arith.constant 0 : i32
    return %c0_i32, %c0_i32_0, %c0_i32_1 : i32, i32, i32
  }
  func.func @transform_9(%arg0: i32) -> (i32, i32, i32) {
    %c0_i32 = arith.constant 0 : i32
    %c0_i32_0 = arith.constant 0 : i32
    %c0_i32_1 = arith.constant 0 : i32
    %c0_i32_2 = arith.constant 0 : i32
    return %c0_i32, %c0_i32_0, %c0_i32_1 : i32, i32, i32
  }
  func.func @transform_10(%arg0: i32) -> (i32, i32, i32) {
    %c0_i32 = arith.constant 0 : i32
    %c0_i32_0 = arith.constant 0 : i32
    %c0_i32_1 = arith.constant 0 : i32
    %c0_i32_2 = arith.constant 0 : i32
    return %c0_i32, %c0_i32_0, %c0_i32_1 : i32, i32, i32
  }
  func.func @transform_11(%arg0: i32) -> (i32, i32, i32) {
    %c0_i32 = arith.constant 0 : i32
    %c0_i32_0 = arith.constant 0 : i32
    %c0_i32_1 = arith.constant 0 : i32
    %c0_i32_2 = arith.constant 0 : i32
    return %c0_i32, %c0_i32_0, %c0_i32_1 : i32, i32, i32
  }
  func.func @transform_12(%arg0: i32) -> (i32, i32, i32) {
    %c0_i32 = arith.constant 0 : i32
    %c0_i32_0 = arith.constant 0 : i32
    %c0_i32_1 = arith.constant 0 : i32
    %c0_i32_2 = arith.constant 0 : i32
    return %c0_i32, %c0_i32_0, %c0_i32_1 : i32, i32, i32
  }
  func.func @transform_13(%arg0: i32) -> (i32, i32, i32) {
    %c0_i32 = arith.constant 0 : i32
    %c0_i32_0 = arith.constant 0 : i32
    %c0_i32_1 = arith.constant 0 : i32
    %c0_i32_2 = arith.constant 0 : i32
    return %c0_i32, %c0_i32_0, %c0_i32_1 : i32, i32, i32
  }
  func.func @transform_14(%arg0: i32) -> (i32, i32, i32) {
    %c0_i32 = arith.constant 0 : i32
    %c0_i32_0 = arith.constant 0 : i32
    %c0_i32_1 = arith.constant 0 : i32
    %c0_i32_2 = arith.constant 0 : i32
    return %c0_i32, %c0_i32_0, %c0_i32_1 : i32, i32, i32
  }
  func.func @transform_15(%arg0: i32) -> (i32, i32, i32) {
    %c0_i32 = arith.constant 0 : i32
    %c0_i32_0 = arith.constant 0 : i32
    %c0_i32_1 = arith.constant 0 : i32
    %c0_i32_2 = arith.constant 0 : i32
    return %c0_i32, %c0_i32_0, %c0_i32_1 : i32, i32, i32
  }
  func.func @transform_16(%arg0: i32) -> (i32, i32, i32) {
    %c0_i32 = arith.constant 0 : i32
    %c0_i32_0 = arith.constant 0 : i32
    %c0_i32_1 = arith.constant 0 : i32
    %c0_i32_2 = arith.constant 0 : i32
    return %c0_i32, %c0_i32_0, %c0_i32_1 : i32, i32, i32
  }
  func.func @transform_17(%arg0: i32) -> (i32, i32, i32) {
    %c0_i32 = arith.constant 0 : i32
    %c0_i32_0 = arith.constant 0 : i32
    %c0_i32_1 = arith.constant 0 : i32
    %c0_i32_2 = arith.constant 0 : i32
    return %c0_i32, %c0_i32_0, %c0_i32_1 : i32, i32, i32
  }
  func.func @transform_18(%arg0: i32) -> (i32, i32, i32) {
    %c0_i32 = arith.constant 0 : i32
    %c0_i32_0 = arith.constant 0 : i32
    %c0_i32_1 = arith.constant 0 : i32
    %c0_i32_2 = arith.constant 0 : i32
    return %c0_i32, %c0_i32_0, %c0_i32_1 : i32, i32, i32
  }
  func.func @transform_19(%arg0: i32) -> (i32, i32, i32) {
    %c0_i32 = arith.constant 0 : i32
    %c0_i32_0 = arith.constant 0 : i32
    %c0_i32_1 = arith.constant 0 : i32
    %c0_i32_2 = arith.constant 0 : i32
    return %c0_i32, %c0_i32_0, %c0_i32_1 : i32, i32, i32
  }
  func.func @transform_20(%arg0: i32) -> (i32, i32, i32) {
    %c0_i32 = arith.constant 0 : i32
    %c0_i32_0 = arith.constant 0 : i32
    %c0_i32_1 = arith.constant 0 : i32
    %c0_i32_2 = arith.constant 0 : i32
    return %c0_i32, %c0_i32_0, %c0_i32_1 : i32, i32, i32
  }
  func.func @transform_21(%arg0: i32) -> (i32, i32, i32) {
    %c0_i32 = arith.constant 0 : i32
    %c0_i32_0 = arith.constant 0 : i32
    %c0_i32_1 = arith.constant 0 : i32
    %c0_i32_2 = arith.constant 0 : i32
    return %c0_i32, %c0_i32_0, %c0_i32_1 : i32, i32, i32
  }
  func.func @transform_22(%arg0: i32) -> (i32, i32, i32) {
    %c0_i32 = arith.constant 0 : i32
    %c0_i32_0 = arith.constant 0 : i32
    %c0_i32_1 = arith.constant 0 : i32
    %c0_i32_2 = arith.constant 0 : i32
    return %c0_i32, %c0_i32_0, %c0_i32_1 : i32, i32, i32
  }
  func.func @transform_23(%arg0: i32) -> (i32, i32, i32) {
    %c0_i32 = arith.constant 0 : i32
    %c0_i32_0 = arith.constant 0 : i32
    %c0_i32_1 = arith.constant 0 : i32
    %c0_i32_2 = arith.constant 0 : i32
    return %c0_i32, %c0_i32_0, %c0_i32_1 : i32, i32, i32
  }
  func.func @transform_24(%arg0: i32) -> (i32, i32) {
    %c0_i32 = arith.constant 0 : i32
    %c0_i32_0 = arith.constant 0 : i32
    %c0_i32_1 = arith.constant 0 : i32
    return %c0_i32, %c0_i32_0 : i32, i32
  }
  func.func @transform_25(%arg0: i32) -> (i32, i32) {
    %c0_i32 = arith.constant 0 : i32
    %c0_i32_0 = arith.constant 0 : i32
    %c0_i32_1 = arith.constant 0 : i32
    return %c0_i32, %c0_i32_0 : i32, i32
  }
  func.func @transform_26(%arg0: i32) -> (i32, i32) {
    %c0_i32 = arith.constant 0 : i32
    %c0_i32_0 = arith.constant 0 : i32
    %c0_i32_1 = arith.constant 0 : i32
    return %c0_i32, %c0_i32_0 : i32, i32
  }
  func.func @transform_27(%arg0: i32) -> (i32, i32) {
    %c0_i32 = arith.constant 0 : i32
    %c0_i32_0 = arith.constant 0 : i32
    %c0_i32_1 = arith.constant 0 : i32
    return %c0_i32, %c0_i32_0 : i32, i32
  }
  func.func @transform_28(%arg0: i32) -> (i32, i32) {
    %c0_i32 = arith.constant 0 : i32
    %c0_i32_0 = arith.constant 0 : i32
    %c0_i32_1 = arith.constant 0 : i32
    return %c0_i32, %c0_i32_0 : i32, i32
  }
  func.func @transform_29(%arg0: i32) -> (i32, i32, i32) {
    %c0_i32 = arith.constant 0 : i32
    %c0_i32_0 = arith.constant 0 : i32
    %c0_i32_1 = arith.constant 0 : i32
    return %arg0, %c0_i32, %c0_i32_0 : i32, i32, i32
  }
}

module attributes {stable_mosaic.version = 11 : i64} {
  func.func @_bev_head_kernel(%arg0: i32, %arg1: memref<1x4x64xf32, #tpu.memory_space<vmem>>, %arg2: memref<16x4xf32, #tpu.memory_space<vmem>>, %arg3: memref<16x1xf32, #tpu.memory_space<vmem>>, %arg4: memref<9x64x64xf32, #tpu.memory_space<vmem>>, %arg5: memref<9x16x16xf32, #tpu.memory_space<vmem>>, %arg6: memref<16x1xf32, #tpu.memory_space<vmem>>, %arg7: memref<7x16xf32, #tpu.memory_space<vmem>>, %arg8: memref<7x1xf32, #tpu.memory_space<vmem>>, %arg9: memref<64x512xf32, #tpu.memory_space<vmem>>, %arg10: memref<1x7x512xf32, #tpu.memory_space<vmem>>) attributes {dimension_semantics = [#tpu.dimension_semantics<parallel>], iteration_bounds = array<i64: 2>, scalar_prefetch = 0 : i64, scratch_operands = 0 : i64, tpu.core_type = #tpu.core_type<tc>, window_params = [{transform_indices = @transform_0, window_bounds = array<i64: 1, 4, 64>}, {pipeline_mode = #tpu.pipeline_mode<synchronous>, transform_indices = @transform_1, window_bounds = array<i64: 16, 4>}, {pipeline_mode = #tpu.pipeline_mode<synchronous>, transform_indices = @transform_2, window_bounds = array<i64: 16, 1>}, {pipeline_mode = #tpu.pipeline_mode<synchronous>, transform_indices = @transform_3, window_bounds = array<i64: 9, 64, 64>}, {pipeline_mode = #tpu.pipeline_mode<synchronous>, transform_indices = @transform_4, window_bounds = array<i64: 9, 16, 16>}, {pipeline_mode = #tpu.pipeline_mode<synchronous>, transform_indices = @transform_5, window_bounds = array<i64: 16, 1>}, {pipeline_mode = #tpu.pipeline_mode<synchronous>, transform_indices = @transform_6, window_bounds = array<i64: 7, 16>}, {pipeline_mode = #tpu.pipeline_mode<synchronous>, transform_indices = @transform_7, window_bounds = array<i64: 7, 1>}, {pipeline_mode = #tpu.pipeline_mode<synchronous>, transform_indices = @transform_8, window_bounds = array<i64: 64, 512>}, {transform_indices = @transform_9, window_bounds = array<i64: 1, 7, 512>}]} {
    %c0 = arith.constant 0 : index
    %c0_0 = arith.constant 0 : index
    %0 = vector.load %arg2[%c0, %c0_0] : memref<16x4xf32, #tpu.memory_space<vmem>>, vector<16x4xf32>
    %c0_1 = arith.constant 0 : index
    %c0_2 = arith.constant 0 : index
    %c0_3 = arith.constant 0 : index
    %1 = vector.load %arg1[%c0_1, %c0_2, %c0_3] : memref<1x4x64xf32, #tpu.memory_space<vmem>>, vector<1x4x64xf32>
    %2 = vector.shape_cast %1 : vector<1x4x64xf32> to vector<4x64xf32>
    %3 = arith.truncf %0 : vector<16x4xf32> to vector<16x4xbf16>
    %4 = arith.truncf %2 : vector<4x64xf32> to vector<4x64xbf16>
    %cst = arith.constant dense<0.000000e+00> : vector<16x64xf32>
    %5 = tpu.matmul %3, %4, %cst {dimension_numbers = #tpu.dot_dimension_numbers<[1], [0], [0], [1], [0, 0, 1, 1], [], []>} : vector<16x4xbf16>, vector<4x64xbf16>, vector<16x64xf32> -> vector<16x64xf32>
    %c0_4 = arith.constant 0 : index
    %c0_5 = arith.constant 0 : index
    %6 = vector.load %arg3[%c0_4, %c0_5] : memref<16x1xf32, #tpu.memory_space<vmem>>, vector<16x1xf32>
    %7 = vector.broadcast %6 : vector<16x1xf32> to vector<16x64xf32>
    %8 = arith.addf %5, %7 : vector<16x64xf32>
    %c0_6 = arith.constant 0 : index
    %c0_7 = arith.constant 0 : index
    %c0_8 = arith.constant 0 : index
    %9 = vector.load %arg5[%c0_6, %c0_7, %c0_8] : memref<9x16x16xf32, #tpu.memory_space<vmem>>, vector<1x16x16xf32>
    %10 = vector.shape_cast %9 : vector<1x16x16xf32> to vector<16x16xf32>
    %c0_9 = arith.constant 0 : index
    %c0_10 = arith.constant 0 : index
    %c0_11 = arith.constant 0 : index
    %11 = vector.load %arg4[%c0_9, %c0_10, %c0_11] : memref<9x64x64xf32, #tpu.memory_space<vmem>>, vector<1x64x64xf32>
    %12 = vector.shape_cast %11 : vector<1x64x64xf32> to vector<64x64xf32>
    %13 = arith.truncf %8 : vector<16x64xf32> to vector<16x64xbf16>
    %14 = arith.truncf %12 : vector<64x64xf32> to vector<64x64xbf16>
    %cst_12 = arith.constant dense<0.000000e+00> : vector<16x64xf32>
    %15 = tpu.matmul %13, %14, %cst_12 {dimension_numbers = #tpu.dot_dimension_numbers<[1], [0], [0], [1], [0, 0, 1, 1], [], []>} : vector<16x64xbf16>, vector<64x64xbf16>, vector<16x64xf32> -> vector<16x64xf32>
    %16 = arith.truncf %10 : vector<16x16xf32> to vector<16x16xbf16>
    %17 = arith.truncf %15 : vector<16x64xf32> to vector<16x64xbf16>
    %cst_13 = arith.constant dense<0.000000e+00> : vector<16x64xf32>
    %18 = tpu.matmul %16, %17, %cst_13 {dimension_numbers = #tpu.dot_dimension_numbers<[1], [0], [0], [1], [0, 0, 1, 1], [], []>} : vector<16x16xbf16>, vector<16x64xbf16>, vector<16x64xf32> -> vector<16x64xf32>
    %c1 = arith.constant 1 : index
    %c0_14 = arith.constant 0 : index
    %c0_15 = arith.constant 0 : index
    %19 = vector.load %arg5[%c1, %c0_14, %c0_15] : memref<9x16x16xf32, #tpu.memory_space<vmem>>, vector<1x16x16xf32>
    %20 = vector.shape_cast %19 : vector<1x16x16xf32> to vector<16x16xf32>
    %c1_16 = arith.constant 1 : index
    %c0_17 = arith.constant 0 : index
    %c0_18 = arith.constant 0 : index
    %21 = vector.load %arg4[%c1_16, %c0_17, %c0_18] : memref<9x64x64xf32, #tpu.memory_space<vmem>>, vector<1x64x64xf32>
    %22 = vector.shape_cast %21 : vector<1x64x64xf32> to vector<64x64xf32>
    %23 = arith.truncf %8 : vector<16x64xf32> to vector<16x64xbf16>
    %24 = arith.truncf %22 : vector<64x64xf32> to vector<64x64xbf16>
    %cst_19 = arith.constant dense<0.000000e+00> : vector<16x64xf32>
    %25 = tpu.matmul %23, %24, %cst_19 {dimension_numbers = #tpu.dot_dimension_numbers<[1], [0], [0], [1], [0, 0, 1, 1], [], []>} : vector<16x64xbf16>, vector<64x64xbf16>, vector<16x64xf32> -> vector<16x64xf32>
    %26 = arith.truncf %20 : vector<16x16xf32> to vector<16x16xbf16>
    %27 = arith.truncf %25 : vector<16x64xf32> to vector<16x64xbf16>
    %cst_20 = arith.constant dense<0.000000e+00> : vector<16x64xf32>
    %28 = tpu.matmul %26, %27, %cst_20 {dimension_numbers = #tpu.dot_dimension_numbers<[1], [0], [0], [1], [0, 0, 1, 1], [], []>} : vector<16x16xbf16>, vector<16x64xbf16>, vector<16x64xf32> -> vector<16x64xf32>
    %29 = arith.addf %18, %28 : vector<16x64xf32>
    %c2 = arith.constant 2 : index
    %c0_21 = arith.constant 0 : index
    %c0_22 = arith.constant 0 : index
    %30 = vector.load %arg5[%c2, %c0_21, %c0_22] : memref<9x16x16xf32, #tpu.memory_space<vmem>>, vector<1x16x16xf32>
    %31 = vector.shape_cast %30 : vector<1x16x16xf32> to vector<16x16xf32>
    %c2_23 = arith.constant 2 : index
    %c0_24 = arith.constant 0 : index
    %c0_25 = arith.constant 0 : index
    %32 = vector.load %arg4[%c2_23, %c0_24, %c0_25] : memref<9x64x64xf32, #tpu.memory_space<vmem>>, vector<1x64x64xf32>
    %33 = vector.shape_cast %32 : vector<1x64x64xf32> to vector<64x64xf32>
    %34 = arith.truncf %8 : vector<16x64xf32> to vector<16x64xbf16>
    %35 = arith.truncf %33 : vector<64x64xf32> to vector<64x64xbf16>
    %cst_26 = arith.constant dense<0.000000e+00> : vector<16x64xf32>
    %36 = tpu.matmul %34, %35, %cst_26 {dimension_numbers = #tpu.dot_dimension_numbers<[1], [0], [0], [1], [0, 0, 1, 1], [], []>} : vector<16x64xbf16>, vector<64x64xbf16>, vector<16x64xf32> -> vector<16x64xf32>
    %37 = arith.truncf %31 : vector<16x16xf32> to vector<16x16xbf16>
    %38 = arith.truncf %36 : vector<16x64xf32> to vector<16x64xbf16>
    %cst_27 = arith.constant dense<0.000000e+00> : vector<16x64xf32>
    %39 = tpu.matmul %37, %38, %cst_27 {dimension_numbers = #tpu.dot_dimension_numbers<[1], [0], [0], [1], [0, 0, 1, 1], [], []>} : vector<16x16xbf16>, vector<16x64xbf16>, vector<16x64xf32> -> vector<16x64xf32>
    %40 = arith.addf %29, %39 : vector<16x64xf32>
    %c3 = arith.constant 3 : index
    %c0_28 = arith.constant 0 : index
    %c0_29 = arith.constant 0 : index
    %41 = vector.load %arg5[%c3, %c0_28, %c0_29] : memref<9x16x16xf32, #tpu.memory_space<vmem>>, vector<1x16x16xf32>
    %42 = vector.shape_cast %41 : vector<1x16x16xf32> to vector<16x16xf32>
    %c3_30 = arith.constant 3 : index
    %c0_31 = arith.constant 0 : index
    %c0_32 = arith.constant 0 : index
    %43 = vector.load %arg4[%c3_30, %c0_31, %c0_32] : memref<9x64x64xf32, #tpu.memory_space<vmem>>, vector<1x64x64xf32>
    %44 = vector.shape_cast %43 : vector<1x64x64xf32> to vector<64x64xf32>
    %45 = arith.truncf %8 : vector<16x64xf32> to vector<16x64xbf16>
    %46 = arith.truncf %44 : vector<64x64xf32> to vector<64x64xbf16>
    %cst_33 = arith.constant dense<0.000000e+00> : vector<16x64xf32>
    %47 = tpu.matmul %45, %46, %cst_33 {dimension_numbers = #tpu.dot_dimension_numbers<[1], [0], [0], [1], [0, 0, 1, 1], [], []>} : vector<16x64xbf16>, vector<64x64xbf16>, vector<16x64xf32> -> vector<16x64xf32>
    %48 = arith.truncf %42 : vector<16x16xf32> to vector<16x16xbf16>
    %49 = arith.truncf %47 : vector<16x64xf32> to vector<16x64xbf16>
    %cst_34 = arith.constant dense<0.000000e+00> : vector<16x64xf32>
    %50 = tpu.matmul %48, %49, %cst_34 {dimension_numbers = #tpu.dot_dimension_numbers<[1], [0], [0], [1], [0, 0, 1, 1], [], []>} : vector<16x16xbf16>, vector<16x64xbf16>, vector<16x64xf32> -> vector<16x64xf32>
    %51 = arith.addf %40, %50 : vector<16x64xf32>
    %c4 = arith.constant 4 : index
    %c0_35 = arith.constant 0 : index
    %c0_36 = arith.constant 0 : index
    %52 = vector.load %arg5[%c4, %c0_35, %c0_36] : memref<9x16x16xf32, #tpu.memory_space<vmem>>, vector<1x16x16xf32>
    %53 = vector.shape_cast %52 : vector<1x16x16xf32> to vector<16x16xf32>
    %c4_37 = arith.constant 4 : index
    %c0_38 = arith.constant 0 : index
    %c0_39 = arith.constant 0 : index
    %54 = vector.load %arg4[%c4_37, %c0_38, %c0_39] : memref<9x64x64xf32, #tpu.memory_space<vmem>>, vector<1x64x64xf32>
    %55 = vector.shape_cast %54 : vector<1x64x64xf32> to vector<64x64xf32>
    %56 = arith.truncf %8 : vector<16x64xf32> to vector<16x64xbf16>
    %57 = arith.truncf %55 : vector<64x64xf32> to vector<64x64xbf16>
    %cst_40 = arith.constant dense<0.000000e+00> : vector<16x64xf32>
    %58 = tpu.matmul %56, %57, %cst_40 {dimension_numbers = #tpu.dot_dimension_numbers<[1], [0], [0], [1], [0, 0, 1, 1], [], []>} : vector<16x64xbf16>, vector<64x64xbf16>, vector<16x64xf32> -> vector<16x64xf32>
    %59 = arith.truncf %53 : vector<16x16xf32> to vector<16x16xbf16>
    %60 = arith.truncf %58 : vector<16x64xf32> to vector<16x64xbf16>
    %cst_41 = arith.constant dense<0.000000e+00> : vector<16x64xf32>
    %61 = tpu.matmul %59, %60, %cst_41 {dimension_numbers = #tpu.dot_dimension_numbers<[1], [0], [0], [1], [0, 0, 1, 1], [], []>} : vector<16x16xbf16>, vector<16x64xbf16>, vector<16x64xf32> -> vector<16x64xf32>
    %62 = arith.addf %51, %61 : vector<16x64xf32>
    %c5 = arith.constant 5 : index
    %c0_42 = arith.constant 0 : index
    %c0_43 = arith.constant 0 : index
    %63 = vector.load %arg5[%c5, %c0_42, %c0_43] : memref<9x16x16xf32, #tpu.memory_space<vmem>>, vector<1x16x16xf32>
    %64 = vector.shape_cast %63 : vector<1x16x16xf32> to vector<16x16xf32>
    %c5_44 = arith.constant 5 : index
    %c0_45 = arith.constant 0 : index
    %c0_46 = arith.constant 0 : index
    %65 = vector.load %arg4[%c5_44, %c0_45, %c0_46] : memref<9x64x64xf32, #tpu.memory_space<vmem>>, vector<1x64x64xf32>
    %66 = vector.shape_cast %65 : vector<1x64x64xf32> to vector<64x64xf32>
    %67 = arith.truncf %8 : vector<16x64xf32> to vector<16x64xbf16>
    %68 = arith.truncf %66 : vector<64x64xf32> to vector<64x64xbf16>
    %cst_47 = arith.constant dense<0.000000e+00> : vector<16x64xf32>
    %69 = tpu.matmul %67, %68, %cst_47 {dimension_numbers = #tpu.dot_dimension_numbers<[1], [0], [0], [1], [0, 0, 1, 1], [], []>} : vector<16x64xbf16>, vector<64x64xbf16>, vector<16x64xf32> -> vector<16x64xf32>
    %70 = arith.truncf %64 : vector<16x16xf32> to vector<16x16xbf16>
    %71 = arith.truncf %69 : vector<16x64xf32> to vector<16x64xbf16>
    %cst_48 = arith.constant dense<0.000000e+00> : vector<16x64xf32>
    %72 = tpu.matmul %70, %71, %cst_48 {dimension_numbers = #tpu.dot_dimension_numbers<[1], [0], [0], [1], [0, 0, 1, 1], [], []>} : vector<16x16xbf16>, vector<16x64xbf16>, vector<16x64xf32> -> vector<16x64xf32>
    %73 = arith.addf %62, %72 : vector<16x64xf32>
    %c6 = arith.constant 6 : index
    %c0_49 = arith.constant 0 : index
    %c0_50 = arith.constant 0 : index
    %74 = vector.load %arg5[%c6, %c0_49, %c0_50] : memref<9x16x16xf32, #tpu.memory_space<vmem>>, vector<1x16x16xf32>
    %75 = vector.shape_cast %74 : vector<1x16x16xf32> to vector<16x16xf32>
    %c6_51 = arith.constant 6 : index
    %c0_52 = arith.constant 0 : index
    %c0_53 = arith.constant 0 : index
    %76 = vector.load %arg4[%c6_51, %c0_52, %c0_53] : memref<9x64x64xf32, #tpu.memory_space<vmem>>, vector<1x64x64xf32>
    %77 = vector.shape_cast %76 : vector<1x64x64xf32> to vector<64x64xf32>
    %78 = arith.truncf %8 : vector<16x64xf32> to vector<16x64xbf16>
    %79 = arith.truncf %77 : vector<64x64xf32> to vector<64x64xbf16>
    %cst_54 = arith.constant dense<0.000000e+00> : vector<16x64xf32>
    %80 = tpu.matmul %78, %79, %cst_54 {dimension_numbers = #tpu.dot_dimension_numbers<[1], [0], [0], [1], [0, 0, 1, 1], [], []>} : vector<16x64xbf16>, vector<64x64xbf16>, vector<16x64xf32> -> vector<16x64xf32>
    %81 = arith.truncf %75 : vector<16x16xf32> to vector<16x16xbf16>
    %82 = arith.truncf %80 : vector<16x64xf32> to vector<16x64xbf16>
    %cst_55 = arith.constant dense<0.000000e+00> : vector<16x64xf32>
    %83 = tpu.matmul %81, %82, %cst_55 {dimension_numbers = #tpu.dot_dimension_numbers<[1], [0], [0], [1], [0, 0, 1, 1], [], []>} : vector<16x16xbf16>, vector<16x64xbf16>, vector<16x64xf32> -> vector<16x64xf32>
    %84 = arith.addf %73, %83 : vector<16x64xf32>
    %c7 = arith.constant 7 : index
    %c0_56 = arith.constant 0 : index
    %c0_57 = arith.constant 0 : index
    %85 = vector.load %arg5[%c7, %c0_56, %c0_57] : memref<9x16x16xf32, #tpu.memory_space<vmem>>, vector<1x16x16xf32>
    %86 = vector.shape_cast %85 : vector<1x16x16xf32> to vector<16x16xf32>
    %c7_58 = arith.constant 7 : index
    %c0_59 = arith.constant 0 : index
    %c0_60 = arith.constant 0 : index
    %87 = vector.load %arg4[%c7_58, %c0_59, %c0_60] : memref<9x64x64xf32, #tpu.memory_space<vmem>>, vector<1x64x64xf32>
    %88 = vector.shape_cast %87 : vector<1x64x64xf32> to vector<64x64xf32>
    %89 = arith.truncf %8 : vector<16x64xf32> to vector<16x64xbf16>
    %90 = arith.truncf %88 : vector<64x64xf32> to vector<64x64xbf16>
    %cst_61 = arith.constant dense<0.000000e+00> : vector<16x64xf32>
    %91 = tpu.matmul %89, %90, %cst_61 {dimension_numbers = #tpu.dot_dimension_numbers<[1], [0], [0], [1], [0, 0, 1, 1], [], []>} : vector<16x64xbf16>, vector<64x64xbf16>, vector<16x64xf32> -> vector<16x64xf32>
    %92 = arith.truncf %86 : vector<16x16xf32> to vector<16x16xbf16>
    %93 = arith.truncf %91 : vector<16x64xf32> to vector<16x64xbf16>
    %cst_62 = arith.constant dense<0.000000e+00> : vector<16x64xf32>
    %94 = tpu.matmul %92, %93, %cst_62 {dimension_numbers = #tpu.dot_dimension_numbers<[1], [0], [0], [1], [0, 0, 1, 1], [], []>} : vector<16x16xbf16>, vector<16x64xbf16>, vector<16x64xf32> -> vector<16x64xf32>
    %95 = arith.addf %84, %94 : vector<16x64xf32>
    %c8 = arith.constant 8 : index
    %c0_63 = arith.constant 0 : index
    %c0_64 = arith.constant 0 : index
    %96 = vector.load %arg5[%c8, %c0_63, %c0_64] : memref<9x16x16xf32, #tpu.memory_space<vmem>>, vector<1x16x16xf32>
    %97 = vector.shape_cast %96 : vector<1x16x16xf32> to vector<16x16xf32>
    %c8_65 = arith.constant 8 : index
    %c0_66 = arith.constant 0 : index
    %c0_67 = arith.constant 0 : index
    %98 = vector.load %arg4[%c8_65, %c0_66, %c0_67] : memref<9x64x64xf32, #tpu.memory_space<vmem>>, vector<1x64x64xf32>
    %99 = vector.shape_cast %98 : vector<1x64x64xf32> to vector<64x64xf32>
    %100 = arith.truncf %8 : vector<16x64xf32> to vector<16x64xbf16>
    %101 = arith.truncf %99 : vector<64x64xf32> to vector<64x64xbf16>
    %cst_68 = arith.constant dense<0.000000e+00> : vector<16x64xf32>
    %102 = tpu.matmul %100, %101, %cst_68 {dimension_numbers = #tpu.dot_dimension_numbers<[1], [0], [0], [1], [0, 0, 1, 1], [], []>} : vector<16x64xbf16>, vector<64x64xbf16>, vector<16x64xf32> -> vector<16x64xf32>
    %103 = arith.truncf %97 : vector<16x16xf32> to vector<16x16xbf16>
    %104 = arith.truncf %102 : vector<16x64xf32> to vector<16x64xbf16>
    %cst_69 = arith.constant dense<0.000000e+00> : vector<16x64xf32>
    %105 = tpu.matmul %103, %104, %cst_69 {dimension_numbers = #tpu.dot_dimension_numbers<[1], [0], [0], [1], [0, 0, 1, 1], [], []>} : vector<16x16xbf16>, vector<16x64xbf16>, vector<16x64xf32> -> vector<16x64xf32>
    %106 = arith.addf %95, %105 : vector<16x64xf32>
    %c0_70 = arith.constant 0 : index
    %c0_71 = arith.constant 0 : index
    %107 = vector.load %arg6[%c0_70, %c0_71] : memref<16x1xf32, #tpu.memory_space<vmem>>, vector<16x1xf32>
    %108 = vector.broadcast %107 : vector<16x1xf32> to vector<16x64xf32>
    %109 = arith.addf %106, %108 : vector<16x64xf32>
    %cst_72 = arith.constant 0.000000e+00 : f32
    %110 = vector.broadcast %cst_72 : f32 to vector<16x64xf32>
    %111 = arith.maximumf %109, %110 : vector<16x64xf32>
    %c0_73 = arith.constant 0 : index
    %c0_74 = arith.constant 0 : index
    %112 = vector.load %arg7[%c0_73, %c0_74] : memref<7x16xf32, #tpu.memory_space<vmem>>, vector<7x16xf32>
    %113 = arith.truncf %112 : vector<7x16xf32> to vector<7x16xbf16>
    %114 = arith.truncf %111 : vector<16x64xf32> to vector<16x64xbf16>
    %cst_75 = arith.constant dense<0.000000e+00> : vector<7x64xf32>
    %115 = tpu.matmul %113, %114, %cst_75 {dimension_numbers = #tpu.dot_dimension_numbers<[1], [0], [0], [1], [0, 0, 1, 1], [], []>} : vector<7x16xbf16>, vector<16x64xbf16>, vector<7x64xf32> -> vector<7x64xf32>
    %c0_76 = arith.constant 0 : index
    %c0_77 = arith.constant 0 : index
    %116 = vector.load %arg8[%c0_76, %c0_77] : memref<7x1xf32, #tpu.memory_space<vmem>>, vector<7x1xf32>
    %117 = vector.broadcast %116 : vector<7x1xf32> to vector<7x64xf32>
    %118 = arith.addf %115, %117 : vector<7x64xf32>
    %c0_78 = arith.constant 0 : index
    %c0_79 = arith.constant 0 : index
    %119 = vector.load %arg9[%c0_78, %c0_79] : memref<64x512xf32, #tpu.memory_space<vmem>>, vector<64x512xf32>
    %120 = arith.truncf %118 : vector<7x64xf32> to vector<7x64xbf16>
    %121 = arith.truncf %119 : vector<64x512xf32> to vector<64x512xbf16>
    %cst_80 = arith.constant dense<0.000000e+00> : vector<7x512xf32>
    %122 = tpu.matmul %120, %121, %cst_80 {dimension_numbers = #tpu.dot_dimension_numbers<[1], [0], [0], [1], [0, 0, 1, 1], [], []>} : vector<7x64xbf16>, vector<64x512xbf16>, vector<7x512xf32> -> vector<7x512xf32>
    %c0_81 = arith.constant 0 : index
    %c0_82 = arith.constant 0 : index
    %c0_83 = arith.constant 0 : index
    %123 = vector.load %arg10[%c0_81, %c0_82, %c0_83] : memref<1x7x512xf32, #tpu.memory_space<vmem>>, vector<1x7x512xf32>
    %124 = vector.shape_cast %123 : vector<1x7x512xf32> to vector<7x512xf32>
    %125 = vector.shape_cast %122 : vector<7x512xf32> to vector<1x7x512xf32>
    tpu.vector_store %arg10[%c0_81, %c0_82, %c0_83], %125 {strides = array<i32>} : memref<1x7x512xf32, #tpu.memory_space<vmem>>, vector<1x7x512xf32>,
    return
  }
  func.func @transform_0(%arg0: i32) -> (i32, i32, i32) {
    %c0_i32 = arith.constant 0 : i32
    %c0_i32_0 = arith.constant 0 : i32
    %c0_i32_1 = arith.constant 0 : i32
    return %arg0, %c0_i32, %c0_i32_0 : i32, i32, i32
  }
  func.func @transform_1(%arg0: i32) -> (i32, i32) {
    %c0_i32 = arith.constant 0 : i32
    %c0_i32_0 = arith.constant 0 : i32
    %c0_i32_1 = arith.constant 0 : i32
    return %c0_i32, %c0_i32_0 : i32, i32
  }
  func.func @transform_2(%arg0: i32) -> (i32, i32) {
    %c0_i32 = arith.constant 0 : i32
    %c0_i32_0 = arith.constant 0 : i32
    %c0_i32_1 = arith.constant 0 : i32
    return %c0_i32, %c0_i32_0 : i32, i32
  }
  func.func @transform_3(%arg0: i32) -> (i32, i32, i32) {
    %c0_i32 = arith.constant 0 : i32
    %c0_i32_0 = arith.constant 0 : i32
    %c0_i32_1 = arith.constant 0 : i32
    %c0_i32_2 = arith.constant 0 : i32
    return %c0_i32, %c0_i32_0, %c0_i32_1 : i32, i32, i32
  }
  func.func @transform_4(%arg0: i32) -> (i32, i32, i32) {
    %c0_i32 = arith.constant 0 : i32
    %c0_i32_0 = arith.constant 0 : i32
    %c0_i32_1 = arith.constant 0 : i32
    %c0_i32_2 = arith.constant 0 : i32
    return %c0_i32, %c0_i32_0, %c0_i32_1 : i32, i32, i32
  }
  func.func @transform_5(%arg0: i32) -> (i32, i32) {
    %c0_i32 = arith.constant 0 : i32
    %c0_i32_0 = arith.constant 0 : i32
    %c0_i32_1 = arith.constant 0 : i32
    return %c0_i32, %c0_i32_0 : i32, i32
  }
  func.func @transform_6(%arg0: i32) -> (i32, i32) {
    %c0_i32 = arith.constant 0 : i32
    %c0_i32_0 = arith.constant 0 : i32
    %c0_i32_1 = arith.constant 0 : i32
    return %c0_i32, %c0_i32_0 : i32, i32
  }
  func.func @transform_7(%arg0: i32) -> (i32, i32) {
    %c0_i32 = arith.constant 0 : i32
    %c0_i32_0 = arith.constant 0 : i32
    %c0_i32_1 = arith.constant 0 : i32
    return %c0_i32, %c0_i32_0 : i32, i32
  }
  func.func @transform_8(%arg0: i32) -> (i32, i32) {
    %c0_i32 = arith.constant 0 : i32
    %c0_i32_0 = arith.constant 0 : i32
    %c0_i32_1 = arith.constant 0 : i32
    return %c0_i32, %c0_i32_0 : i32, i32
  }
  func.func @transform_9(%arg0: i32) -> (i32, i32, i32) {
    %c0_i32 = arith.constant 0 : i32
    %c0_i32_0 = arith.constant 0 : i32
    %c0_i32_1 = arith.constant 0 : i32
    return %arg0, %c0_i32, %c0_i32_0 : i32, i32, i32
  }
}

</mosaic_0001>

<bundles_post_ra>
// kernel: transfuser_forward.23
= control target key start
LH: loop header
LB: loop body
LE: loop exit
PB: predicated region body
PF: predicated region fallthrough
CT: control target
= control target key end

     0   :  { %s2031_s30 = smov 0   ;;  %s2565_s0 = inlined_call_operand.vmem [shape: f32[2,4,64], index: 0, kind: input, shape index: {}]   ;;  %s2566_s1 = inlined_call_operand.vmem [shape: f32[16,4], index: 1, kind: input, shape index: {}]   ;;  %s2567_s2 = inlined_call_operand.vmem [shape: f32[16,1], index: 2, kind: input, shape index: {}]   ;;  %s2568_s3 = inlined_call_operand.vmem [shape: f32[9,64,64], index: 3, kind: input, shape index: {}]   ;;  %s2569_s4 = inlined_call_operand.vmem [shape: f32[9,16,16], index: 4, kind: input, shape index: {}]   ;;  %s2570_s5 = inlined_call_operand.vmem [shape: f32[16,1], index: 5, kind: input, shape index: {}]   ;;  %s2571_s6 = inlined_call_operand.vmem [shape: f32[7,16], index: 6, kind: input, shape index: {}]   ;;  %s2572_s7 = inlined_call_operand.vmem [shape: f32[7,1], index: 7, kind: input, shape index: {}]   ;;  %s2573_s8 = inlined_call_operand.vmem [shape: f32[64,512], index: 8, kind: input, shape index: {}]   ;;  %s2574_s9 = inlined_call_operand.vmem [shape: f32[2,7,512], index: 9, kind: output, shape index: {}]  }
   0x1 LB: > { %s1603_s10 = sadd.s32 4294967295, %s1976_s30   ;;  %p1607_p0 = scmp.ge.s32.totalorder %s1976_s30, 1  ;;  %s1976_s30 = sphi %s2031_s30, %s19_s30  }
   0x2   : > { %p286_p1 = scmp.lt.s32.totalorder %s1976_s30, 3 }
   0x4   : > { %p287_p2 = pnand %p1607_p0, %p286_p1 }
   0x5   : > { %p321_p3 = scmp.lt.s32.totalorder (!%p287_p2), %s1603_s10, 1  ;;  %v1978_v0 = vmov (!%p287_p2), 0.0   ;;  %vm1979_vm0 = vmmov (!%p287_p2), 0   ;;  %v336_v1 = vld [vmem:[%s2567_s2] sm:$0xff] (!%p287_p2)  ;;  %v1980_v2 = vmov (!%p287_p2), 0   ;;  %v400_v4 = vld [vmem:[%s2568_s3 + $0x8] sm:$0xff] (!%p287_p2) }
   0x6   : > { %290 = sbr.rel (%p287_p2) target bundleno = 2761 (0xac9), region = 56  ;;  %1783 = vmatprep.subr.bf16.mxu0 (!%p287_p2), %v1978_v0  ;;  %1785 = vmatprep.mubr.msk.bf16.mxu0 (!%p287_p2), %vm1979_vm0, %v1978_v0  ;;  %v399_v3 = vld [vmem:[%s2568_s3] sm:$0xff] (!%p287_p2)  ;;  %v337_v6 = vld [vmem:[%s2567_s2 + $0x8] sm:$0xff] (!%p287_p2)  ;;  %vm352_vm1 = vcmask (!%p287_p2), 1041408   ;;  %v401_v10 = vld [vmem:[%s2568_s3 + $0x10] sm:$0xff] (!%p287_p2)  ;;  %vm348_vm2 = vcmask (!%p287_p2), 31744  }
   0x7   : > { %1968 = vset.pattern.permute.xlu0 (!%p287_p2), %v1980_v2  ;;  %1789 = vmatprep.subr.bf16.mxu1 (!%p287_p2), %v1978_v0  ;;  %v408_v5 = vpack.c.bf16 (!%p287_p2), %v400_v4, %v399_v3  ;;  %v331_v7 = vld [vmem:[%s2566_s1] sm:$0xff] (!%p287_p2)  ;;  %v332_v8 = vld [vmem:[%s2566_s1 + $0x8] sm:$0xff] (!%p287_p2)  ;;  %v402_v11 = vld [vmem:[%s2568_s3 + $0x18] sm:$0xff] (!%p287_p2)  ;;  %vm412_vm3 = vcmask (!%p287_p2), 523264   ;;  %vm518_vm4 = vcmask (!%p287_p2), 130048  }
   0x8   : > { %340 = vperm.xlu0 (!%p287_p2), %1968, %v336_v1   ;;  %1797 = vmatprep.mubr.msk.bf16.mxu1 (!%p287_p2), %vm1979_vm0, %v1978_v0  ;;  %v1615_v13 = vld [vmem:[%s2568_s3 + $0x40] sm:$0xff] (!%p287_p2)  ;;  %v1616_v14 = vld [vmem:[%s2568_s3 + $0x48] sm:$0xff] (!%p287_p2)  ;;  %v409_v15 = vpack.c.bf16 (!%p287_p2), %v402_v11, %v401_v10  ;;  %v334_v18 = vpack.c.bf16 (!%p287_p2), %v332_v8, %v331_v7  ;;  %v1617_v20 = vld [vmem:[%s2568_s3 + $0x50] sm:$0xff] (!%p287_p2) }
   0x9   : > { %1969 = vset.pattern.permute.xlu1 (!%p287_p2), %v1980_v2  ;;  %1790 = vmatpush3.bf16.msra.mxu1 (!%p287_p2), %v408_v5  ;;  %v1361_v16 = vld [vmem:[%s2572_s7] sm:$0x7f] (!%p287_p2)  ;;  %v471_v19 = vpack.c.bf16 (!%p287_p2), %v1616_v14, %v1615_v13  ;;  %v1618_v21 = vld [vmem:[%s2568_s3 + $0x58] sm:$0xff] (!%p287_p2)  ;;  %v404_v24 = vld [vmem:[%s2568_s3 + $0x28] sm:$0xff] (!%p287_p2) }
   0xa   : > { %1791 = vmatprep.subr.bf16.mxu1 (!%p287_p2), %v1978_v0  ;;  %v472_v22 = vpack.c.bf16 (!%p287_p2), %v1618_v21, %v1617_v20  ;;  %v403_v23 = vld [vmem:[%s2568_s3 + $0x20] sm:$0xff] (!%p287_p2)  ;;  %v1620_v27 = vld [vmem:[%s2568_s3 + $0x68] sm:$0xff] (!%p287_p2)  ;;  %v405_v29 = vld [vmem:[%s2568_s3 + $0x30] sm:$0xff] (!%p287_p2) }
   0xb   : > { %v1619_v25 = vld [vmem:[%s2568_s3 + $0x60] sm:$0xff] (!%p287_p2)  ;;  %v410_v26 = vpack.c.bf16 (!%p287_p2), %v404_v24, %v403_v23  ;;  %v406_v30 = vld [vmem:[%s2568_s3 + $0x38] sm:$0xff] (!%p287_p2)  ;;  %v1621_v31 = vld [vmem:[%s2568_s3 + $0x70] sm:$0xff] (!%p287_p2) }
   0xc   : > { %345 = vperm.xlu0 (!%p287_p2), %1968, %v337_v6   ;;  %v473_v28 = vpack.c.bf16 (!%p287_p2), %v1620_v27, %v1619_v25  ;;  %v411_v32 = vpack.c.bf16 (!%p287_p2), %v406_v30, %v405_v29  ;;  %v1622_v33 = vld [vmem:[%s2568_s3 + $0x78] sm:$0xff] (!%p287_p2)  ;;  %v1613_v46 = vld [vmem:[%s2569_s4 + $0x10] sm:$0xff] (!%p287_p2)  ;;  %v397_v50 = vld [vmem:[%s2569_s4] sm:$0xff] (!%p287_p2) }
   0xd   : > { %s2576_s10 = smov (!%p321_p3, %s1603_s10), 1  ;;  %1792 = vmatpush3.bf16.msra.mxu1 %v409_v15  ;;  %v474_v34 = vpack.c.bf16 %v1622_v33, %v1621_v31  ;;  %v1614_v49 = vld [vmem:[%s2569_s4 + $0x18] sm:$0xff]  ;;  %v398_v51 = vld [vmem:[%s2569_s4 + $0x8] sm:$0xff]  ;;  %v1628_v54 = vld [vmem:[%s2568_s3 + $0x80] sm:$0xff] }
   0xe   : > { %s1608_s17 = sshll.u32 %s2576_s10, 2  ;;  %1793 = vmatprep.subr.bf16.mxu1 %v1978_v0  ;;  %v1629_v55 = vld [vmem:[%s2568_s3 + $0x88] sm:$0xff]  ;;  %v516_v60 = vpack.c.bf16 %v1614_v49, %v1613_v46  ;;  %v457_v61 = vpack.c.bf16 %v398_v51, %v397_v50  ;;  %v1630_v63 = vld [vmem:[%s2568_s3 + $0x90] sm:$0xff]  ;;  %v1631_v1 = vld [vmem:[%s2568_s3 + $0x98] sm:$0xff]  ;;  %s1715_s28 = sshll.u32 %s2576_s10, 5 }
   0xf   : > { %s324_s22 = scalar_lea.vmem %s2565_s0, %s1608_s17  ;;  %v619_v62 = vpack.c.bf16 %v1629_v55, %v1628_v54  ;;  %v620_v3 = vpack.c.bf16 %v1631_v1, %v1630_v63  ;;  %v1632_v4 = vld [vmem:[%s2568_s3 + $0xa0] sm:$0xff]  ;;  %v1633_v5 = vld [vmem:[%s2568_s3 + $0xa8] sm:$0xff]  ;;  %v1634_v7 = vld [vmem:[%s2568_s3 + $0xb0] sm:$0xff]  ;;  %s329_s12 = scalar_lea.vmem %s2574_s9, %s1715_s28 }
  0x10   : > { %v333_v9 = vld [vmem:[%s324_s22] sm:$0xf]  ;;  %1364 = vperm.xlu0 %1968, %v1361_v16   ;;  %v621_v6 = vpack.c.bf16 %v1633_v5, %v1632_v4  ;;  %v1635_v8 = vld [vmem:[%s2568_s3 + $0xb8] sm:$0xff]  ;;  %v1627_v23 = vld [vmem:[%s2569_s4 + $0x28] sm:$0xff] }
  0x11   : > { %v335_v12 = vpack.c.bf16 %v333_v9, %v333_v9  ;;  %1794 = vmatpush3.bf16.msra.mxu1 %v410_v26  ;;  %v622_v9 = vpack.c.bf16 %v1635_v8, %v1634_v7  ;;  %v1640_v25 = vld [vmem:[%s2568_s3 + $0xc0] sm:$0xff]  ;;  %v1641_v26 = vld [vmem:[%s2568_s3 + $0xc8] sm:$0xff]  ;;  %v1642_v31 = vld [vmem:[%s2568_s3 + $0xd0] sm:$0xff] }
  0x12   : > { %1795 = vmatprep.subr.bf16.mxu1 %v1978_v0  ;;  %v724_v30 = vpack.c.bf16 %v1641_v26, %v1640_v25  ;;  %v1638_v49 = vld [vmem:[%s2569_s4 + $0x30] sm:$0xff]  ;;  %v1639_v50 = vld [vmem:[%s2569_s4 + $0x38] sm:$0xff]  ;;  %v1668_v25 = vld [vmem:[%s2568_s3 + $0x160] sm:$0xff] }
  0x13   : > { %v354_v17 = vsel %vm352_vm1, %v335_v12, 0  ;;  %v1658_v1 = vld [vmem:[%s2568_s3 + $0x130] sm:$0xff]  ;;  %v1669_v26 = vld [vmem:[%s2568_s3 + $0x168] sm:$0xff] }
  0x14   : > { %1784 = vmatpush3.bf16.msra.mxu0 %v354_v17 }
  0x15   : > { %1801 = vmatprep.subr.bf16.mxu0 %v1978_v0  ;;  %1796 = vmatpush3.bf16.msra.mxu1 %v411_v32  ;;  %v1643_v32 = vld [vmem:[%s2568_s3 + $0xd8] sm:$0xff] }
  0x16   : > { %1813 = vmatprep.subr.bf16.mxu1 %v1978_v0  ;;  %v725_v33 = vpack.c.bf16 %v1643_v32, %v1642_v31 }
  0x17   : > { %1786 = vmatmul.mubr.msk.bf16.vlgmr.msra.gmra.mrb[0].mxu0 %vm348_vm2, %v334_v18 }
  0x18   : > { %1802 = vmatpush3.bf16.msra.mxu0 %v471_v19  ;;  %1809 = vmatprep.mubr.msk.bf16.mxu0 %vm1979_vm0, %v1978_v0 }
  0x19   : > { %1803 = vmatprep.subr.bf16.mxu0 %v1978_v0 }
  0x1c   : > { %1804 = vmatpush3.bf16.msra.mxu0 %v472_v22  ;;  %v1626_v22 = vld [vmem:[%s2569_s4 + $0x20] sm:$0xff] }
  0x1d   : > { %1805 = vmatprep.subr.bf16.mxu0 %v1978_v0  ;;  %v664_v29 = vpack.c.bf16 %v1627_v23, %v1626_v22  ;;  %v1666_v22 = vld [vmem:[%s2568_s3 + $0x150] sm:$0xff]  ;;  %v1667_v23 = vld [vmem:[%s2568_s3 + $0x158] sm:$0xff] }
  0x20   : > { %1806 = vmatpush3.bf16.msra.mxu0 %v473_v28 }
  0x21   : > { %1807 = vmatprep.subr.bf16.mxu0 %v1978_v0 }
  0x24   : > { %1808 = vmatpush3.bf16.msra.mxu0 %v474_v34  ;;  %v1644_v34 = vld [vmem:[%s2568_s3 + $0xe0] sm:$0xff] }
  0x25   : > { %1819 = vmatprep.subr.bf16.mxu0 %v1978_v0 }
  0x87   : > { %v341_v35 = vpop.permute.xlu0 %340 }
  0x8b   : > { %v346_v38 = vpop.permute.xlu0 %345 }
  0xea   : > { %v390_v36 = vpop.f32.mrb[0].mxu0 }
  0xeb   : > { %v1787_v37 = vpop.f32.mrb[1].mxu0  ;;  %v391_v40 = vadd.f32 %v390_v36, %v341_v35  ;;  %v1645_v35 = vld [vmem:[%s2568_s3 + $0xe8] sm:$0xff] }
  0xec   : > { %v393_v39 = vpop.f32.mrb[2].mxu0  ;;  %v726_v36 = vpack.c.bf16 %v1645_v35, %v1644_v34  ;;  %v1646_v37 = vld [vmem:[%s2568_s3 + $0xf0] sm:$0xff] }
  0xed   : > { %v394_v41 = vadd.f32 %v393_v39, %v346_v38  ;;  %v1788_v42 = vpop.f32.mrb[3].mxu0  ;;  %v1647_v38 = vld [vmem:[%s2568_s3 + $0xf8] sm:$0xff] }
  0xee   : > { %v727_v39 = vpack.c.bf16 %v1647_v38, %v1646_v37 }
  0xef   : > { %v2127_v43 = vpack.c.bf16 %v394_v41, %v391_v40 }
  0xf1   : > { %1798 = vmatmul.mubr.msk.bf16.vlgmr.msra.gmra.mrb[0].mxu1 %vm412_vm3, %v2127_v43  ;;  %1810 = vmatmul.mubr.msk.bf16.vlgmr.msra.gmra.mrb[4].mxu0 %vm412_vm3, %v2127_v43 }
  0xf2   : > { %1815 = vmatprep.mubr.msk.bf16.mxu1 %vm1979_vm0, %v1978_v0  ;;  %1821 = vmatprep.mubr.msk.bf16.mxu0 %vm1979_vm0, %v1978_v0 }
 0x1c4   : > { %v450_v44 = vpop.f32.mrb[0].mxu1  ;;  %v509_v45 = vpop.f32.mrb[4].mxu0 }
 0x1c5   : > { %v1799_v47 = vpop.f32.mrb[1].mxu1  ;;  %v1811_v48 = vpop.f32.mrb[5].mxu0 }
 0x1c6   : > { %v453_v52 = vpop.f32.mrb[2].mxu1  ;;  %v512_v53 = vpop.f32.mrb[6].mxu0 }
 0x1c7   : > { %v458_v56 = vpack.c.bf16 %v453_v52, %v450_v44  ;;  %v517_v57 = vpack.c.bf16 %v512_v53, %v509_v45  ;;  %v1800_v58 = vpop.f32.mrb[3].mxu1  ;;  %v1812_v59 = vpop.f32.mrb[7].mxu0  ;;  %v1652_v52 = vld [vmem:[%s2568_s3 + $0x100] sm:$0xff]  ;;  %v1653_v53 = vld [vmem:[%s2568_s3 + $0x108] sm:$0xff] }
 0x1c8   : > { %v1654_v58 = vld [vmem:[%s2568_s3 + $0x110] sm:$0xff]  ;;  %v1655_v59 = vld [vmem:[%s2568_s3 + $0x118] sm:$0xff] }
 0x1c9   : > { %1814 = vmatpush3.bf16.msra.mxu1 %v517_v57  ;;  %1820 = vmatpush3.bf16.msra.mxu0 %v458_v56  ;;  %v769_v56 = vpack.c.bf16 %v1639_v50, %v1638_v49  ;;  %v829_v57 = vpack.c.bf16 %v1653_v53, %v1652_v52  ;;  %v1678_v49 = vld [vmem:[%s2568_s3 + $0x190] sm:$0xff]  ;;  %v1679_v50 = vld [vmem:[%s2568_s3 + $0x198] sm:$0xff]  ;;  %v1680_v52 = vld [vmem:[%s2568_s3 + $0x1a0] sm:$0xff] }
 0x1ca   : > { %1825 = vmatprep.subr.bf16.mxu1 %v1978_v0  ;;  %1837 = vmatprep.subr.bf16.mxu0 %v1978_v0  ;;  %v1681_v53 = vld [vmem:[%s2568_s3 + $0x1a8] sm:$0xff] }
 0x1cc   : > { %1816 = vmatmul.mubr.msk.bf16.vlgmr.msra.gmra.mrb[4].mxu1 %vm518_vm4, %v516_v60  ;;  %1822 = vmatmul.mubr.msk.bf16.vlgmr.msra.gmra.mrb[8].mxu0 %vm518_vm4, %v457_v61  ;;  %v830_v60 = vpack.c.bf16 %v1655_v59, %v1654_v58  ;;  %v1656_v61 = vld [vmem:[%s2568_s3 + $0x120] sm:$0xff] }
 0x1cd   : > { %1826 = vmatpush3.bf16.msra.mxu1 %v619_v62  ;;  %1833 = vmatprep.mubr.msk.bf16.mxu1 %vm1979_vm0, %v1978_v0  ;;  %v1657_v62 = vld [vmem:[%s2568_s3 + $0x128] sm:$0xff] }
 0x1ce   : > { %1827 = vmatprep.subr.bf16.mxu1 %v1978_v0  ;;  %1839 = vmatprep.mubr.msk.bf16.mxu0 %vm1979_vm0, %v1978_v0  ;;  %v831_v63 = vpack.c.bf16 %v1657_v62, %v1656_v61 }
 0x1d1   : > { %1828 = vmatpush3.bf16.msra.mxu1 %v620_v3  ;;  %v1659_v3 = vld [vmem:[%s2568_s3 + $0x138] sm:$0xff] }
 0x1d2   : > { %1829 = vmatprep.subr.bf16.mxu1 %v1978_v0  ;;  %v832_v4 = vpack.c.bf16 %v1659_v3, %v1658_v1 }
 0x1d5   : > { %1830 = vmatpush3.bf16.msra.mxu1 %v621_v6 }
 0x1d6   : > { %1831 = vmatprep.subr.bf16.mxu1 %v1978_v0 }
 0x1d9   : > { %1832 = vmatpush3.bf16.msra.mxu1 %v622_v9 }
 0x1da   : > { %1855 = vmatprep.subr.bf16.mxu1 %v1978_v0 }
 0x1dc   : > { %1834 = vmatmul.mubr.msk.bf16.vlgmr.msra.gmra.mrb[8].mxu1 %vm412_vm3, %v2127_v43 }
 0x1dd   : > { %1857 = vmatprep.mubr.msk.bf16.mxu1 %vm1979_vm0, %v1978_v0 }
 0x29f   : > { %v556_v10 = vpop.f32.mrb[4].mxu1  ;;  %v600_v11 = vpop.f32.mrb[8].mxu0 }
 0x2a0   : > { %v601_v12 = vadd.f32 %v600_v11, %v556_v10  ;;  %v1817_v13 = vpop.f32.mrb[5].mxu1  ;;  %v1823_v14 = vpop.f32.mrb[9].mxu0 }
 0x2a1   : > { %v559_v15 = vpop.f32.mrb[6].mxu1  ;;  %v603_v16 = vpop.f32.mrb[10].mxu0  ;;  %v1650_v13 = vld [vmem:[%s2569_s4 + $0x40] sm:$0xff]  ;;  %v1651_v14 = vld [vmem:[%s2569_s4 + $0x48] sm:$0xff] }
 0x2a2   : > { %v604_v17 = vadd.f32 %v603_v16, %v559_v15  ;;  %v1818_v18 = vpop.f32.mrb[7].mxu1  ;;  %v1824_v19 = vpop.f32.mrb[11].mxu0  ;;  %v1664_v16 = vld [vmem:[%s2568_s3 + $0x140] sm:$0xff] }
 0x2af   : > { %v657_v20 = vpop.f32.mrb[8].mxu1 }
 0x2b0   : > { %v1835_v21 = vpop.f32.mrb[9].mxu1 }
 0x2b1   : > { %v660_v24 = vpop.f32.mrb[10].mxu1 }
 0x2b2   : > { %v665_v27 = vpack.c.bf16 %v660_v24, %v657_v20  ;;  %v1836_v28 = vpop.f32.mrb[11].mxu1  ;;  %v874_v20 = vpack.c.bf16 %v1651_v14, %v1650_v13  ;;  %v935_v24 = vpack.c.bf16 %v1667_v23, %v1666_v22  ;;  %v1690_v13 = vld [vmem:[%s2568_s3 + $0x1d0] sm:$0xff]  ;;  %v1691_v14 = vld [vmem:[%s2568_s3 + $0x1d8] sm:$0xff] }
 0x2b3   : > { %v1670_v28 = vld [vmem:[%s2568_s3 + $0x170] sm:$0xff] }
 0x2b4   : > { %1838 = vmatpush3.bf16.msra.mxu0 %v665_v27  ;;  %v936_v27 = vpack.c.bf16 %v1669_v26, %v1668_v25 }
 0x2b5   : > { %1843 = vmatprep.subr.bf16.mxu0 %v1978_v0 }
 0x2b7   : > { %1840 = vmatmul.mubr.msk.bf16.vlgmr.msra.gmra.mrb[12].mxu0 %vm518_vm4, %v664_v29  ;;  %v1671_v29 = vld [vmem:[%s2568_s3 + $0x178] sm:$0xff] }
 0x2b8   : > { %1844 = vmatpush3.bf16.msra.mxu0 %v724_v30  ;;  %1851 = vmatprep.mubr.msk.bf16.mxu0 %vm1979_vm0, %v1978_v0  ;;  %v937_v30 = vpack.c.bf16 %v1671_v29, %v1670_v28 }
 0x2b9   : > { %1845 = vmatprep.subr.bf16.mxu0 %v1978_v0 }
 0x2bc   : > { %1846 = vmatpush3.bf16.msra.mxu0 %v725_v33 }
 0x2bd   : > { %1847 = vmatprep.subr.bf16.mxu0 %v1978_v0 }
 0x2c0   : > { %1848 = vmatpush3.bf16.msra.mxu0 %v726_v36 }
 0x2c1   : > { %1849 = vmatprep.subr.bf16.mxu0 %v1978_v0 }
 0x2c4   : > { %1850 = vmatpush3.bf16.msra.mxu0 %v727_v39  ;;  %v1662_v39 = vld [vmem:[%s2569_s4 + $0x50] sm:$0xff] }
 0x2c5   : > { %1873 = vmatprep.subr.bf16.mxu0 %v1978_v0 }
 0x2c7   : > { %1852 = vmatmul.mubr.msk.bf16.vlgmr.msra.gmra.mrb[16].mxu0 %vm412_vm3, %v2127_v43 }
 0x2c8   : > { %1875 = vmatprep.mubr.msk.bf16.mxu0 %vm1979_vm0, %v1978_v0 }
 0x38a   : > { %v703_v40 = vpop.f32.mrb[12].mxu0 }
 0x38b   : > { %v710_v41 = vadd.f32 %v703_v40, %v601_v12  ;;  %v1841_v42 = vpop.f32.mrb[13].mxu0  ;;  %v1663_v40 = vld [vmem:[%s2569_s4 + $0x58] sm:$0xff] }
 0x38c   : > { %v706_v44 = vpop.f32.mrb[14].mxu0  ;;  %v1676_v42 = vld [vmem:[%s2568_s3 + $0x180] sm:$0xff] }
 0x38d   : > { %v711_v45 = vadd.f32 %v706_v44, %v604_v17  ;;  %v1842_v46 = vpop.f32.mrb[15].mxu0  ;;  %v1665_v17 = vld [vmem:[%s2568_s3 + $0x148] sm:$0xff] }
 0x38e   : > { %v934_v21 = vpack.c.bf16 %v1665_v17, %v1664_v16  ;;  %v1677_v44 = vld [vmem:[%s2568_s3 + $0x188] sm:$0xff]  ;;  %v1692_v16 = vld [vmem:[%s2568_s3 + $0x1e0] sm:$0xff] }
 0x38f   : > { %v1693_v17 = vld [vmem:[%s2568_s3 + $0x1e8] sm:$0xff] }
 0x39a   : > { %v762_v47 = vpop.f32.mrb[16].mxu0 }
 0x39b   : > { %v1853_v48 = vpop.f32.mrb[17].mxu0 }
 0x39c   : > { %v765_v51 = vpop.f32.mrb[18].mxu0  ;;  %v1039_v48 = vpack.c.bf16 %v1677_v44, %v1676_v42  ;;  %v1704_v42 = vld [vmem:[%s2568_s3 + $0x220] sm:$0xff]  ;;  %v1705_v44 = vld [vmem:[%s2568_s3 + $0x228] sm:$0xff] }
 0x39d   : > { %v770_v54 = vpack.c.bf16 %v765_v51, %v762_v47  ;;  %v1854_v55 = vpop.f32.mrb[19].mxu0  ;;  %v979_v47 = vpack.c.bf16 %v1663_v40, %v1662_v39  ;;  %v1040_v51 = vpack.c.bf16 %v1679_v50, %v1678_v49  ;;  %v1702_v39 = vld [vmem:[%s2568_s3 + $0x210] sm:$0xff]  ;;  %v1703_v40 = vld [vmem:[%s2568_s3 + $0x218] sm:$0xff]  ;;  %v1342_v49 = vld [vmem:[%s2570_s5] sm:$0xff] }
 0x39e   : > { %v1682_v55 = vld [vmem:[%s2568_s3 + $0x1b0] sm:$0xff]  ;;  %1346 = vperm.xlu1 %1969, %v1342_v49   ;;  %v1343_v50 = vld [vmem:[%s2570_s5 + $0x8] sm:$0xff] }
 0x39f   : > { %1856 = vmatpush3.bf16.msra.mxu1 %v770_v54  ;;  %v1041_v54 = vpack.c.bf16 %v1681_v53, %v1680_v52 }
 0x3a0   : > { %1861 = vmatprep.subr.bf16.mxu1 %v1978_v0 }
 0x3a2   : > { %1858 = vmatmul.mubr.msk.bf16.vlgmr.msra.gmra.mrb[12].mxu1 %vm518_vm4, %v769_v56  ;;  %v1683_v56 = vld [vmem:[%s2568_s3 + $0x1b8] sm:$0xff]  ;;  %1351 = vperm.xlu1 %1969, %v1343_v50   ;;  %v1428_v50 = vld [vmem:[%s2573_s8 + $0x90] sm:$0xff] }
 0x3a3   : > { %1862 = vmatpush3.bf16.msra.mxu1 %v829_v57  ;;  %1869 = vmatprep.mubr.msk.bf16.mxu1 %vm1979_vm0, %v1978_v0  ;;  %v1042_v57 = vpack.c.bf16 %v1683_v56, %v1682_v55 }
 0x3a4   : > { %1863 = vmatprep.subr.bf16.mxu1 %v1978_v0 }
 0x3a7   : > { %1864 = vmatpush3.bf16.msra.mxu1 %v830_v60 }
 0x3a8   : > { %1865 = vmatprep.subr.bf16.mxu1 %v1978_v0 }
 0x3ab   : > { %1866 = vmatpush3.bf16.msra.mxu1 %v831_v63 }
 0x3ac   : > { %1867 = vmatprep.subr.bf16.mxu1 %v1978_v0 }
 0x3af   : > { %1868 = vmatpush3.bf16.msra.mxu1 %v832_v4  ;;  %v1674_v4 = vld [vmem:[%s2569_s4 + $0x60] sm:$0xff] }
 0x3b0   : > { %1891 = vmatprep.subr.bf16.mxu1 %v1978_v0 }
 0x3b2   : > { %1870 = vmatmul.mubr.msk.bf16.vlgmr.msra.gmra.mrb[16].mxu1 %vm412_vm3, %v2127_v43 }
 0x3b3   : > { %1893 = vmatprep.mubr.msk.bf16.mxu1 %vm1979_vm0, %v1978_v0 }
 0x475   : > { %v808_v5 = vpop.f32.mrb[12].mxu1 }
 0x476   : > { %v815_v6 = vadd.f32 %v808_v5, %v710_v41  ;;  %v1859_v7 = vpop.f32.mrb[13].mxu1  ;;  %v1675_v5 = vld [vmem:[%s2569_s4 + $0x68] sm:$0xff] }
 0x477   : > { %v811_v8 = vpop.f32.mrb[14].mxu1  ;;  %v1688_v7 = vld [vmem:[%s2568_s3 + $0x1c0] sm:$0xff] }
 0x478   : > { %v816_v9 = vadd.f32 %v811_v8, %v711_v45  ;;  %v1860_v10 = vpop.f32.mrb[15].mxu1  ;;  %v1689_v8 = vld [vmem:[%s2568_s3 + $0x1c8] sm:$0xff] }
 0x485   : > { %v867_v11 = vpop.f32.mrb[16].mxu1 }
 0x486   : > { %v1871_v12 = vpop.f32.mrb[17].mxu1 }
 0x487   : > { %v870_v15 = vpop.f32.mrb[18].mxu1  ;;  %v1144_v12 = vpack.c.bf16 %v1689_v8, %v1688_v7  ;;  %v1423_v8 = vld [vmem:[%s2573_s8 + $0x68] sm:$0xff] }
 0x488   : > { %v875_v18 = vpack.c.bf16 %v870_v15, %v867_v11  ;;  %v1872_v19 = vpop.f32.mrb[19].mxu1  ;;  %v1084_v11 = vpack.c.bf16 %v1675_v5, %v1674_v4  ;;  %v1145_v15 = vpack.c.bf16 %v1691_v14, %v1690_v13  ;;  %v1410_v5 = vld [vmem:[%s2573_s8] sm:$0xff]  ;;  %v1427_v13 = vld [vmem:[%s2573_s8 + $0x88] sm:$0xff] }
 0x489   : > { %v1694_v19 = vld [vmem:[%s2568_s3 + $0x1f0] sm:$0xff]  ;;  %v1431_v14 = vld [vmem:[%s2573_s8 + $0xa8] sm:$0xff] }
 0x48a   : > { %1874 = vmatpush3.bf16.msra.mxu0 %v875_v18  ;;  %v1146_v18 = vpack.c.bf16 %v1693_v17, %v1692_v16  ;;  %v1426_v16 = vld [vmem:[%s2573_s8 + $0x80] sm:$0xff] }
 0x48b   : > { %1879 = vmatprep.subr.bf16.mxu0 %v1978_v0  ;;  %v1430_v17 = vld [vmem:[%s2573_s8 + $0xa0] sm:$0xff] }
 0x48d   : > { %1876 = vmatmul.mubr.msk.bf16.vlgmr.msra.gmra.mrb[20].mxu0 %vm518_vm4, %v874_v20  ;;  %v1695_v20 = vld [vmem:[%s2568_s3 + $0x1f8] sm:$0xff] }
 0x48e   : > { %1880 = vmatpush3.bf16.msra.mxu0 %v934_v21  ;;  %1887 = vmatprep.mubr.msk.bf16.mxu0 %vm1979_vm0, %v1978_v0  ;;  %v1147_v21 = vpack.c.bf16 %v1695_v20, %v1694_v19  ;;  %v1347_v19 = vpop.permute.xlu1 %1346 }
 0x48f   : > { %1881 = vmatprep.subr.bf16.mxu0 %v1978_v0 }
 0x492   : > { %1882 = vmatpush3.bf16.msra.mxu0 %v935_v24 }
 0x493   : > { %1883 = vmatprep.subr.bf16.mxu0 %v1978_v0 }
 0x496   : > { %1884 = vmatpush3.bf16.msra.mxu0 %v936_v27 }
 0x497   : > { %1885 = vmatprep.subr.bf16.mxu0 %v1978_v0 }
 0x49a   : > { %1886 = vmatpush3.bf16.msra.mxu0 %v937_v30  ;;  %v1686_v30 = vld [vmem:[%s2569_s4 + $0x70] sm:$0xff] }
 0x49b   : > { %1909 = vmatprep.subr.bf16.mxu0 %v1978_v0 }
 0x49d   : > { %1888 = vmatmul.mubr.msk.bf16.vlgmr.msra.gmra.mrb[24].mxu0 %vm412_vm3, %v2127_v43 }
 0x49e   : > { %1911 = vmatprep.mubr.msk.bf16.mxu0 %vm1979_vm0, %v1978_v0 }
 0x560   : > { %v913_v31 = vpop.f32.mrb[20].mxu0 }
 0x561   : > { %v920_v32 = vadd.f32 %v913_v31, %v815_v6  ;;  %v1877_v33 = vpop.f32.mrb[21].mxu0  ;;  %v1687_v31 = vld [vmem:[%s2569_s4 + $0x78] sm:$0xff] }
 0x562   : > { %v916_v34 = vpop.f32.mrb[22].mxu0  ;;  %v1700_v33 = vld [vmem:[%s2568_s3 + $0x200] sm:$0xff] }
 0x563   : > { %v921_v35 = vadd.f32 %v916_v34, %v816_v9  ;;  %v1878_v36 = vpop.f32.mrb[23].mxu0  ;;  %v1701_v34 = vld [vmem:[%s2568_s3 + $0x208] sm:$0xff] }
 0x570   : > { %v972_v37 = vpop.f32.mrb[24].mxu0 }
 0x571   : > { %v1889_v38 = vpop.f32.mrb[25].mxu0 }
 0x572   : > { %v975_v41 = vpop.f32.mrb[26].mxu0  ;;  %v1249_v38 = vpack.c.bf16 %v1701_v34, %v1700_v33  ;;  %v1358_v33 = vld [vmem:[%s2571_s6] sm:$0x7f] }
 0x573   : > { %v980_v45 = vpack.c.bf16 %v975_v41, %v972_v37  ;;  %v1890_v46 = vpop.f32.mrb[27].mxu0  ;;  %v1189_v37 = vpack.c.bf16 %v1687_v31, %v1686_v30  ;;  %v1250_v41 = vpack.c.bf16 %v1703_v40, %v1702_v39  ;;  %v1417_v30 = vld [vmem:[%s2573_s8 + $0x38] sm:$0xff]  ;;  %v1359_v40 = vpack.c.bf16 %v1358_v33, %v1358_v33 }
 0x574   : > { %v1706_v46 = vld [vmem:[%s2568_s3 + $0x230] sm:$0xff]  ;;  %v1425_v39 = vld [vmem:[%s2573_s8 + $0x78] sm:$0xff] }
 0x575   : > { %1892 = vmatpush3.bf16.msra.mxu1 %v980_v45  ;;  %v1251_v45 = vpack.c.bf16 %v1705_v44, %v1704_v42  ;;  %v1420_v44 = vld [vmem:[%s2573_s8 + $0x50] sm:$0xff] }
 0x576   : > { %1897 = vmatprep.subr.bf16.mxu1 %v1978_v0 }
 0x578   : > { %1894 = vmatmul.mubr.msk.bf16.vlgmr.msra.gmra.mrb[20].mxu1 %vm518_vm4, %v979_v47  ;;  %v1707_v47 = vld [vmem:[%s2568_s3 + $0x238] sm:$0xff] }
 0x579   : > { %1898 = vmatpush3.bf16.msra.mxu1 %v1039_v48  ;;  %1905 = vmatprep.mubr.msk.bf16.mxu1 %vm1979_vm0, %v1978_v0  ;;  %v1252_v48 = vpack.c.bf16 %v1707_v47, %v1706_v46  ;;  %v1429_v46 = vld [vmem:[%s2573_s8 + $0x98] sm:$0xff] }
 0x57a   : > { %1899 = vmatprep.subr.bf16.mxu1 %v1978_v0  ;;  %v1433_v47 = vld [vmem:[%s2573_s8 + $0xb8] sm:$0xff] }
 0x57b   : > { %v1454_v49 = vpack.c.bf16 %v1433_v47, %v1429_v46 }
 0x57d   : > { %1900 = vmatpush3.bf16.msra.mxu1 %v1040_v51 }
 0x57e   : > { %1901 = vmatprep.subr.bf16.mxu1 %v1978_v0 }
 0x581   : > { %1902 = vmatpush3.bf16.msra.mxu1 %v1041_v54 }
 0x582   : > { %1903 = vmatprep.subr.bf16.mxu1 %v1978_v0 }
 0x585   : > { %1904 = vmatpush3.bf16.msra.mxu1 %v1042_v57 }
 0x586   : > { %1927 = vmatprep.subr.bf16.mxu1 %v1978_v0 }
 0x588   : > { %1906 = vmatmul.mubr.msk.bf16.vlgmr.msra.gmra.mrb[24].mxu1 %vm412_vm3, %v2127_v43 }
 0x589   : > { %1929 = vmatprep.mubr.msk.bf16.mxu1 %vm1979_vm0, %v1978_v0 }
 0x64b   : > { %v1018_v58 = vpop.f32.mrb[20].mxu1 }
 0x64c   : > { %v1025_v59 = vadd.f32 %v1018_v58, %v920_v32  ;;  %v1895_v60 = vpop.f32.mrb[21].mxu1  ;;  %v1698_v58 = vld [vmem:[%s2569_s4 + $0x80] sm:$0xff] }
 0x64d   : > { %v1021_v61 = vpop.f32.mrb[22].mxu1 }
 0x64e   : > { %v1026_v62 = vadd.f32 %v1021_v61, %v921_v35  ;;  %v1896_v63 = vpop.f32.mrb[23].mxu1 }
 0x65b   : > { %v1077_v1 = vpop.f32.mrb[24].mxu1 }
 0x65c   : > { %v1907_v3 = vpop.f32.mrb[25].mxu1 }
 0x65d   : > { %v1080_v6 = vpop.f32.mrb[26].mxu1  ;;  %v1415_v3 = vld [vmem:[%s2573_s8 + $0x28] sm:$0xff] }
 0x65e   : > { %v1085_v9 = vpack.c.bf16 %v1080_v6, %v1077_v1  ;;  %v1908_v10 = vpop.f32.mrb[27].mxu1  ;;  %v1411_v1 = vld [vmem:[%s2573_s8 + $0x8] sm:$0xff]  ;;  %v1414_v6 = vld [vmem:[%s2573_s8 + $0x20] sm:$0xff] }
 0x65f   : > { %v1444_v4 = vpack.c.bf16 %v1415_v3, %v1411_v1  ;;  %v1443_v7 = vpack.c.bf16 %v1414_v6, %v1410_v5  ;;  %v1418_v10 = vld [vmem:[%s2573_s8 + $0x40] sm:$0xff] }
 0x660   : > { %1910 = vmatpush3.bf16.msra.mxu0 %v1085_v9 }
 0x661   : > { %1915 = vmatprep.subr.bf16.mxu0 %v1978_v0 }
 0x663   : > { %1912 = vmatmul.mubr.msk.bf16.vlgmr.msra.gmra.mrb[28].mxu0 %vm518_vm4, %v1084_v11  ;;  %v1422_v11 = vld [vmem:[%s2573_s8 + $0x60] sm:$0xff] }
 0x664   : > { %1916 = vmatpush3.bf16.msra.mxu0 %v1144_v12  ;;  %1923 = vmatprep.mubr.msk.bf16.mxu0 %vm1979_vm0, %v1978_v0  ;;  %v1447_v12 = vpack.c.bf16 %v1422_v11, %v1418_v10 }
 0x665   : > { %1917 = vmatprep.subr.bf16.mxu0 %v1978_v0 }
 0x668   : > { %1918 = vmatpush3.bf16.msra.mxu0 %v1145_v15  ;;  %v1452_v15 = vpack.c.bf16 %v1431_v14, %v1427_v13 }
 0x669   : > { %1919 = vmatprep.subr.bf16.mxu0 %v1978_v0 }
 0x66c   : > { %1920 = vmatpush3.bf16.msra.mxu0 %v1146_v18  ;;  %v1451_v18 = vpack.c.bf16 %v1430_v17, %v1426_v16 }
 0x66d   : > { %1921 = vmatprep.subr.bf16.mxu0 %v1978_v0 }
 0x670   : > { %1922 = vmatpush3.bf16.msra.mxu0 %v1147_v21 }
 0x671   : > { %1945 = vmatprep.subr.bf16.mxu0 %v1978_v0 }
 0x673   : > { %1924 = vmatmul.mubr.msk.bf16.vlgmr.msra.gmra.mrb[32].mxu0 %vm412_vm3, %v2127_v43 }
 0x674   : > { %1947 = vmatprep.mubr.msk.bf16.mxu0 %vm1979_vm0, %v1978_v0 }
 0x736   : > { %v1123_v22 = vpop.f32.mrb[28].mxu0 }
 0x737   : > { %v1130_v23 = vadd.f32 %v1123_v22, %v1025_v59  ;;  %v1913_v24 = vpop.f32.mrb[29].mxu0  ;;  %v1699_v59 = vld [vmem:[%s2569_s4 + $0x88] sm:$0xff] }
 0x738   : > { %v1126_v25 = vpop.f32.mrb[30].mxu0  ;;  %v1294_v63 = vpack.c.bf16 %v1699_v59, %v1698_v58 }
 0x739   : > { %v1131_v26 = vadd.f32 %v1126_v25, %v1026_v62  ;;  %v1914_v27 = vpop.f32.mrb[31].mxu0 }
 0x73a   : > { %v1352_v27 = vpop.permute.xlu1 %1351 }
 0x746   : > { %v1182_v28 = vpop.f32.mrb[32].mxu0 }
 0x747   : > { %v1925_v29 = vpop.f32.mrb[33].mxu0 }
 0x748   : > { %v1185_v32 = vpop.f32.mrb[34].mxu0  ;;  %v1413_v29 = vld [vmem:[%s2573_s8 + $0x18] sm:$0xff] }
 0x749   : > { %v1190_v35 = vpack.c.bf16 %v1185_v32, %v1182_v28  ;;  %v1926_v36 = vpop.f32.mrb[35].mxu0  ;;  %v1446_v34 = vpack.c.bf16 %v1417_v30, %v1413_v29 }
 0x74a   : > { %v1416_v36 = vld [vmem:[%s2573_s8 + $0x30] sm:$0xff] }
 0x74b   : > { %1928 = vmatpush3.bf16.msra.mxu1 %v1190_v35  ;;  %v1412_v35 = vld [vmem:[%s2573_s8 + $0x10] sm:$0xff] }
 0x74c   : > { %1933 = vmatprep.subr.bf16.mxu1 %v1978_v0 }
 0x74e   : > { %1930 = vmatmul.mubr.msk.bf16.vlgmr.msra.gmra.mrb[28].mxu1 %vm518_vm4, %v1189_v37 }
 0x74f   : > { %1934 = vmatpush3.bf16.msra.mxu1 %v1249_v38  ;;  %1941 = vmatprep.mubr.msk.bf16.mxu1 %vm1979_vm0, %v1978_v0  ;;  %v1421_v38 = vld [vmem:[%s2573_s8 + $0x58] sm:$0xff] }
 0x750   : > { %1935 = vmatprep.subr.bf16.mxu1 %v1978_v0  ;;  %v1450_v42 = vpack.c.bf16 %v1425_v39, %v1421_v38 }
 0x753   : > { %1936 = vmatpush3.bf16.msra.mxu1 %v1250_v41  ;;  %v1445_v41 = vpack.c.bf16 %v1416_v36, %v1412_v35 }
 0x754   : > { %1937 = vmatprep.subr.bf16.mxu1 %v1978_v0 }
 0x757   : > { %1938 = vmatpush3.bf16.msra.mxu1 %v1251_v45  ;;  %v1424_v45 = vld [vmem:[%s2573_s8 + $0x70] sm:$0xff] }
 0x758   : > { %1939 = vmatprep.subr.bf16.mxu1 %v1978_v0 }
 0x75b   : > { %1940 = vmatpush3.bf16.msra.mxu1 %v1252_v48  ;;  %v1449_v48 = vpack.c.bf16 %v1424_v45, %v1420_v44 }
 0x75c   : > { %1462 = vmatprep.subr.bf16.mxu1 %v1444_v4 }
 0x75e   : > { %1942 = vmatmul.mubr.msk.bf16.vlgmr.msra.gmra.mrb[32].mxu1 %vm412_vm3, %v2127_v43 }
 0x75f   : > { %1494 = vmatprep.mubr.bf16.mxu1 %v1980_v2  ;;  %1463 = vmatpush1.bf16.msra.mxu1 %v1443_v7 }
 0x821   : > { %v1228_v51 = vpop.f32.mrb[28].mxu1 }
 0x822   : > { %v1235_v52 = vadd.f32 %v1228_v51, %v1130_v23  ;;  %v1931_v53 = vpop.f32.mrb[29].mxu1  ;;  %v1432_v51 = vld [vmem:[%s2573_s8 + $0xb0] sm:$0xff] }
 0x823   : > { %v1231_v54 = vpop.f32.mrb[30].mxu1  ;;  %v1435_v53 = vld [vmem:[%s2573_s8 + $0xc8] sm:$0xff] }
 0x824   : > { %v1236_v55 = vadd.f32 %v1231_v54, %v1131_v26  ;;  %v1932_v56 = vpop.f32.mrb[31].mxu1  ;;  %v1437_v54 = vld [vmem:[%s2573_s8 + $0xd8] sm:$0xff] }
 0x825   : > { %v1441_v56 = vld [vmem:[%s2573_s8 + $0xf8] sm:$0xff] }
 0x826   : > { %v1458_v58 = vpack.c.bf16 %v1441_v56, %v1437_v54 }
 0x831   : > { %v1287_v57 = vpop.f32.mrb[32].mxu1 }
 0x832   : > { %v1943_v43 = vpop.f32.mrb[33].mxu1 }
 0x833   : > { %v1290_v60 = vpop.f32.mrb[34].mxu1  ;;  %v1438_v43 = vld [vmem:[%s2573_s8 + $0xe0] sm:$0xff] }
 0x834   : > { %v1295_v61 = vpack.c.bf16 %v1290_v60, %v1287_v57  ;;  %v1944_v62 = vpop.f32.mrb[35].mxu1  ;;  %v1434_v57 = vld [vmem:[%s2573_s8 + $0xc0] sm:$0xff]  ;;  %v1436_v60 = vld [vmem:[%s2573_s8 + $0xd0] sm:$0xff] }
 0x835   : > { %v1455_v59 = vpack.c.bf16 %v1438_v43, %v1434_v57 }
 0x836   : > { %1946 = vmatpush3.bf16.msra.mxu0 %v1295_v61  ;;  %v1440_v61 = vld [vmem:[%s2573_s8 + $0xf0] sm:$0xff] }
 0x837   : > { %1951 = vmatprep.subr.bf16.mxu0 %v1978_v0  ;;  %v1457_v62 = vpack.c.bf16 %v1440_v61, %v1436_v60 }
 0x839   : > { %1948 = vmatmul.mubr.msk.bf16.vlgmr.msra.gmra.mrb[36].mxu0 %vm518_vm4, %v1294_v63  ;;  %v1365_v63 = vpop.permute.xlu0 %1364 }
 0x83a   : > { %1953 = vmatprep.mubr.msk.bf16.mxu0 %vm1979_vm0, %v1978_v0  ;;  %v1419_v0 = vld [vmem:[%s2573_s8 + $0x48] sm:$0xff] }
 0x83b   : > { %v1448_v9 = vpack.c.bf16 %v1423_v8, %v1419_v0 }
 0x83d   : > { %1464 = vmatprep.subr.bf16.mxu1 %v1448_v9 }
 0x83e   : > { %1465 = vmatpush1.bf16.msra.mxu1 %v1447_v12 }
 0x83f   : > { %1466 = vmatprep.subr.bf16.mxu1 %v1452_v15 }
 0x842   : > { %1467 = vmatpush1.bf16.msra.mxu1 %v1451_v18 }
 0x90c   : > { %v1333_v20 = vpop.f32.mrb[36].mxu0 }
 0x90d   : > { %v1340_v21 = vadd.f32 %v1333_v20, %v1235_v52  ;;  %v1949_v22 = vpop.f32.mrb[37].mxu0  ;;  %v1453_v52 = vpack.c.bf16 %v1432_v51, %v1428_v50 }
 0x90e   : > { %v1336_v23 = vpop.f32.mrb[38].mxu0 }
 0x90f   : > { %v1354_v24 = vadd.f32 %v1347_v19, %v1340_v21  ;;  %v1341_v25 = vadd.f32 %v1336_v23, %v1236_v55  ;;  %v1950_v26 = vpop.f32.mrb[39].mxu0 }
 0x911   : > { %v1355_v28 = vadd.f32 %v1352_v27, %v1341_v25  ;;  %v1356_v31 = vmax.f32 %v1354_v24, 0.0 }
 0x913   : > { %v1357_v32 = vmax.f32 %v1355_v28, 0.0 }
 0x915   : > { %v1360_v37 = vpack.c.bf16 %v1357_v32, %v1356_v31 }
 0x917   : > { %1952 = vmatpush3.bf16.msra.mxu0 %v1360_v37 }
 0x918   : > { %1503 = vmatprep.subr.bf16.mxu0 %v1446_v34 }
 0x91a   : > { %1954 = vmatmul.mubr.msk.bf16.vlgmr.msra.gmra.mrb[40].mxu0 %vm518_vm4, %v1359_v40 }
 0x91b   : > { %1504 = vmatpush1.bf16.msra.mxu0 %v1445_v41  ;;  %1535 = vmatprep.mubr.bf16.mxu0 %v1980_v2  ;;  %v1439_v2 = vld [vmem:[%s2573_s8 + $0xe8] sm:$0xff] }
 0x91c   : > { %1505 = vmatprep.subr.bf16.mxu0 %v1450_v42  ;;  %v1456_v55 = vpack.c.bf16 %v1439_v2, %v1435_v53 }
 0x91e   : > { %1468 = vmatprep.subr.bf16.mxu1 %v1456_v55 }
 0x91f   : > { %1506 = vmatpush1.bf16.msra.mxu0 %v1449_v48  ;;  %1469 = vmatpush1.bf16.msra.mxu1 %v1455_v59 }
 0x920   : > { %1507 = vmatprep.subr.bf16.mxu0 %v1454_v49 }
 0x923   : > { %1508 = vmatpush1.bf16.msra.mxu0 %v1453_v52 }
 0x924   : > { %1509 = vmatprep.subr.bf16.mxu0 %v1458_v58 }
 0x927   : > { %1510 = vmatpush1.bf16.msra.mxu0 %v1457_v62 }
 0x9ed   : > { %v1404_v1 = vpop.f32.mrb[40].mxu0 }
 0x9ee   : > { %v1405_v3 = vadd.f32 %v1404_v1, %v1365_v63  ;;  %v1955_v4 = vpop.f32.mrb[41].mxu0 }
 0x9ef   : > { %v1407_v5 = vpop.f32.mrb[42].mxu0 }
 0x9f0   : > { %v1442_v6 = vpack.c.bf16 %v1405_v3, %v1405_v3  ;;  %v1956_v7 = vpop.f32.mrb[43].mxu0 }
 0x9f2   : > { %1711 = vmatmul.mubr.msk.bf16.vlgmr.msra.gmra.mrb[36].mxu1 %vm412_vm3, %v1442_v6  ;;  %1712 = vmatmul.mubr.msk.bf16.vlgmr.msra.gmra.mrb[44].mxu0 %vm412_vm3, %v1442_v6 }
 0xac5   : > { %v1496_v0 = vpop.f32.mrb[36].mxu1  ;;  %v1537_v8 = vpop.f32.mrb[44].mxu0 }
 0xac6   : > { %1544 = vst [vmem:[%s329_s12] sm:$0x7f] %v1496_v0  ;;  %1546 = vst [vmem:[%s329_s12 + $0x10] sm:$0x7f] %v1537_v8  ;;  %v1498_v9 = vpop.f32.mrb[37].mxu1  ;;  %v1539_v10 = vpop.f32.mrb[45].mxu0 }
 0xac7   : > { %1545 = vst [vmem:[%s329_s12 + $0x8] sm:$0x7f] %v1498_v9  ;;  %1547 = vst [vmem:[%s329_s12 + $0x18] sm:$0x7f] %v1539_v10  ;;  %v1500_v11 = vpop.f32.mrb[38].mxu1  ;;  %v1541_v12 = vpop.f32.mrb[46].mxu0 }
 0xac8   : > { %v1501_v13 = vpop.f32.mrb[39].mxu1  ;;  %v1542_v14 = vpop.f32.mrb[47].mxu0 }
 0xac9 PF: > { %s19_s30 = sadd.s32 1, %s1976_s30  }
 0xaca   : > { %p16_p4 = scmp.ge.s32.totalorder %s19_s30, 4  }
 0xacc   :  { %18 = sbr.rel (!%p16_p4) target bundleno = 1 (0x1), region = 102 }

// kernel: transfuser_forward.22
= control target key start
LH: loop header
LB: loop body
LE: loop exit
PB: predicated region body
PF: predicated region fallthrough
CT: control target
= control target key end

     0   :  { %s6127_s6 = smov 1   ;;  %s6128_s10 = smov 2   ;;  %s7286_s0 = inlined_call_operand.smem [shape: u32[30], index: -1, kind: input, shape index: {}] }
   0x1   :  { %s6178_s5 = sld [smem:[%s7286_s0]]   ;;  %s6129_s14 = smov 3  }
   0x2   :  { %s6183_s9 = sld [smem:[%s7286_s0 + %s6127_s6]]   ;;  %s6130_s18 = smov 4  }
   0x3   :  { %s6188_s13 = sld [smem:[%s7286_s0 + %s6128_s10]]   ;;  %s6131_s22 = smov 5  }
   0x4   :  { %s6193_s17 = sld [smem:[%s7286_s0 + %s6129_s14]]   ;;  %s6132_s26 = smov 6  }
   0x5   :  { %s6198_s21 = sld [smem:[%s7286_s0 + %s6130_s18]]   ;;  %s6133_s30 = smov 7  }
   0x6   :  { %s6203_s25 = sld [smem:[%s7286_s0 + %s6131_s22]]   ;;  %s6134_s4 = smov 8  }
   0x7   :  { %7318 = sst [smem:[#allocation2_spill]] %s6178_s5  ;;  %s6135_s10 = smov 9  }
   0x8   :  { %7319 = sst [smem:[#allocation3_spill]] %s6183_s9  ;;  %s6136_s15 = smov 10  }
   0x9   :  { %7320 = sst [smem:[#allocation4_spill]] %s6188_s13  ;;  %s6137_s20 = smov 11  }
   0xa   :  { %s6208_s29 = sld [smem:[%s7286_s0 + %s6132_s26]]   ;;  %s6138_s26 = smov 12  }
   0xb   :  { %s6213_s3 = sld [smem:[%s7286_s0 + %s6133_s30]]   ;;  %s6139_s1 = smov 13  }
   0xc   :  { %s6218_s8 = sld [smem:[%s7286_s0 + %s6134_s4]]   ;;  %s6140_s7 = smov 14  }
   0xd   :  { %s6223_s14 = sld [smem:[%s7286_s0 + %s6135_s10]]   ;;  %s6142_s22 = smov 16  }
   0xe   :  { %s6228_s19 = sld [smem:[%s7286_s0 + %s6136_s15]]   ;;  %s6141_s15 = smov 15  }
   0xf   :  { %s6233_s24 = sld [smem:[%s7286_s0 + %s6137_s20]]   ;;  %s6143_s28 = smov 17  }
  0x10   :  { %s6238_s30 = sld [smem:[%s7286_s0 + %s6138_s26]]  }
  0x11   :  { %7321 = sst [smem:[#allocation5_spill]] %s6213_s3 }
  0x12   :  { %7322 = sst [smem:[#allocation6_spill]] %s6218_s8 }
  0x13   :  { %7323 = sst [smem:[#allocation7_spill]] %s6223_s14 }
  0x14   :  { %s6243_s6 = sld [smem:[%s7286_s0 + %s6139_s1]]  }
  0x15   :  { %s6248_s12 = sld [smem:[%s7286_s0 + %s6140_s7]]   ;;  %s6144_s7 = smov 18  }
  0x16   :  { %7324 = sst [smem:[#allocation8_spill]] %s6238_s30 }
  0x17   :  { %s6253_s20 = sld [smem:[%s7286_s0 + %s6141_s15]]   ;;  %s6145_s15 = smov 19  }
  0x18   :  { %s6258_s27 = sld [smem:[%s7286_s0 + %s6142_s22]]   ;;  %s6146_s22 = smov 20  }
  0x19   :  { %s6263_s4 = sld [smem:[%s7286_s0 + %s6143_s28]]   ;;  %s6147_s28 = smov 21  }
  0x1a   :  { %7325 = sst [smem:[#allocation9_spill]] %s6243_s6 }
  0x1b   :  { %s6268_s6 = sld [smem:[%s7286_s0 + %s6144_s7]]   ;;  %s6148_s7 = smov 22  }
  0x1c   :  { %s6273_s30 = sld [smem:[%s7286_s0 + %s6145_s15]]   ;;  %s6149_s15 = smov 23  }
  0x1e   :  { %7326 = sst [smem:[#allocation10_spill]] %s6258_s27 }
  0x1f   :  { %7327 = sst [smem:[#allocation11_spill]] %s6263_s4 }
  0x20   :  { %s6278_s27 = sld [smem:[%s7286_s0 + %s6146_s22]]   ;;  %s6150_s22 = smov 24  }
  0x21   :  { %7328 = sst [smem:[#allocation12_spill]] %s6268_s6 }
  0x22   :  { %7329 = sst [smem:[#allocation13_spill]] %s6273_s30 }
  0x23   :  { %s6283_s4 = sld [smem:[%s7286_s0 + %s6147_s28]]   ;;  %s6151_s28 = smov 25  }
  0x24   :  { %s6288_s6 = sld [smem:[%s7286_s0 + %s6148_s7]]   ;;  %s6152_s7 = smov 26  }
  0x25   :  { %s6293_s30 = sld [smem:[%s7286_s0 + %s6149_s15]]   ;;  %s6153_s15 = smov 27  }
  0x26   :  { %7330 = sst [smem:[#allocation14_spill]] %s6278_s27 }
  0x27   :  { %s6298_s27 = sld [smem:[%s7286_s0 + %s6150_s22]]   ;;  %s6154_s22 = smov 28  }
  0x29   :  { %7331 = sst [smem:[#allocation15_spill]] %s6283_s4 }
  0x2a   :  { %7332 = sst [smem:[#allocation16_spill]] %s6288_s6 }
  0x2b   :  { %7333 = sst [smem:[#allocation17_spill]] %s6293_s30 }
  0x2c   :  { %s6303_s4 = sld [smem:[%s7286_s0 + %s6151_s28]]   ;;  %s6155_s28 = smov 29  }
  0x2d   :  { %7334 = sst [smem:[#allocation18_spill]] %s6298_s27 }
  0x2e   :  { %s6308_s6 = sld [smem:[%s7286_s0 + %s6152_s7]]   ;;  %s6325_s7 = smov 0  }
  0x2f   :  { %s6313_s30 = sld [smem:[%s7286_s0 + %s6153_s15]]  }
  0x30   :  { %s6318_s27 = sld [smem:[%s7286_s0 + %s6154_s22]]  }
  0x32   :  { %7335 = sst [smem:[#allocation19_spill]] %s6303_s4 }
  0x33   :  { %s6323_s4 = sld [smem:[%s7286_s0 + %s6155_s28]]  }
  0x34 LB: > { %s7336_s14 = sld [smem:[#allocation7_spill]]  ;;  %s7337_s8 = sld [smem:[#allocation6_spill]]  ;;  %s6125_s7 = sphi %s6325_s7, %s69_s7  }
  0x35   : > { %s5046_s10 = sadd.s32 4294967295, %s6125_s7   ;;  %p5050_p0 = scmp.ge.s32.totalorder %s6125_s7, 1 }
  0x36   : > { %p825_p1 = scmp.lt.s32.totalorder %s6125_s7, 3 }
  0x38   : > { %p826_p2 = pnand %p5050_p0, %p825_p1 }
  0x39   : > { %s7338_s9 = sld [smem:[#allocation3_spill]] (!%p826_p2)  ;;  %v1020_v0 = vld [vmem:[%s6198_s21] sm:$0xff] (!%p826_p2)  ;;  %vm1028_vm0 = vcmask (!%p826_p2), 1043456   ;;  %p903_p3 = scmp.lt.s32.totalorder (!%p826_p2), %s5046_s10, 1  ;;  %v6156_v1 = vmov (!%p826_p2), 0.0   ;;  %vm6157_vm1 = vmmov (!%p826_p2), 0  }
  0x3a   : > { %829 = sbr.rel (%p826_p2) target bundleno = 14210 (0x3782), region = 136  ;;  %5419 = vmatprep.subr.bf16.mxu1 (!%p826_p2), %v6156_v1  ;;  %v1022_v2 = vpack.c.bf16 (!%p826_p2), %v1020_v0, %v1020_v0  ;;  %5421 = vmatprep.mubr.msk.bf16.mxu1 (!%p826_p2), %vm6157_vm1, %v6156_v1  ;;  %v1093_v3 = vld [vmem:[%s7337_s8] sm:$0xff] (!%p826_p2)  ;;  %s7339_s3 = sld [smem:[#allocation5_spill]] (!%p826_p2)  ;;  %v1094_v4 = vld [vmem:[%s7337_s8 + $0x8] sm:$0xff] (!%p826_p2)  ;;  %vm1024_vm2 = vcmask (!%p826_p2), 64512   ;;  %v1095_v9 = vld [vmem:[%s7337_s8 + $0x10] sm:$0xff] (!%p826_p2) }
  0x3b   : > { %v1098_v7 = vpack.c.bf16 (!%p826_p2), %v1094_v4, %v1093_v3  ;;  %s7340_s5 = sld [smem:[#allocation2_spill]] (!%p826_p2)  ;;  %s7341_s13 = sld [smem:[#allocation4_spill]] (!%p826_p2)  ;;  %v1096_v10 = vld [vmem:[%s7337_s8 + $0x18] sm:$0xff] (!%p826_p2)  ;;  %vm1107_vm3 = vcmask (!%p826_p2), 261120   ;;  %vm950_vm4 = vcmask (!%p826_p2), 1041408   ;;  %vm937_vm5 = vcmask (!%p826_p2), 31744  }
  0x3c   : > { %v1030_v5 = vsel (!%p826_p2), %vm1028_vm0, %v1022_v2, 0  ;;  %v1099_v11 = vpack.c.bf16 (!%p826_p2), %v1096_v10, %v1095_v9  ;;  %v5060_v33 = vld [vmem:[%s7336_s14] ss:$0 sm:$0xff] (!%p826_p2)  ;;  %s7312_s16 = smov (!%p826_p2), 96   ;;  %s7310_s18 = smov (!%p826_p2), 120   ;;  %v1074_v44 = vld [vmem:[%s6208_s29 + $0x10] sm:$0xff] (!%p826_p2) }
  0x3d   : > { %5420 = vmatpush3.bf16.msra.mxu1 (!%p826_p2), %v1030_v5  ;;  %s7314_s22 = smov (!%p826_p2), 88   ;;  %v5054_v42 = vld [vmem:[%s6193_s17] ss:$0 sm:$0xff] (!%p826_p2)  ;;  %v1075_v50 = vld [vmem:[%s6208_s29 + $0x18] sm:$0xff] (!%p826_p2)  ;;  %v1073_v54 = vld [vmem:[%s6208_s29 + $0x8] sm:$0xff] (!%p826_p2)  ;;  %s7301_s23 = smov (!%p826_p2), 64  }
  0x3e   : > { %5425 = vmatprep.subr.bf16.mxu1 (!%p826_p2), %v6156_v1  ;;  %v1072_v47 = vld [vmem:[%s6208_s29] sm:$0xff] (!%p826_p2)  ;;  %v1078_v4 = vld [vmem:[%s6208_s29 + $0x30] sm:$0xff] (!%p826_p2)  ;;  %v1079_v10 = vld [vmem:[%s6208_s29 + $0x38] sm:$0xff] (!%p826_p2)  ;;  %s7300_s26 = smov (!%p826_p2), 56   ;;  %s7302_s28 = smov (!%p826_p2), 112   ;;  %vm2056_vm6 = vcmask (!%p826_p2), 531456  }
  0x3f   : > { %s7308_s1 = smov (!%p826_p2), 80   ;;  %s7306_s2 = smov (!%p826_p2), 72   ;;  %vm2091_vm7 = vcmask (!%p826_p2), 1040384   ;;  %vm2868_vm8 = vcmask (!%p826_p2), 523264  }
  0x40   : > { %v6351_v12 = vld [vmem:[%s7339_s3] sm:$0xff] (!%p826_p2)  ;;  %s7352_s3 = smov (!%p826_p2), 96  }
  0x41   : > { %s7366_s10 = smov (!%p903_p3, %s5046_s10), 1  ;;  %v1097_v13 = vpack.c.bf16 %v6351_v12, %v6351_v12  ;;  %v924_v14 = vld [vmem:[%s7341_s13] sm:$0xf]  ;;  %s7357_s13 = smov 80  }
  0x42   : > { %s910_s0 = scalar_lea.vmem %s7338_s9, %s7366_s10  ;;  %s5188_s11 = sshll.u32 %s7366_s10, 6  ;;  %v929_v17 = vpack.c.bf16 %v924_v14, %v924_v14 }
  0x43   : > { %v1019_v6 = vld [vmem:[%s910_s0] sm:$0x1]  ;;  %s907_s15 = scalar_lea.vmem %s7340_s5, %s5188_s11  ;;  %s7304_s0 = smov 104  }
  0x44   : > { %v1021_v8 = vpack.c.bf16 %v1019_v6, %v1019_v6  ;;  %v916_v15 = vld [vmem:[%s907_s15] sm:$0xff]  ;;  %v917_v16 = vld [vmem:[%s907_s15 + $0x8] sm:$0xff]  ;;  %v918_v19 = vld [vmem:[%s907_s15 + $0x10] sm:$0xff]  ;;  %5989 = vmatprep.subr.msk.bf16.mxu0 %vm950_vm4, %v929_v17  ;;  %v952_v21 = vsel %vm950_vm4, %v929_v17, 0  ;;  %s7299_s11 = smov 48   ;;  %s7353_s5 = smov 120  }
  0x45   : > { %v925_v18 = vpack.c.bf16 %v917_v16, %v916_v15  ;;  %v919_v20 = vld [vmem:[%s907_s15 + $0x18] sm:$0xff]  ;;  %5410 = vmatpush3.bf16.msra.mxu0 %v952_v21  ;;  %v920_v23 = vld [vmem:[%s907_s15 + $0x20] sm:$0xff]  ;;  %v921_v24 = vld [vmem:[%s907_s15 + $0x28] sm:$0xff]  ;;  %s7356_s9 = smov 112  }
  0x46   : > { %5422 = vmatmul.mubr.msk.bf16.vlgmr.msra.gmra.mrb[0].mxu1 %vm1024_vm2, %v1021_v8  ;;  %v926_v22 = vpack.c.bf16 %v919_v20, %v918_v19  ;;  %5433 = vmatprep.subr.bf16.mxu0 %v6156_v1  ;;  %v927_v25 = vpack.c.bf16 %v921_v24, %v920_v23  ;;  %v922_v26 = vld [vmem:[%s907_s15 + $0x30] sm:$0xff]  ;;  %v923_v27 = vld [vmem:[%s907_s15 + $0x38] sm:$0xff]  ;;  %v1077_v15 = vld [vmem:[%s6208_s29 + $0x28] sm:$0xff]  ;;  %s7298_s15 = smov 40  }
  0x47   : > { %5426 = vmatpush3.bf16.msra.mxu1 %v1098_v7  ;;  %5429 = vmatprep.mubr.msk.bf16.mxu1 %vm6157_vm1, %v6156_v1  ;;  %v928_v28 = vpack.c.bf16 %v923_v27, %v922_v26  ;;  %v1076_v7 = vld [vmem:[%s6208_s29 + $0x20] sm:$0xff] }
  0x48   : > { %5427 = vmatprep.subr.bf16.mxu1 %v6156_v1  ;;  %5411 = vmatprep.mubr.msk.bf16.mxu0 %vm937_vm5, %v925_v18 }
  0x49   : > { %5412 = vmatmul.mubr.msk.bf16.vlgmr.msra.gmra.mrb[0].mxu0 %vm937_vm5, %v926_v22 }
  0x4a   : > { %5415 = vmatprep.mubr.msk.bf16.mxu0 %vm937_vm5, %v927_v25 }
  0x4b   : > { %5428 = vmatpush3.bf16.msra.mxu1 %v1099_v11 }
  0x4c   : > { %5439 = vmatprep.subr.bf16.mxu1 %v6156_v1 }
  0x4e   : > { %5430 = vmatmul.mubr.msk.bf16.vlgmr.msra.gmra.mrb[4].mxu1 %vm1107_vm3, %v1097_v13 }
  0x4f   : > { %5441 = vmatprep.mubr.msk.bf16.mxu1 %vm6157_vm1, %v6156_v1 }
  0x51   : > { %5416 = vmatmul.mubr.msk.bf16.gmra.mrb[4].mxu0 %vm937_vm5, %v928_v28 }
  0x52   : > { %5435 = vmatprep.mubr.msk.bf16.mxu0 %vm6157_vm1, %v6156_v1 }
 0x119   : > { %v6370_v29 = vpop.f32.mrb[0].mxu1 }
 0x11a   : > { %v5423_v30 = vpop.f32.mrb[1].mxu1 }
 0x11b   : > { %v1069_v31 = vpop.f32.mrb[2].mxu1 }
 0x11c   : > { %v5424_v32 = vpop.f32.mrb[3].mxu1  ;;  %v5413_v43 = vpop.f32.mrb[0].mxu0 }
 0x11d   : > { %v997_v45 = vadd.f32 %v5413_v43, %v5054_v42  ;;  %v988_v46 = vpop.f32.mrb[1].mxu0 }
 0x11e   : > { %v989_v48 = vadd.f32 %v5054_v42, %v988_v46  ;;  %v5414_v49 = vpop.f32.mrb[2].mxu0 }
 0x11f   : > { %v1083_v51 = vadd.f32 %v1074_v44, %v997_v45  ;;  %v1000_v52 = vadd.f32 %v5414_v49, %v5054_v42  ;;  %v991_v53 = vpop.f32.mrb[3].mxu0 }
 0x120   : > { %v1081_v55 = vadd.f32 %v1072_v47, %v989_v48  ;;  %v992_v56 = vadd.f32 %v5054_v42, %v991_v53 }
 0x121   : > { %v1145_v34 = vpop.f32.mrb[4].mxu1  ;;  %v1084_v57 = vadd.f32 %v1075_v50, %v1000_v52 }
 0x122   : > { %v1146_v35 = vadd.f32 %v5060_v33, %v1145_v34  ;;  %v5431_v36 = vpop.f32.mrb[5].mxu1  ;;  %v1082_v58 = vadd.f32 %v1073_v54, %v992_v56 }
 0x123   : > { %v1148_v37 = vpop.f32.mrb[6].mxu1  ;;  %v6388_v59 = vpack.c.bf16 %v1084_v57, %v1083_v51  ;;  %v1152_v57 = vld [vmem:[%s6228_s19] sm:$0xff] }
 0x124   : > { %v1151_v38 = vmul.f32 0.35355338, %v1146_v35  ;;  %v6373_v39 = vpack.c.bf16 %v1146_v35, %v1146_v35  ;;  %v5432_v40 = vpop.f32.mrb[7].mxu1  ;;  %v6390_v60 = vpack.c.bf16 %v1082_v58, %v1081_v55  ;;  %v5417_v3 = vpop.f32.mrb[4].mxu0  ;;  %v1268_v58 = vpack.c.bf16 %v1152_v57, %v1152_v57 }
 0x125   : > { %v1013_v5 = vadd.f32 %v5417_v3, %v5054_v42  ;;  %v1004_v6 = vpop.f32.mrb[5].mxu0 }
 0x126   : > { %v6375_v41 = vpack.c.bf16 %v1151_v38, %v1151_v38  ;;  %1159 = vrot.lane.b32.xlu0 %v6373_v39, %s7312_s16  ;;  %v1005_v8 = vadd.f32 %v5054_v42, %v1004_v6  ;;  %v5418_v9 = vpop.f32.mrb[6].mxu0 }
 0x127   : > { %v1087_v11 = vadd.f32 %v1078_v4, %v1013_v5  ;;  %v1016_v13 = vadd.f32 %v5418_v9, %v5054_v42  ;;  %v1007_v14 = vpop.f32.mrb[7].mxu0 }
 0x128   : > { %1270 = vrot.lane.b32.xlu1 %v6375_v41, %s7310_s18  ;;  %v1085_v16 = vadd.f32 %v1076_v7, %v1005_v8  ;;  %v1008_v17 = vadd.f32 %v5054_v42, %v1007_v14 }
 0x129   : > { %v1088_v18 = vadd.f32 %v1079_v10, %v1016_v13 }
 0x12a   : > { %1272 = vrot.lane.b32.xlu0 %v6373_v39, %s7314_s22  ;;  %v1086_v19 = vadd.f32 %v1077_v15, %v1008_v17 }
 0x12b   : > { %v6407_v20 = vpack.c.bf16 %v1088_v18, %v1087_v11 }
 0x12c   : > { %v6409_v21 = vpack.c.bf16 %v1086_v19, %v1085_v16 }
 0x198   : > { %v1160_v61 = vpop.permute.xlu0 %1159 }
 0x199   : > { %v1165_v62 = vsel %vm1024_vm2, %v1160_v61, 0  ;;  %v1153_v61 = vld [vmem:[%s6228_s19 + $0x8] sm:$0xff] }
 0x19a   : > { %5434 = vmatpush3.bf16.xpose.msra.mxu0 %v1165_v62  ;;  %v1271_v2 = vpop.permute.xlu1 %1270  ;;  %v1432_v62 = vsel %vm1028_vm0, %v1268_v58, 0 }
 0x19b   : > { %5445 = vmatprep.subr.bf16.mxu0 %v6156_v1 }
 0x19c   : > { %v1273_v63 = vpop.permute.xlu0 %1272 }
 0x19d   : > { %v1278_v0 = vsel %vm1024_vm2, %v1273_v63, 0  ;;  %v1381_v63 = vpack.c.bf16 %v1153_v61, %v1153_v61 }
 0x1a1   : > { %5436 = vmatmul.mubr.msk.bf16.vlgmr.msra.gmra.mrb[8].mxu0 %vm1024_vm2, %v6375_v41 }
 0x1a2   : > { %5446 = vmatpush3.bf16.xpose.msra.mxu0 %v1278_v0  ;;  %5447 = vmatprep.mubr.msk.bf16.mxu0 %vm6157_vm1, %v6156_v1  ;;  %v1386_v0 = vsel %vm1028_vm0, %v1381_v63, 0 }
 0x1a3   : > { %5457 = vmatprep.subr.bf16.mxu0 %v6156_v1 }
 0x1a9   : > { %5448 = vmatmul.mubr.msk.bf16.vlgmr.msra.gmra.mrb[12].mxu0 %vm1024_vm2, %v1271_v2 }
 0x1aa   : > { %5459 = vmatprep.mubr.msk.bf16.mxu0 %vm6157_vm1, %v6156_v1  ;;  %5458 = vmatpush3.bf16.msra.mxu0 %v1386_v0 }
 0x1ab   : > { %5469 = vmatprep.subr.bf16.mxu0 %v6156_v1 }
 0x274   : > { %v1201_v22 = vpop.f32.mrb[8].mxu0 }
 0x275   : > { %v5437_v23 = vpop.f32.mrb[9].mxu0  ;;  %v1207_v24 = vsel %vm1024_vm2, %v1201_v22, -inf }
 0x276   : > { %1208 = vmax.xlane.f32.xlu1 %v1207_v24  ;;  %v1204_v25 = vpop.f32.mrb[10].mxu0 }
 0x277   : > { %v5438_v26 = vpop.f32.mrb[11].mxu0 }
 0x27c   : > { %v1314_v27 = vpop.f32.mrb[12].mxu0 }
 0x27d   : > { %v5449_v28 = vpop.f32.mrb[13].mxu0  ;;  %v1320_v30 = vsel %vm1024_vm2, %v1314_v27, -inf }
 0x27e   : > { %1321 = vmax.xlane.f32.xlu0 %v1320_v30  ;;  %v1317_v31 = vpop.f32.mrb[14].mxu0 }
 0x27f   : > { %v5450_v32 = vpop.f32.mrb[15].mxu0 }
 0x303   : > { %v1209_v33 = vpop.xlane.xlu1 %1208 }
 0x304   : > { %v1210_v34 = vsub.f32 %v1201_v22, %v1209_v33 }
 0x306   : > { %v1211_v35 = vmul.f32 1.442695, %v1210_v34 }
 0x308   : > { %6041 = vpow2.f32 %v1211_v35 }
 0x30b   : > { %v1322_v36 = vpop.xlane.xlu0 %1321 }
 0x30c   : > { %v1323_v37 = vsub.f32 %v1314_v27, %v1322_v36 }
 0x30e   : > { %v1324_v38 = vmul.f32 1.442695, %v1323_v37 }
 0x310   : > { %6043 = vpow2.f32 %v1324_v38 }
 0x312   : > { %v6042_v40 = vpop.eup %6041 }
 0x313   : > { %v1213_v42 = vsel %vm1024_vm2, %v6042_v40, 0.0 }
 0x314   : > { %1214 = vadd.xlane.f32.xlu0 %v1213_v42 }
 0x31a   : > { %v6044_v43 = vpop.eup %6043 }
 0x31b   : > { %v1326_v44 = vsel %vm1024_vm2, %v6044_v43, 0.0 }
 0x31c   : > { %1327 = vadd.xlane.f32.xlu1 %v1326_v44 }
 0x32a   : > { %1219 = vrot.lane.b32.xlu0 %v6373_v39, %s7301_s23  ;;  %s7345_s23 = sld [smem:[#allocation9_spill]] }
 0x32d   : > { %1332 = vrot.lane.b32.xlu1 %v6373_v39, %s7300_s26  ;;  %s7344_s26 = sld [smem:[#allocation17_spill]] }
 0x32e   : > { %1474 = vrot.lane.b32.xlu0 %v6375_v41, %s7302_s28 }
 0x331   : > { %1476 = vrot.lane.b32.xlu1 %v6373_v39, %s7308_s1 }
 0x3a1   : > { %v1215_v45 = vpop.xlane.xlu0 %1214 }
 0x3a2   : > { %6045 = vrcp.f32 %v1215_v45 }
 0x3a5   : > { %v1220_v46 = vpop.permute.xlu0 %1219 }
 0x3a6   : > { %v1225_v47 = vsel %vm1028_vm0, %v1220_v46, 0 }
 0x3a7   : > { %5440 = vmatpush3.bf16.msra.mxu1 %v1225_v47 }
 0x3a8   : > { %5451 = vmatprep.subr.bf16.mxu1 %v6156_v1 }
 0x3a9   : > { %v1328_v48 = vpop.xlane.xlu1 %1327  ;;  %v1475_v15 = vpop.permute.xlu0 %1474 }
 0x3aa   : > { %6047 = vrcp.f32 %v1328_v48  ;;  %v1154_v48 = vld [vmem:[%s6228_s19 + $0x10] sm:$0xff] }
 0x3ac   : > { %v6046_v49 = vpop.eup %6045 }
 0x3ad   : > { %v1217_v50 = vmul.f32 %v6046_v49, %v6042_v40  ;;  %v1333_v51 = vpop.permute.xlu1 %1332  ;;  %v1585_v49 = vpack.c.bf16 %v1154_v48, %v1154_v48 }
 0x3ae   : > { %v1338_v53 = vsel %vm1028_vm0, %v1333_v51, 0 }
 0x3af   : > { %v1218_v52 = vpack.c.bf16 %v1217_v50, %v1217_v50  ;;  %v1590_v50 = vsel %vm1028_vm0, %v1585_v49, 0 }
 0x3b1   : > { %5442 = vmatmul.mubr.msk.bf16.vlgmr.msra.gmra.mrb[8].mxu1 %vm1024_vm2, %v1218_v52  ;;  %v1477_v7 = vpop.permute.xlu1 %1476 }
 0x3b2   : > { %5452 = vmatpush3.bf16.msra.mxu1 %v1338_v53  ;;  %5453 = vmatprep.mubr.msk.bf16.mxu1 %vm6157_vm1, %v6156_v1  ;;  %v1482_v13 = vsel %vm1024_vm2, %v1477_v7, 0 }
 0x3b3   : > { %5463 = vmatprep.subr.bf16.mxu1 %v6156_v1 }
 0x3b4   : > { %v6048_v54 = vpop.eup %6047 }
 0x3b5   : > { %v1330_v55 = vmul.f32 %v6048_v54, %v6044_v43 }
 0x3b7   : > { %v1331_v56 = vpack.c.bf16 %v1330_v55, %v1330_v55 }
 0x3b9   : > { %5454 = vmatmul.mubr.msk.bf16.vlgmr.msra.gmra.mrb[12].mxu1 %vm1024_vm2, %v1331_v56 }
 0x3ba   : > { %5465 = vmatprep.mubr.msk.bf16.mxu1 %vm6157_vm1, %v6156_v1  ;;  %5464 = vmatpush3.bf16.msra.mxu1 %v1432_v62 }
 0x3bb   : > { %5475 = vmatprep.subr.bf16.mxu1 %v6156_v1 }
 0x484   : > { %v1261_v2 = vpop.f32.mrb[8].mxu1 }
 0x485   : > { %v1267_v3 = vpack.c.bf16 %v1261_v2, %v1261_v2  ;;  %v5443_v4 = vpop.f32.mrb[9].mxu1 }
 0x486   : > { %v1264_v5 = vpop.f32.mrb[10].mxu1 }
 0x487   : > { %v5444_v6 = vpop.f32.mrb[11].mxu1  ;;  %5466 = vmatmul.mubr.msk.bf16.vlgmr.msra.gmra.mrb[16].mxu1 %vm1024_vm2, %v1267_v3 }
 0x488   : > { %5477 = vmatprep.mubr.msk.bf16.mxu1 %vm6157_vm1, %v6156_v1 }
 0x48c   : > { %v1374_v8 = vpop.f32.mrb[12].mxu1 }
 0x48d   : > { %v1380_v9 = vpack.c.bf16 %v1374_v8, %v1374_v8  ;;  %v5455_v10 = vpop.f32.mrb[13].mxu1 }
 0x48e   : > { %v1377_v11 = vpop.f32.mrb[14].mxu1 }
 0x48f   : > { %v5456_v14 = vpop.f32.mrb[15].mxu1  ;;  %5460 = vmatmul.mubr.msk.bf16.vlgmr.msra.gmra.mrb[16].mxu0 %vm1024_vm2, %v1380_v9 }
 0x490   : > { %5470 = vmatpush3.bf16.xpose.msra.mxu0 %v1482_v13  ;;  %5471 = vmatprep.mubr.msk.bf16.mxu0 %vm6157_vm1, %v6156_v1 }
 0x491   : > { %5481 = vmatprep.subr.bf16.mxu0 %v6156_v1 }
 0x497   : > { %5472 = vmatmul.mubr.msk.bf16.vlgmr.msra.gmra.mrb[20].mxu0 %vm1024_vm2, %v1475_v15 }
 0x498   : > { %5483 = vmatprep.mubr.msk.bf16.mxu0 %vm6157_vm1, %v6156_v1  ;;  %5482 = vmatpush3.bf16.msra.mxu0 %v1590_v50 }
 0x499   : > { %5493 = vmatprep.subr.bf16.mxu0 %v6156_v1 }
 0x55a   : > { %v1468_v16 = vpop.f32.mrb[16].mxu1 }
 0x55b   : > { %v5467_v17 = vpop.f32.mrb[17].mxu1 }
 0x55c   : > { %v1471_v18 = vpop.f32.mrb[18].mxu1 }
 0x55d   : > { %v5468_v19 = vpop.f32.mrb[19].mxu1 }
 0x55e   : > { %v1883_v19 = vld [vmem:[%s6248_s12] sm:$0xff] }
 0x562   : > { %v1422_v22 = vpop.f32.mrb[16].mxu0 }
 0x563   : > { %v6450_v23 = vadd.f32 %v1468_v16, %v1422_v22  ;;  %v5461_v24 = vpop.f32.mrb[17].mxu0  ;;  %v1155_v16 = vld [vmem:[%s6228_s19 + $0x18] sm:$0xff]  ;;  %v1884_v22 = vld [vmem:[%s6248_s12 + $0x8] sm:$0xff] }
 0x564   : > { %v1425_v25 = vpop.f32.mrb[18].mxu0  ;;  %v1744_v17 = vpack.c.bf16 %v1155_v16, %v1155_v16  ;;  %v1892_v24 = vpack.c.bf16 %v1884_v22, %v1883_v19 }
 0x565   : > { %v5462_v26 = vpop.f32.mrb[19].mxu0 }
 0x566   : > { %v1749_v18 = vsel %vm1028_vm0, %v1744_v17, 0 }
 0x56a   : > { %v1518_v27 = vpop.f32.mrb[20].mxu0 }
 0x56b   : > { %v5473_v28 = vpop.f32.mrb[21].mxu0  ;;  %v1524_v30 = vsel %vm1024_vm2, %v1518_v27, -inf }
 0x56c   : > { %1525 = vmax.xlane.f32.xlu1 %v1524_v30  ;;  %v1521_v31 = vpop.f32.mrb[22].mxu0  ;;  %v1886_v28 = vld [vmem:[%s6248_s12 + $0x18] sm:$0xff] }
 0x56d   : > { %v5474_v32 = vpop.f32.mrb[23].mxu0 }
 0x57d   : > { %1635 = vrot.lane.b32.xlu1 %v6373_v39, %s7306_s2 }
 0x581   : > { %1633 = vrot.lane.b32.xlu1 %v6375_v41, %s7304_s0 }
 0x5f9   : > { %v1526_v33 = vpop.xlane.xlu1 %1525 }
 0x5fa   : > { %v1527_v34 = vsub.f32 %v1518_v27, %v1526_v33  ;;  %v1885_v27 = vld [vmem:[%s6248_s12 + $0x10] sm:$0xff]  ;;  %v1023_v33 = vld [vmem:[%s6203_s25] sm:$0x1] }
 0x5fb   : > { %v1893_v32 = vpack.c.bf16 %v1886_v28, %v1885_v27 }
 0x5fc   : > { %v1528_v35 = vmul.f32 1.442695, %v1527_v34  ;;  %v1067_v34 = vadd.f32 %v6370_v29, %v1023_v33 }
 0x5fd   : > { %v1636_v44 = vpop.permute.xlu1 %1635 }
 0x5fe   : > { %6049 = vpow2.f32 %v1528_v35  ;;  %v1641_v46 = vsel %vm1024_vm2, %v1636_v44, 0  ;;  %v1080_v35 = vld [vmem:[%s6208_s29 + $0x40] sm:$0x1] }
 0x601   : > { %v1634_v47 = vpop.permute.xlu1 %1633 }
 0x608   : > { %v6050_v36 = vpop.eup %6049 }
 0x609   : > { %v1530_v37 = vsel %vm1024_vm2, %v6050_v36, 0.0 }
 0x60a   : > { %1531 = vadd.xlane.f32.xlu0 %v1530_v37 }
 0x620   : > { %1536 = vrot.lane.b32.xlu0 %v6373_v39, %s7299_s11  ;;  %s7343_s11 = sld [smem:[#allocation16_spill]] }
 0x697   : > { %v1532_v38 = vpop.xlane.xlu0 %1531 }
 0x698   : > { %6051 = vrcp.f32 %v1532_v38 }
 0x69b   : > { %v1537_v40 = vpop.permute.xlu0 %1536 }
 0x69c   : > { %v1542_v42 = vsel %vm1028_vm0, %v1537_v40, 0  ;;  %v5074_v40 = vld [vmem:[%s6233_s24] ss:$0 sm:$0xff] }
 0x69d   : > { %5476 = vmatpush3.bf16.msra.mxu1 %v1542_v42 }
 0x69e   : > { %5487 = vmatprep.subr.bf16.mxu1 %v6156_v1 }
 0x6a2   : > { %v6052_v41 = vpop.eup %6051 }
 0x6a3   : > { %v1534_v43 = vmul.f32 %v6052_v41, %v6050_v36  ;;  %v1089_v36 = vadd.f32 %v1080_v35, %v1067_v34 }
 0x6a5   : > { %v1535_v45 = vpack.c.bf16 %v1534_v43, %v1534_v43  ;;  %v6517_v37 = vpack.c.bf16 %v1089_v36, %v1089_v36  ;;  %v1815_v36 = vlaneseq }
 0x6a7   : > { %5478 = vmatmul.mubr.msk.bf16.vlgmr.msra.gmra.mrb[20].mxu1 %vm1024_vm2, %v1535_v45 }
 0x6a8   : > { %5488 = vmatpush3.bf16.xpose.msra.mxu1 %v1641_v46  ;;  %5489 = vmatprep.mubr.msk.bf16.mxu1 %vm6157_vm1, %v6156_v1  ;;  %v5077_v46 = vld [vmem:[%s6253_s20] ss:$0 sm:$0xff] }
 0x6a9   : > { %5499 = vmatprep.subr.bf16.mxu1 %v6156_v1 }
 0x6af   : > { %5490 = vmatmul.mubr.msk.bf16.vlgmr.msra.gmra.mrb[24].mxu1 %vm1024_vm2, %v1634_v47 }
 0x6b0   : > { %5501 = vmatprep.mubr.msk.bf16.mxu1 %vm6157_vm1, %v6156_v1  ;;  %5500 = vmatpush3.bf16.msra.mxu1 %v1749_v18 }
 0x6b1   : > { %5513 = vmatprep.subr.bf16.mxu1 %v6156_v1 }
 0x77a   : > { %v1578_v51 = vpop.f32.mrb[20].mxu1 }
 0x77b   : > { %v1584_v52 = vpack.c.bf16 %v1578_v51, %v1578_v51  ;;  %v5479_v53 = vpop.f32.mrb[21].mxu1 }
 0x77c   : > { %v1581_v54 = vpop.f32.mrb[22].mxu1 }
 0x77d   : > { %v5480_v55 = vpop.f32.mrb[23].mxu1  ;;  %5484 = vmatmul.mubr.msk.bf16.vlgmr.msra.gmra.mrb[24].mxu0 %vm1024_vm2, %v1584_v52 }
 0x77e   : > { %5495 = vmatprep.mubr.msk.bf16.mxu0 %vm6157_vm1, %v6156_v1 }
 0x782   : > { %v1677_v56 = vpop.f32.mrb[24].mxu1 }
 0x783   : > { %v5491_v57 = vpop.f32.mrb[25].mxu1  ;;  %v1683_v58 = vsel %vm1024_vm2, %v1677_v56, -inf }
 0x784   : > { %1684 = vmax.xlane.f32.xlu0 %v1683_v58  ;;  %v1680_v61 = vpop.f32.mrb[26].mxu1 }
 0x785   : > { %v5492_v62 = vpop.f32.mrb[27].mxu1 }
 0x79a   : > { %1695 = vrot.lane.b32.xlu0 %v6373_v39, %s7298_s15  ;;  %s7342_s15 = sld [smem:[#allocation8_spill]] }
 0x7a0   : > { %v1825_v27 = vld [vmem:[%s7342_s15] sm:$0xff]  ;;  %v1826_v28 = vld [vmem:[%s7342_s15 + $0x8] sm:$0xff] }
 0x811   : > { %v1685_v63 = vpop.xlane.xlu0 %1684 }
 0x812   : > { %v1686_v0 = vsub.f32 %v1677_v56, %v1685_v63 }
 0x814   : > { %v1687_v2 = vmul.f32 1.442695, %v1686_v0 }
 0x815   : > { %v1696_v3 = vpop.permute.xlu0 %1695 }
 0x816   : > { %6053 = vpow2.f32 %v1687_v2  ;;  %v1701_v4 = vsel %vm1028_vm0, %v1696_v3, 0 }
 0x817   : > { %5494 = vmatpush3.bf16.msra.mxu0 %v1701_v4 }
 0x818   : > { %5505 = vmatprep.subr.bf16.mxu0 %v6156_v1 }
 0x820   : > { %v6054_v5 = vpop.eup %6053 }
 0x821   : > { %v1689_v6 = vsel %vm1024_vm2, %v6054_v5, 0.0 }
 0x822   : > { %1690 = vadd.xlane.f32.xlu1 %v1689_v6 }
 0x850   : > { %v1626_v7 = vpop.f32.mrb[24].mxu0 }
 0x851   : > { %v1632_v8 = vadd.f32 %v1626_v7, %v6450_v23  ;;  %v5485_v39 = vpop.f32.mrb[25].mxu0 }
 0x852   : > { %v1629_v9 = vpop.f32.mrb[26].mxu0 }
 0x853   : > { %v5486_v10 = vpop.f32.mrb[27].mxu0 }
 0x8af   : > { %v1691_v11 = vpop.xlane.xlu1 %1690 }
 0x8b0   : > { %6055 = vrcp.f32 %v1691_v11 }
 0x8ba   : > { %v6056_v13 = vpop.eup %6055 }
 0x8bb   : > { %v1693_v14 = vmul.f32 %v6056_v13, %v6054_v5 }
 0x8bd   : > { %v1694_v15 = vpack.c.bf16 %v1693_v14, %v1693_v14 }
 0x8bf   : > { %5496 = vmatmul.mubr.msk.bf16.vlgmr.msra.gmra.mrb[28].mxu0 %vm1024_vm2, %v1694_v15 }
 0x8c0   : > { %5509 = vmatprep.mubr.msk.bf16.mxu0 %vm6157_vm1, %v6156_v1 }
 0x992   : > { %v1737_v23 = vpop.f32.mrb[28].mxu0 }
 0x993   : > { %v1743_v25 = vpack.c.bf16 %v1737_v23, %v1737_v23  ;;  %v5497_v26 = vpop.f32.mrb[29].mxu0 }
 0x994   : > { %v1740_v30 = vpop.f32.mrb[30].mxu0 }
 0x995   : > { %v5498_v31 = vpop.f32.mrb[31].mxu0  ;;  %5502 = vmatmul.mubr.msk.bf16.vlgmr.msra.gmra.mrb[28].mxu1 %vm1024_vm2, %v1743_v25  ;;  %v1830_v30 = vpack.c.bf16 %v1826_v28, %v1825_v27 }
 0x996   : > { %5514 = vmatpush3.bf16.msra.mxu1 %v1892_v24  ;;  %5517 = vmatprep.mubr.msk.bf16.mxu1 %vm6157_vm1, %v6156_v1  ;;  %v1827_v31 = vld [vmem:[%s7342_s15 + $0x10] sm:$0xff] }
 0x997   : > { %5515 = vmatprep.subr.bf16.mxu1 %v6156_v1  ;;  %5506 = vmatpush3.bf16.msra.mxu0 %v1830_v30 }
 0x998   : > { %5507 = vmatprep.subr.bf16.mxu0 %v6156_v1 }
 0x99a   : > { %5516 = vmatpush3.bf16.msra.mxu1 %v1893_v32  ;;  %v1828_v32 = vld [vmem:[%s7342_s15 + $0x18] sm:$0xff] }
 0x99b   : > { %5551 = vmatprep.subr.bf16.mxu1 %v6156_v1  ;;  %v1831_v33 = vpack.c.bf16 %v1828_v32, %v1827_v31 }
 0x99d   : > { %5518 = vmatmul.mubr.msk.bf16.vlgmr.msra.gmra.mrb[32].mxu1 %vm1107_vm3, %v6390_v60  ;;  %5508 = vmatpush3.bf16.msra.mxu0 %v1831_v33 }
 0x99e   : > { %5521 = vmatprep.mubr.msk.bf16.mxu1 %vm6157_vm1, %v6156_v1  ;;  %5537 = vmatprep.subr.bf16.mxu0 %v6156_v1 }
 0x9a5   : > { %5522 = vmatmul.mubr.msk.bf16.gmra.mrb[36].mxu1 %vm1107_vm3, %v6388_v59 }
 0x9a6   : > { %5525 = vmatprep.mubr.msk.bf16.mxu1 %vm6157_vm1, %v6156_v1 }
 0x9ad   : > { %5526 = vmatmul.mubr.msk.bf16.gmra.mrb[40].mxu1 %vm1107_vm3, %v6409_v21 }
 0x9ae   : > { %5529 = vmatprep.mubr.msk.bf16.mxu1 %vm6157_vm1, %v6156_v1 }
 0x9b5   : > { %5530 = vmatmul.mubr.msk.bf16.gmra.mrb[44].mxu1 %vm1107_vm3, %v6407_v20 }
 0x9b6   : > { %5533 = vmatprep.mubr.msk.bf16.mxu1 %vm6157_vm1, %v6156_v1 }
 0x9bd   : > { %5534 = vmatmul.mubr.msk.bf16.gmra.mrb[48].mxu1 %vm1107_vm3, %v6517_v37 }
 0x9be   : > { %5561 = vmatprep.mubr.msk.bf16.mxu1 %vm6157_vm1, %v6156_v1 }
 0xa68   : > { %v1785_v38 = vpop.f32.mrb[28].mxu1 }
 0xa69   : > { %v1791_v29 = vadd.f32 %v1785_v38, %v1632_v8  ;;  %v5503_v42 = vpop.f32.mrb[29].mxu1 }
 0xa6a   : > { %v1788_v41 = vpop.f32.mrb[30].mxu1  ;;  %v6561_v42 = vld [vmem:[%s7343_s11] sm:$0x7] }
 0xa6b   : > { %v1799_v43 = vadd.f32 %v5074_v40, %v1791_v29  ;;  %v5504_v44 = vpop.f32.mrb[31].mxu1  ;;  %v6555_v40 = vshrl.u32 %v1815_v36, 7  ;;  %v6564_v41 = vld [vmem:[%s7344_s26] sm:$0x7] }
 0xa6d   : > { %v1800_v45 = vadd.f32 %v1799_v43, %v6351_v12  ;;  %v6558_v29 = vsub.s32 0, %v6555_v40 }
 0xa6f   : > { %v1801_v47 = vsel %vm1107_vm3, %v1800_v45, 0.0  ;;  %v1818_v43 = vrot.slane %v6561_v42, %v6558_v29 }
 0xa70   : > { %1802 = vadd.xlane.f32.xlu1 %v1801_v47  ;;  %v1950_v48 = vpop.f32.mrb[32].mxu1 }
 0xa71   : > { %v1951_v49 = vadd.f32 %v5077_v46, %v1950_v48  ;;  %v5519_v50 = vpop.f32.mrb[33].mxu1 }
 0xa72   : > { %v1953_v51 = vpop.f32.mrb[34].mxu1 }
 0xa73   : > { %v1954_v52 = vadd.f32 %v5077_v46, %v1953_v51  ;;  %v5520_v53 = vpop.f32.mrb[35].mxu1 }
 0xa75   : > { %v6527_v54 = vpack.c.bf16 %v1954_v52, %v1951_v49 }
 0xa77   : > { %v2002_v50 = vsel %vm1024_vm2, %v6527_v54, 0 }
 0xa78   : > { %v1958_v55 = vpop.f32.mrb[36].mxu1 }
 0xa79   : > { %v5523_v56 = vpop.f32.mrb[37].mxu1  ;;  %v1959_v58 = vadd.f32 %v5077_v46, %v1958_v55 }
 0xa7a   : > { %v1961_v57 = vpop.f32.mrb[38].mxu1  ;;  %v5075_v56 = vld [vmem:[%s7345_s23] ss:$0 sm:$0xff] }
 0xa7b   : > { %v1962_v61 = vadd.f32 %v5077_v46, %v1961_v57  ;;  %v5524_v62 = vpop.f32.mrb[39].mxu1 }
 0xa7d   : > { %v6529_v63 = vpack.c.bf16 %v1962_v61, %v1959_v58 }
 0xa7f   : > { %2144 = vrot.lane.b32.xlu0 %v6529_v63, %s7310_s18  ;;  %v2005_v51 = vsel %vm1024_vm2, %v6529_v63, 0 }
 0xa80   : > { %v1966_v12 = vpop.f32.mrb[40].mxu1 }
 0xa81   : > { %v5527_v0 = vpop.f32.mrb[41].mxu1  ;;  %v1967_v3 = vadd.f32 %v5077_v46, %v1966_v12 }
 0xa82   : > { %v1969_v2 = vpop.f32.mrb[42].mxu1 }
 0xa83   : > { %v1970_v4 = vadd.f32 %v5077_v46, %v1969_v2  ;;  %v5528_v5 = vpop.f32.mrb[43].mxu1 }
 0xa85   : > { %v6533_v6 = vpack.c.bf16 %v1970_v4, %v1967_v3 }
 0xa87   : > { %2146 = vrot.lane.b32.xlu0 %v6533_v6, %s7310_s18  ;;  %v2008_v52 = vsel %vm1024_vm2, %v6533_v6, 0 }
 0xa88   : > { %v1974_v7 = vpop.f32.mrb[44].mxu1 }
 0xa89   : > { %v5531_v8 = vpop.f32.mrb[45].mxu1  ;;  %v1975_v9 = vadd.f32 %v5077_v46, %v1974_v7 }
 0xa8a   : > { %v1977_v39 = vpop.f32.mrb[46].mxu1 }
 0xa8b   : > { %v1978_v10 = vadd.f32 %v5077_v46, %v1977_v39  ;;  %v5532_v11 = vpop.f32.mrb[47].mxu1 }
 0xa8d   : > { %v6537_v13 = vpack.c.bf16 %v1978_v10, %v1975_v9 }
 0xa8f   : > { %2148 = vrot.lane.b32.xlu0 %v6537_v13, %s7310_s18  ;;  %v2011_v53 = vsel %vm1024_vm2, %v6537_v13, 0 }
 0xa90   : > { %v1982_v14 = vpop.f32.mrb[48].mxu1 }
 0xa91   : > { %v1983_v15 = vadd.f32 %v5077_v46, %v1982_v14  ;;  %v5535_v16 = vpop.f32.mrb[49].mxu1  ;;  %v1823_v46 = vrot.slane %v6564_v41, %v6558_v29 }
 0xa92   : > { %v1985_v17 = vpop.f32.mrb[50].mxu1 }
 0xa93   : > { %v5536_v18 = vpop.f32.mrb[51].mxu1  ;;  %v6544_v26 = vpack.c.bf16 %v1983_v15, %v1983_v15 }
 0xa95   : > { %v2014_v55 = vsel %vm1024_vm2, %v6544_v26, 0 }
 0xaf1   : > { %v2145_v5 = vpop.permute.xlu0 %2144 }
 0xaf2   : > { %v2159_v7 = vsel %vm1024_vm2, %v2145_v5, 0 }
 0xaf9   : > { %v2147_v8 = vpop.permute.xlu0 %2146 }
 0xafa   : > { %v2162_v39 = vsel %vm1024_vm2, %v2147_v8, 0 }
 0xafd   : > { %v1803_v19 = vpop.xlane.xlu1 %1802 }
 0xafe   : > { %v1805_v22 = vmul.f32 0.03125, %v1803_v19 }
 0xb00   : > { %v1806_v23 = vsub.f32 %v1800_v45, %v1805_v22 }
 0xb01   : > { %v2149_v9 = vpop.permute.xlu0 %2148 }
 0xb02   : > { %v1807_v24 = vmul.f32 %v1806_v23, %v1806_v23  ;;  %v2165_v10 = vsel %vm1024_vm2, %v2149_v9, 0 }
 0xb04   : > { %v1808_v25 = vsel %vm1107_vm3, %v1807_v24, 0.0 }
 0xb05   : > { %1809 = vadd.xlane.f32.xlu1 %v1808_v25 }
 0xb16   : > { %2142 = vrot.lane.b32.xlu1 %v6527_v54, %s7310_s18 }
 0xb1a   : > { %2150 = vrot.lane.b32.xlu1 %v6544_v26, %s7310_s18 }
 0xb92   : > { %v1810_v34 = vpop.xlane.xlu1 %1809 }
 0xb93   : > { %v1811_v35 = vmul.f32 0.03125, %v1810_v34 }
 0xb95   : > { %v1812_v38 = vadd.f32 1e-05, %v1811_v35 }
 0xb96   : > { %v2143_v2 = vpop.permute.xlu1 %2142 }
 0xb97   : > { %6057 = vrsqrt.f32 %v1812_v38  ;;  %v2156_v4 = vsel %vm1024_vm2, %v2143_v2, 0 }
 0xb9a   : > { %v2151_v11 = vpop.permute.xlu1 %2150 }
 0xb9b   : > { %v2168_v14 = vsel %vm1024_vm2, %v2151_v11, 0 }
 0xba1   : > { %v6058_v44 = vpop.eup %6057 }
 0xba2   : > { %v1814_v45 = vmul.f32 %v6058_v44, %v1806_v23 }
 0xba4   : > { %v1819_v47 = vmul.f32 %v1818_v43, %v1814_v45 }
 0xba6   : > { %v6570_v48 = vadd.f32 %v1823_v46, %v1819_v47 }
 0xba8   : > { %v1829_v49 = vpack.c.bf16 %v6570_v48, %v6570_v48 }
 0xbaa   : > { %5510 = vmatmul.mubr.msk.bf16.vlgmr.msra.gmra.mrb[32].mxu0 %vm1107_vm3, %v1829_v49 }
 0xbab   : > { %5538 = vmatpush3.bf16.xpose.msra.mxu0 %v2002_v50  ;;  %5547 = vmatprep.mubr.msk.bf16.mxu0 %vm6157_vm1, %v6156_v1 }
 0xbac   : > { %5539 = vmatprep.subr.bf16.mxu0 %v6156_v1 }
 0xbb3   : > { %5540 = vmatpush3.bf16.xpose.msra.mxu0 %v2005_v51 }
 0xbb4   : > { %5541 = vmatprep.subr.bf16.mxu0 %v6156_v1 }
 0xbbb   : > { %5542 = vmatpush3.bf16.xpose.msra.mxu0 %v2008_v52  ;;  %v6169_v52 = vmov 0  }
 0xbbc   : > { %5543 = vmatprep.subr.bf16.mxu0 %v6156_v1 }
 0xbc3   : > { %5544 = vmatpush3.bf16.xpose.msra.mxu0 %v2011_v53  ;;  %v6655_v53 = vsel %vm2091_vm7, 65535, %v6169_v52 }
 0xbc4   : > { %5545 = vmatprep.subr.bf16.mxu0 %v6156_v1 }
 0xbcb   : > { %5546 = vmatpush3.bf16.xpose.msra.mxu0 %v2014_v55 }
 0xbcc   : > { %5565 = vmatprep.subr.bf16.mxu0 %v6156_v1 }
 0xc7d   : > { %v1876_v57 = vpop.f32.mrb[32].mxu0 }
 0xc7e   : > { %v1877_v58 = vadd.f32 %v5075_v56, %v1876_v57  ;;  %v5511_v61 = vpop.f32.mrb[33].mxu0 }
 0xc7f   : > { %v1879_v62 = vpop.f32.mrb[34].mxu0 }
 0xc80   : > { %v1882_v12 = vmul.f32 0.35355338, %v1877_v58  ;;  %v5512_v0 = vpop.f32.mrb[35].mxu0 }
 0xc82   : > { %v6593_v3 = vpack.c.bf16 %v1882_v12, %v1882_v12 }
 0xc84   : > { %2140 = vrot.lane.b32.xlu0 %v6593_v3, %s7310_s18  ;;  %5548 = vmatmul.mubr.msk.bf16.vlgmr.msra.gmra.mrb[36].mxu0 %vm1024_vm2, %v6593_v3  ;;  %s7350_s18 = sld [smem:[#allocation13_spill]] }
 0xc85   : > { %5566 = vmatpush3.bf16.xpose.msra.mxu0 %v2156_v4  ;;  %5575 = vmatprep.mubr.msk.bf16.mxu0 %vm6157_vm1, %v6156_v1 }
 0xc86   : > { %5567 = vmatprep.subr.bf16.mxu0 %v6156_v1 }
 0xc8d   : > { %5568 = vmatpush3.bf16.xpose.msra.mxu0 %v2159_v7 }
 0xc8e   : > { %5569 = vmatprep.subr.bf16.mxu0 %v6156_v1 }
 0xc95   : > { %5570 = vmatpush3.bf16.xpose.msra.mxu0 %v2162_v39 }
 0xc96   : > { %5571 = vmatprep.subr.bf16.mxu0 %v6156_v1 }
 0xc9d   : > { %5572 = vmatpush3.bf16.xpose.msra.mxu0 %v2165_v10 }
 0xc9e   : > { %5573 = vmatprep.subr.bf16.mxu0 %v6156_v1 }
 0xca5   : > { %5574 = vmatpush3.bf16.xpose.msra.mxu0 %v2168_v14 }
 0xca6   : > { %5619 = vmatprep.subr.bf16.mxu0 %v6156_v1 }
 0xcf6   : > { %v2141_v15 = vpop.permute.xlu0 %2140 }
 0xcf7   : > { %5576 = vmatmul.mubr.msk.bf16.vlgmr.msra.gmra.mrb[40].mxu0 %vm1024_vm2, %v2141_v15 }
 0xcf8   : > { %5629 = vmatprep.mubr.msk.bf16.mxu0 %vm6157_vm1, %v6156_v1 }
 0xd57   : > { %v2050_v16 = vpop.f32.mrb[36].mxu0 }
 0xd58   : > { %v5549_v17 = vpop.f32.mrb[37].mxu0  ;;  %v2057_v18 = vsel %vm2056_vm6, %v2050_v16, -inf }
 0xd59   : > { %2058 = vmax.xlane.f32.xlu1 %v2057_v18  ;;  %v2053_v19 = vpop.f32.mrb[38].mxu0 }
 0xd5a   : > { %v5550_v22 = vpop.f32.mrb[39].mxu0 }
 0xd6a   : > { %2074 = vrot.lane.b32.xlu1 %v6527_v54, %s7312_s16 }
 0xd6e   : > { %2078 = vrot.lane.b32.xlu1 %v6533_v6, %s7312_s16 }
 0xdca   : > { %v2204_v23 = vpop.f32.mrb[40].mxu0 }
 0xdcb   : > { %v5577_v24 = vpop.f32.mrb[41].mxu0  ;;  %v2210_v25 = vsel %vm2056_vm6, %v2204_v23, -inf }
 0xdcc   : > { %2211 = vmax.xlane.f32.xlu0 %v2210_v25  ;;  %v2207_v27 = vpop.f32.mrb[42].mxu0 }
 0xdcd   : > { %v5578_v28 = vpop.f32.mrb[43].mxu0 }
 0xde2   : > { %2076 = vrot.lane.b32.xlu0 %v6529_v63, %s7312_s16 }
 0xde6   : > { %v2059_v30 = vpop.xlane.xlu1 %2058 }
 0xde7   : > { %v2060_v32 = vsub.f32 %v2050_v16, %v2059_v30 }
 0xde9   : > { %v2061_v33 = vmul.f32 1.442695, %v2060_v32 }
 0xdea   : > { %v2075_v31 = vpop.permute.xlu1 %2074 }
 0xdeb   : > { %5552 = vmatpush3.bf16.msra.mxu1 %v2075_v31  ;;  %6059 = vpow2.f32 %v2061_v33 }
 0xdec   : > { %5553 = vmatprep.subr.bf16.mxu1 %v6156_v1 }
 0xdee   : > { %v2079_v46 = vpop.permute.xlu1 %2078 }
 0xdf5   : > { %v6060_v34 = vpop.eup %6059 }
 0xdf6   : > { %v2063_v35 = vsel %vm2056_vm6, %v6060_v34, 0.0 }
 0xe01   : > { %2064 = vadd.xlane.f32.xlu0 %v2063_v35 }
 0xe17   : > { %2080 = vrot.lane.b32.xlu0 %v6537_v13, %s7312_s16 }
 0xe1b   : > { %2082 = vrot.lane.b32.xlu0 %v6544_v26, %s7312_s16  ;;  %s7351_s16 = sld [smem:[#allocation15_spill]] }
 0xe1f   : > { %2222 = vrot.lane.b32.xlu0 %v6527_v54, %s7314_s22 }
 0xe23   : > { %2224 = vrot.lane.b32.xlu0 %v6529_v63, %s7314_s22 }
 0xe27   : > { %2226 = vrot.lane.b32.xlu0 %v6533_v6, %s7314_s22 }
 0xe2b   : > { %2228 = vrot.lane.b32.xlu0 %v6537_v13, %s7314_s22 }
 0xe2f   : > { %2230 = vrot.lane.b32.xlu0 %v6544_v26, %s7314_s22 }
 0xe33   : > { %2378 = vrot.lane.b32.xlu0 %v6527_v54, %s7302_s28 }
 0xe37   : > { %2380 = vrot.lane.b32.xlu0 %v6529_v63, %s7302_s28 }
 0xe3b   : > { %2384 = vrot.lane.b32.xlu0 %v6537_v13, %s7302_s28 }
 0xe3f   : > { %2386 = vrot.lane.b32.xlu0 %v6544_v26, %s7302_s28 }
 0xe43   : > { %2376 = vrot.lane.b32.xlu0 %v6593_v3, %s7302_s28 }
 0xe59   : > { %v2212_v38 = vpop.xlane.xlu0 %2211 }
 0xe5a   : > { %v2213_v43 = vsub.f32 %v2204_v23, %v2212_v38 }
 0xe5c   : > { %v2214_v44 = vmul.f32 1.442695, %v2213_v43 }
 0xe5d   : > { %v2077_v45 = vpop.permute.xlu0 %2076 }
 0xe5e   : > { %6061 = vpow2.f32 %v2214_v44  ;;  %5554 = vmatpush3.bf16.msra.mxu1 %v2077_v45 }
 0xe5f   : > { %5555 = vmatprep.subr.bf16.mxu1 %v6156_v1 }
 0xe62   : > { %5556 = vmatpush3.bf16.msra.mxu1 %v2079_v46 }
 0xe63   : > { %5557 = vmatprep.subr.bf16.mxu1 %v6156_v1 }
 0xe68   : > { %v6062_v47 = vpop.eup %6061 }
 0xe69   : > { %v2216_v49 = vsel %vm2056_vm6, %v6062_v47, 0.0 }
 0xe6a   : > { %2217 = vadd.xlane.f32.xlu1 %v2216_v49 }
 0xe7b   : > { %2382 = vrot.lane.b32.xlu1 %v6533_v6, %s7302_s28  ;;  %s7346_s28 = sld [smem:[#allocation10_spill]] }
 0xe7f   : > { %2460 = vrot.lane.b32.xlu1 %v6529_v63, %s7308_s1 }
 0xe81   : > { %v1989_v8 = vld [vmem:[%s7346_s28 + $0x8] sm:$0xff]  ;;  %v1988_v19 = vld [vmem:[%s7346_s28] sm:$0xff] }
 0xe82   : > { %v2283_v39 = vpack.c.bf16 %v1989_v8, %v1989_v8  ;;  %v2138_v22 = vpack.c.bf16 %v1988_v19, %v1988_v19 }
 0xe84   : > { %v2288_v14 = vsel %vm1028_vm0, %v2283_v39, 0  ;;  %v2334_v27 = vsel %vm1028_vm0, %v2138_v22, 0 }
 0xe8e   : > { %v2065_v50 = vpop.xlane.xlu0 %2064 }
 0xe8f   : > { %6063 = vrcp.f32 %v2065_v50 }
 0xe92   : > { %v2081_v51 = vpop.permute.xlu0 %2080 }
 0xe93   : > { %5558 = vmatpush3.bf16.msra.mxu1 %v2081_v51 }
 0xe94   : > { %5559 = vmatprep.subr.bf16.mxu1 %v6156_v1 }
 0xe96   : > { %v2083_v55 = vpop.permute.xlu0 %2082 }
 0xe97   : > { %v2095_v56 = vand.u32 %v6655_v53, %v2083_v55 }
 0xe99   : > { %v6064_v57 = vpop.eup %6063  ;;  %5560 = vmatpush3.bf16.msra.mxu1 %v2095_v56 }
 0xe9a   : > { %v2067_v58 = vmul.f32 %v6064_v57, %v6060_v34  ;;  %v2223_v61 = vpop.permute.xlu0 %2222  ;;  %5579 = vmatprep.subr.bf16.mxu1 %v6156_v1 }
 0xe9c   : > { %v2068_v62 = vpack.c.bf16 %v2067_v58, %v2067_v58 }
 0xe9e   : > { %5562 = vmatmul.mubr.msk.bf16.vlgmr.msra.gmra.mrb[52].mxu1 %vm2056_vm6, %v2068_v62  ;;  %v2225_v12 = vpop.permute.xlu0 %2224 }
 0xe9f   : > { %5580 = vmatpush3.bf16.msra.mxu1 %v2223_v61  ;;  %5589 = vmatprep.mubr.msk.bf16.mxu1 %vm6157_vm1, %v6156_v1 }
 0xea0   : > { %5581 = vmatprep.subr.bf16.mxu1 %v6156_v1 }
 0xea2   : > { %v2227_v0 = vpop.permute.xlu0 %2226 }
 0xea3   : > { %5582 = vmatpush3.bf16.msra.mxu1 %v2225_v12 }
 0xea4   : > { %5583 = vmatprep.subr.bf16.mxu1 %v6156_v1 }
 0xea6   : > { %v2229_v2 = vpop.permute.xlu0 %2228 }
 0xea7   : > { %5584 = vmatpush3.bf16.msra.mxu1 %v2227_v0 }
 0xea8   : > { %5585 = vmatprep.subr.bf16.mxu1 %v6156_v1 }
 0xeaa   : > { %v2231_v4 = vpop.permute.xlu0 %2230 }
 0xeab   : > { %5586 = vmatpush3.bf16.msra.mxu1 %v2229_v2  ;;  %v2240_v5 = vand.u32 %v2231_v4, %v6655_v53 }
 0xeac   : > { %5587 = vmatprep.subr.bf16.mxu1 %v6156_v1 }
 0xeae   : > { %v2379_v31 = vpop.permute.xlu0 %2378 }
 0xeaf   : > { %5588 = vmatpush3.bf16.msra.mxu1 %v2240_v5  ;;  %v2392_v33 = vsel %vm1024_vm2, %v2379_v31, 0 }
 0xeb0   : > { %5593 = vmatprep.subr.bf16.mxu1 %v6156_v1 }
 0xeb2   : > { %v2381_v34 = vpop.permute.xlu0 %2380 }
 0xeb3   : > { %v2395_v35 = vsel %vm1024_vm2, %v2381_v34, 0 }
 0xeb6   : > { %v2385_v44 = vpop.permute.xlu0 %2384 }
 0xeb7   : > { %v2401_v45 = vsel %vm1024_vm2, %v2385_v44, 0 }
 0xeba   : > { %v2387_v46 = vpop.permute.xlu0 %2386 }
 0xebe   : > { %v2377_v49 = vpop.permute.xlu0 %2376 }
 0xef7   : > { %v2218_v7 = vpop.xlane.xlu1 %2217 }
 0xef8   : > { %6065 = vrcp.f32 %v2218_v7 }
 0xefb   : > { %v2383_v38 = vpop.permute.xlu1 %2382 }
 0xefc   : > { %v2398_v43 = vsel %vm1024_vm2, %v2383_v38, 0 }
 0xf02   : > { %v6066_v9 = vpop.eup %6065 }
 0xf03   : > { %v2220_v10 = vmul.f32 %v6066_v9, %v6062_v47  ;;  %v2404_v47 = vsel %vm1024_vm2, %v2387_v46, 0 }
 0xf05   : > { %v2221_v11 = vpack.c.bf16 %v2220_v10, %v2220_v10  ;;  %v2461_v10 = vpop.permute.xlu1 %2460 }
 0xf07   : > { %5590 = vmatmul.mubr.msk.bf16.vlgmr.msra.gmra.mrb[56].mxu1 %vm2056_vm6, %v2221_v11 }
 0xf08   : > { %5594 = vmatpush3.bf16.msra.mxu1 %v2288_v14  ;;  %5595 = vmatprep.mubr.msk.bf16.mxu1 %vm6157_vm1, %v6156_v1 }
 0xf09   : > { %5599 = vmatprep.subr.bf16.mxu1 %v6156_v1 }
 0xf71   : > { %v2131_v15 = vpop.f32.mrb[52].mxu1 }
 0xf72   : > { %v5563_v16 = vpop.f32.mrb[53].mxu1  ;;  %v2137_v32 = vpack.c.bf16 %v2131_v15, %v2131_v15 }
 0xf73   : > { %v2134_v17 = vpop.f32.mrb[54].mxu1 }
 0xf74   : > { %v5564_v18 = vpop.f32.mrb[55].mxu1 }
 0xfda   : > { %v2276_v23 = vpop.f32.mrb[56].mxu1 }
 0xfdb   : > { %v2282_v24 = vpack.c.bf16 %v2276_v23, %v2276_v23  ;;  %v5591_v25 = vpop.f32.mrb[57].mxu1 }
 0xfdc   : > { %v2279_v28 = vpop.f32.mrb[58].mxu1  ;;  %v1990_v25 = vld [vmem:[%s7346_s28 + $0x10] sm:$0xff] }
 0xfdd   : > { %v5592_v30 = vpop.f32.mrb[59].mxu1  ;;  %5596 = vmatmul.mubr.msk.bf16.vlgmr.msra.gmra.mrb[60].mxu1 %vm1024_vm2, %v2282_v24 }
 0xfde   : > { %5600 = vmatpush3.bf16.msra.mxu1 %v2334_v27  ;;  %5601 = vmatprep.mubr.msk.bf16.mxu1 %vm6157_vm1, %v6156_v1  ;;  %v2519_v27 = vpack.c.bf16 %v1990_v25, %v1990_v25 }
 0xfdf   : > { %5605 = vmatprep.subr.bf16.mxu1 %v6156_v1 }
 0xfe0   : > { %v2524_v31 = vsel %vm1028_vm0, %v2519_v27, 0 }
 0xfe5   : > { %5602 = vmatmul.mubr.msk.bf16.vlgmr.msra.gmra.mrb[64].mxu1 %vm1024_vm2, %v2137_v32 }
 0xfe6   : > { %5615 = vmatprep.mubr.msk.bf16.mxu1 %vm6157_vm1, %v6156_v1 }
 0xfe7   : > { %5606 = vmatpush3.bf16.xpose.msra.mxu1 %v2392_v33 }
 0xfe8   : > { %5607 = vmatprep.subr.bf16.mxu1 %v6156_v1 }
 0xfef   : > { %5608 = vmatpush3.bf16.xpose.msra.mxu1 %v2395_v35 }
 0xff0   : > { %5609 = vmatprep.subr.bf16.mxu1 %v6156_v1 }
 0xff7   : > { %5610 = vmatpush3.bf16.xpose.msra.mxu1 %v2398_v43 }
 0xff8   : > { %5611 = vmatprep.subr.bf16.mxu1 %v6156_v1 }
 0xfff   : > { %5612 = vmatpush3.bf16.xpose.msra.mxu1 %v2401_v45 }
0x1000   : > { %5613 = vmatprep.subr.bf16.mxu1 %v6156_v1 }
0x1007   : > { %5614 = vmatpush3.bf16.xpose.msra.mxu1 %v2404_v47 }
0x1008   : > { %5653 = vmatprep.subr.bf16.mxu1 %v6156_v1 }
0x100e   : > { %5616 = vmatmul.mubr.msk.bf16.vlgmr.msra.gmra.mrb[68].mxu1 %vm1024_vm2, %v2377_v49 }
0x100f   : > { %5663 = vmatprep.mubr.msk.bf16.mxu1 %vm6157_vm1, %v6156_v1 }
0x10b0   : > { %v2324_v50 = vpop.f32.mrb[60].mxu1 }
0x10b1   : > { %v5597_v51 = vpop.f32.mrb[61].mxu1 }
0x10b2   : > { %v2327_v52 = vpop.f32.mrb[62].mxu1 }
0x10b3   : > { %v5598_v55 = vpop.f32.mrb[63].mxu1 }
0x10b8   : > { %v2370_v56 = vpop.f32.mrb[64].mxu1 }
0x10b9   : > { %v6697_v57 = vadd.f32 %v2370_v56, %v2324_v50  ;;  %v5603_v58 = vpop.f32.mrb[65].mxu1 }
0x10ba   : > { %v2373_v61 = vpop.f32.mrb[66].mxu1 }
0x10bb   : > { %v5604_v62 = vpop.f32.mrb[67].mxu1 }
0x10e1   : > { %v2440_v12 = vpop.f32.mrb[68].mxu1 }
0x10e2   : > { %v5617_v0 = vpop.f32.mrb[69].mxu1  ;;  %v2446_v2 = vsel %vm2056_vm6, %v2440_v12, -inf }
0x10e3   : > { %2447 = vmax.xlane.f32.xlu0 %v2446_v2  ;;  %v2443_v4 = vpop.f32.mrb[70].mxu1 }
0x10e4   : > { %v5618_v5 = vpop.f32.mrb[71].mxu1 }
0x10f9   : > { %2458 = vrot.lane.b32.xlu0 %v6527_v54, %s7308_s1 }
0x10fd   : > { %2462 = vrot.lane.b32.xlu0 %v6533_v6, %s7308_s1 }
0x1101   : > { %2466 = vrot.lane.b32.xlu0 %v6544_v26, %s7308_s1 }
0x1105   : > { %2571 = vrot.lane.b32.xlu0 %v6529_v63, %s7304_s0 }
0x1109   : > { %2575 = vrot.lane.b32.xlu0 %v6537_v13, %s7304_s0 }
0x110d   : > { %2567 = vrot.lane.b32.xlu0 %v6593_v3, %s7304_s0 }
0x1111   : > { %2649 = vrot.lane.b32.xlu0 %v6527_v54, %s7306_s2 }
0x1170   : > { %v2448_v7 = vpop.xlane.xlu0 %2447 }
0x1171   : > { %v2449_v8 = vsub.f32 %v2440_v12, %v2448_v7 }
0x1173   : > { %v2450_v39 = vmul.f32 1.442695, %v2449_v8 }
0x1174   : > { %v2459_v9 = vpop.permute.xlu0 %2458 }
0x1175   : > { %6067 = vpow2.f32 %v2450_v39  ;;  %5620 = vmatpush3.bf16.msra.mxu0 %v2459_v9 }
0x1176   : > { %5621 = vmatprep.subr.bf16.mxu0 %v6156_v1 }
0x1178   : > { %v2463_v11 = vpop.permute.xlu0 %2462 }
0x1179   : > { %5622 = vmatpush3.bf16.msra.mxu0 %v2461_v10 }
0x117a   : > { %5623 = vmatprep.subr.bf16.mxu0 %v6156_v1 }
0x117c   : > { %v2467_v14 = vpop.permute.xlu0 %2466 }
0x117d   : > { %5624 = vmatpush3.bf16.msra.mxu0 %v2463_v11  ;;  %v2476_v24 = vand.u32 %v2467_v14, %v6655_v53 }
0x117e   : > { %5625 = vmatprep.subr.bf16.mxu0 %v6156_v1 }
0x117f   : > { %v6068_v3 = vpop.eup %6067 }
0x1180   : > { %v2572_v15 = vpop.permute.xlu0 %2571  ;;  %v2452_v16 = vsel %vm2056_vm6, %v6068_v3, 0.0 }
0x1181   : > { %2453 = vadd.xlane.f32.xlu1 %v2452_v16  ;;  %v2586_v45 = vsel %vm1024_vm2, %v2572_v15, 0 }
0x1184   : > { %v2576_v17 = vpop.permute.xlu0 %2575 }
0x1185   : > { %v2592_v49 = vsel %vm1024_vm2, %v2576_v17, 0 }
0x1188   : > { %v2568_v18 = vpop.permute.xlu0 %2567 }
0x118c   : > { %v2650_v19 = vpop.permute.xlu0 %2649 }
0x118d   : > { %5654 = vmatpush3.bf16.msra.mxu1 %v2650_v19 }
0x118e   : > { %5655 = vmatprep.subr.bf16.mxu1 %v6156_v1 }
0x1192   : > { %2464 = vrot.lane.b32.xlu1 %v6537_v13, %s7308_s1  ;;  %s7349_s1 = sld [smem:[#allocation14_spill]] }
0x1196   : > { %2569 = vrot.lane.b32.xlu1 %v6527_v54, %s7304_s0 }
0x119a   : > { %2573 = vrot.lane.b32.xlu1 %v6533_v6, %s7304_s0 }
0x119e   : > { %2577 = vrot.lane.b32.xlu1 %v6544_v26, %s7304_s0  ;;  %s7347_s0 = sld [smem:[#allocation11_spill]] }
0x11a4   : > { %v5095_v27 = vld [vmem:[%s7347_s0] ss:$0 sm:$0xff] }
0x120e   : > { %v2454_v22 = vpop.xlane.xlu1 %2453 }
0x120f   : > { %6069 = vrcp.f32 %v2454_v22 }
0x1212   : > { %v2465_v23 = vpop.permute.xlu1 %2464 }
0x1213   : > { %5626 = vmatpush3.bf16.msra.mxu0 %v2465_v23 }
0x1214   : > { %5627 = vmatprep.subr.bf16.mxu0 %v6156_v1 }
0x1216   : > { %v2570_v32 = vpop.permute.xlu1 %2569 }
0x1217   : > { %5628 = vmatpush3.bf16.msra.mxu0 %v2476_v24  ;;  %v2583_v43 = vsel %vm1024_vm2, %v2570_v32, 0 }
0x1218   : > { %5633 = vmatprep.subr.bf16.mxu0 %v6156_v1 }
0x1219   : > { %v6070_v54 = vpop.eup %6069 }
0x121a   : > { %v2456_v28 = vmul.f32 %v6070_v54, %v6068_v3  ;;  %v2574_v46 = vpop.permute.xlu1 %2573 }
0x121b   : > { %v2589_v47 = vsel %vm1024_vm2, %v2574_v46, 0 }
0x121c   : > { %v2457_v30 = vpack.c.bf16 %v2456_v28, %v2456_v28 }
0x121e   : > { %5630 = vmatmul.mubr.msk.bf16.vlgmr.msra.gmra.mrb[44].mxu0 %vm2056_vm6, %v2457_v30  ;;  %v2578_v50 = vpop.permute.xlu1 %2577 }
0x121f   : > { %5634 = vmatpush3.bf16.msra.mxu0 %v2524_v31  ;;  %5635 = vmatprep.mubr.msk.bf16.mxu0 %vm6157_vm1, %v6156_v1  ;;  %v2595_v51 = vsel %vm1024_vm2, %v2578_v50, 0 }
0x1220   : > { %5639 = vmatprep.subr.bf16.mxu0 %v6156_v1 }
0x12f1   : > { %v2512_v33 = vpop.f32.mrb[44].mxu0 }
0x12f2   : > { %v2518_v34 = vpack.c.bf16 %v2512_v33, %v2512_v33  ;;  %v5631_v35 = vpop.f32.mrb[45].mxu0 }
0x12f3   : > { %v2515_v38 = vpop.f32.mrb[46].mxu0 }
0x12f4   : > { %v5632_v44 = vpop.f32.mrb[47].mxu0  ;;  %5636 = vmatmul.mubr.msk.bf16.vlgmr.msra.gmra.mrb[48].mxu0 %vm1024_vm2, %v2518_v34 }
0x12f5   : > { %5640 = vmatpush3.bf16.xpose.msra.mxu0 %v2583_v43  ;;  %5649 = vmatprep.mubr.msk.bf16.mxu0 %vm6157_vm1, %v6156_v1 }
0x12f6   : > { %5641 = vmatprep.subr.bf16.mxu0 %v6156_v1 }
0x12fd   : > { %5642 = vmatpush3.bf16.xpose.msra.mxu0 %v2586_v45 }
0x12fe   : > { %5643 = vmatprep.subr.bf16.mxu0 %v6156_v1 }
0x1305   : > { %5644 = vmatpush3.bf16.xpose.msra.mxu0 %v2589_v47 }
0x1306   : > { %5645 = vmatprep.subr.bf16.mxu0 %v6156_v1 }
0x130d   : > { %5646 = vmatpush3.bf16.xpose.msra.mxu0 %v2592_v49 }
0x130e   : > { %5647 = vmatprep.subr.bf16.mxu0 %v6156_v1 }
0x1315   : > { %5648 = vmatpush3.bf16.xpose.msra.mxu0 %v2595_v51 }
0x1316   : > { %5681 = vmatprep.subr.bf16.mxu0 %v6156_v1 }
0x131c   : > { %5650 = vmatmul.mubr.msk.bf16.vlgmr.msra.gmra.mrb[52].mxu0 %vm1024_vm2, %v2568_v18 }
0x131d   : > { %5689 = vmatprep.mubr.msk.bf16.mxu0 %vm6157_vm1, %v6156_v1 }
0x13c7   : > { %v2560_v52 = vpop.f32.mrb[48].mxu0 }
0x13c8   : > { %v2566_v55 = vadd.f32 %v2560_v52, %v6697_v57  ;;  %v5637_v56 = vpop.f32.mrb[49].mxu0  ;;  %v2848_v52 = vld [vmem:[%s7349_s1] sm:$0xff] }
0x13c9   : > { %v2563_v58 = vpop.f32.mrb[50].mxu0  ;;  %v2850_v56 = vld [vmem:[%s7349_s1 + $0x10] sm:$0xff] }
0x13ca   : > { %v5638_v61 = vpop.f32.mrb[51].mxu0 }
0x13cb   : > { %v2851_v61 = vld [vmem:[%s7349_s1 + $0x18] sm:$0xff] }
0x13ef   : > { %v2631_v62 = vpop.f32.mrb[52].mxu0 }
0x13f0   : > { %v5651_v12 = vpop.f32.mrb[53].mxu0  ;;  %v2637_v0 = vsel %vm2056_vm6, %v2631_v62, -inf }
0x13f1   : > { %2638 = vmax.xlane.f32.xlu1 %v2637_v0  ;;  %v2634_v2 = vpop.f32.mrb[54].mxu0 }
0x13f2   : > { %v5652_v4 = vpop.f32.mrb[55].mxu0 }
0x13f3   : > { %v6794_v4 = vsub.s32 1, %v6555_v40 }
0x1402   : > { %2651 = vrot.lane.b32.xlu1 %v6529_v63, %s7306_s2 }
0x1406   : > { %2653 = vrot.lane.b32.xlu1 %v6533_v6, %s7306_s2 }
0x140a   : > { %2657 = vrot.lane.b32.xlu1 %v6544_v26, %s7306_s2 }
0x147e   : > { %v2639_v57 = vpop.xlane.xlu1 %2638 }
0x147f   : > { %v2640_v5 = vsub.f32 %v2631_v62, %v2639_v57  ;;  %v2858_v62 = vpack.c.bf16 %v2851_v61, %v2850_v56  ;;  %v2783_v57 = vrot.slane %v6561_v42, %v6794_v4 }
0x1481   : > { %v2641_v7 = vmul.f32 1.442695, %v2640_v5 }
0x1482   : > { %v2652_v8 = vpop.permute.xlu1 %2651 }
0x1483   : > { %6071 = vpow2.f32 %v2641_v7  ;;  %5656 = vmatpush3.bf16.msra.mxu1 %v2652_v8  ;;  %v2788_v8 = vrot.slane %v6564_v41, %v6794_v4 }
0x1484   : > { %5657 = vmatprep.subr.bf16.mxu1 %v6156_v1 }
0x1486   : > { %v2654_v39 = vpop.permute.xlu1 %2653 }
0x1487   : > { %5658 = vmatpush3.bf16.msra.mxu1 %v2654_v39 }
0x1488   : > { %5659 = vmatprep.subr.bf16.mxu1 %v6156_v1 }
0x148a   : > { %v2658_v26 = vpop.permute.xlu1 %2657 }
0x148b   : > { %v2667_v11 = vand.u32 %v2658_v26, %v6655_v53  ;;  %v2853_v26 = vld [vmem:[%s7349_s1 + $0x28] sm:$0xff] }
0x148d   : > { %v6072_v9 = vpop.eup %6071 }
0x148e   : > { %v2643_v63 = vsel %vm2056_vm6, %v6072_v9, 0.0 }
0x148f   : > { %2644 = vadd.xlane.f32.xlu0 %v2643_v63 }
0x14a5   : > { %2655 = vrot.lane.b32.xlu0 %v6537_v13, %s7306_s2  ;;  %v1991_v13 = vld [vmem:[%s7346_s28 + $0x18] sm:$0xff]  ;;  %s7348_s2 = sld [smem:[#allocation12_spill]] }
0x14a6   : > { %v2710_v16 = vpack.c.bf16 %v1991_v13, %v1991_v13 }
0x14a8   : > { %v2715_v17 = vsel %vm1028_vm0, %v2710_v16, 0 }
0x14ab   : > { %v2790_v46 = vld [vmem:[%s7348_s2] sm:$0xff]  ;;  %v2791_v47 = vld [vmem:[%s7348_s2 + $0x8] sm:$0xff]  ;;  %v2793_v50 = vld [vmem:[%s7348_s2 + $0x18] sm:$0xff] }
0x14ac   : > { %v2795_v49 = vpack.c.bf16 %v2791_v47, %v2790_v46  ;;  %v5104_v47 = vld [vmem:[%s7337_s8 + $0x30] sm:$0xff] }
0x151c   : > { %v2645_v6 = vpop.xlane.xlu0 %2644 }
0x151d   : > { %6073 = vrcp.f32 %v2645_v6  ;;  %v2852_v6 = vld [vmem:[%s7349_s1 + $0x20] sm:$0xff] }
0x1520   : > { %v2656_v10 = vpop.permute.xlu0 %2655 }
0x1521   : > { %5660 = vmatpush3.bf16.msra.mxu1 %v2656_v10  ;;  %v2859_v10 = vpack.c.bf16 %v2853_v26, %v2852_v6 }
0x1522   : > { %5661 = vmatprep.subr.bf16.mxu1 %v6156_v1 }
0x1525   : > { %5662 = vmatpush3.bf16.msra.mxu1 %v2667_v11  ;;  %v2854_v11 = vld [vmem:[%s7349_s1 + $0x30] sm:$0xff] }
0x1526   : > { %5667 = vmatprep.subr.bf16.mxu1 %v6156_v1 }
0x1527   : > { %v6074_v14 = vpop.eup %6073 }
0x1528   : > { %v2647_v3 = vmul.f32 %v6074_v14, %v6072_v9  ;;  %v2855_v14 = vld [vmem:[%s7349_s1 + $0x38] sm:$0xff] }
0x152a   : > { %v2648_v15 = vpack.c.bf16 %v2647_v3, %v2647_v3  ;;  %v2860_v3 = vpack.c.bf16 %v2855_v14, %v2854_v11 }
0x152c   : > { %5664 = vmatmul.mubr.msk.bf16.vlgmr.msra.gmra.mrb[72].mxu1 %vm2056_vm6, %v2648_v15  ;;  %v5096_v15 = vld [vmem:[%s7350_s18] ss:$0 sm:$0xff] }
0x152d   : > { %5669 = vmatprep.mubr.msk.bf16.mxu1 %vm6157_vm1, %v6156_v1  ;;  %5668 = vmatpush3.bf16.msra.mxu1 %v2715_v17 }
0x152e   : > { %5673 = vmatprep.subr.bf16.mxu1 %v6156_v1 }
0x15ff   : > { %v2703_v18 = vpop.f32.mrb[72].mxu1 }
0x1600   : > { %v2709_v19 = vpack.c.bf16 %v2703_v18, %v2703_v18  ;;  %v5665_v22 = vpop.f32.mrb[73].mxu1 }
0x1601   : > { %v2706_v23 = vpop.f32.mrb[74].mxu1 }
0x1602   : > { %v5666_v24 = vpop.f32.mrb[75].mxu1  ;;  %5670 = vmatmul.mubr.msk.bf16.vlgmr.msra.gmra.mrb[76].mxu1 %vm1024_vm2, %v2709_v19 }
0x1603   : > { %5677 = vmatprep.mubr.msk.bf16.mxu1 %vm6157_vm1, %v6156_v1  ;;  %5674 = vmatpush3.bf16.msra.mxu1 %v2795_v49  ;;  %v5098_v24 = vld [vmem:[%s7351_s16] ss:$0 sm:$0xff]  ;;  %v5105_v49 = vld [vmem:[%s7337_s8 + $0x38] sm:$0xff] }
0x1604   : > { %5675 = vmatprep.subr.bf16.mxu1 %v6156_v1 }
0x16d5   : > { %v2751_v25 = vpop.f32.mrb[76].mxu1 }
0x16d6   : > { %v2757_v54 = vadd.f32 %v2751_v25, %v2566_v55  ;;  %v5671_v28 = vpop.f32.mrb[77].mxu1  ;;  %v2849_v55 = vld [vmem:[%s7349_s1 + $0x8] sm:$0xff] }
0x16d7   : > { %v2754_v30 = vpop.f32.mrb[78].mxu1  ;;  %v2857_v58 = vpack.c.bf16 %v2849_v55, %v2848_v52  ;;  %v6823_v55 = vsub.s32 2, %v6555_v40  ;;  %v5107_v40 = vld [vmem:[%s7336_s14 + $0x1] ss:$0 sm:$0xff]  ;;  %s7360_s14 = smov 48  }
0x16d8   : > { %v2765_v31 = vadd.f32 %v5095_v27, %v2757_v54  ;;  %v5672_v32 = vpop.f32.mrb[79].mxu1 }
0x16d9   : > { %5682 = vmatpush3.bf16.msra.mxu0 %v2857_v58  ;;  %v2929_v56 = vrot.slane %v6561_v42, %v6823_v55 }
0x16da   : > { %v2766_v33 = vadd.f32 %v2765_v31, %v6570_v48  ;;  %v2792_v48 = vld [vmem:[%s7348_s2 + $0x10] sm:$0xff]  ;;  %5683 = vmatprep.subr.bf16.mxu0 %v6156_v1 }
0x16db   : > { %v2796_v51 = vpack.c.bf16 %v2793_v50, %v2792_v48  ;;  %v2947_v48 = vpack.c.bf16 %v5105_v49, %v5104_v47 }
0x16dc   : > { %v2767_v34 = vsel %vm1107_vm3, %v2766_v33, 0.0 }
0x16dd   : > { %2768 = vadd.xlane.f32.xlu0 %v2767_v34  ;;  %5676 = vmatpush3.bf16.msra.mxu1 %v2796_v51 }
0x16de   : > { %5693 = vmatprep.subr.bf16.mxu1 %v6156_v1  ;;  %5684 = vmatpush3.bf16.msra.mxu0 %v2858_v62  ;;  %v2934_v62 = vrot.slane %v6564_v41, %v6823_v55 }
0x16df   : > { %5685 = vmatprep.subr.bf16.mxu0 %v6156_v1 }
0x16e2   : > { %5686 = vmatpush3.bf16.msra.mxu0 %v2859_v10 }
0x16e3   : > { %5687 = vmatprep.subr.bf16.mxu0 %v6156_v1 }
0x16e6   : > { %5688 = vmatpush3.bf16.msra.mxu0 %v2860_v3 }
0x16e7   : > { %5707 = vmatprep.subr.bf16.mxu0 %v6156_v1 }
0x176a   : > { %v2769_v35 = vpop.xlane.xlu0 %2768 }
0x176b   : > { %v2770_v38 = vmul.f32 0.03125, %v2769_v35 }
0x176d   : > { %v2771_v43 = vsub.f32 %v2766_v33, %v2770_v38 }
0x176f   : > { %v2772_v44 = vmul.f32 %v2771_v43, %v2771_v43 }
0x1771   : > { %v2773_v45 = vsel %vm1107_vm3, %v2772_v44, 0.0  ;;  %v5102_v44 = vld [vmem:[%s7337_s8 + $0x20] sm:$0xff] }
0x1772   : > { %2774 = vadd.xlane.f32.xlu1 %v2773_v45  ;;  %v5103_v45 = vld [vmem:[%s7337_s8 + $0x28] sm:$0xff]  ;;  %s7355_s8 = smov 56  }
0x1773   : > { %v2946_v46 = vpack.c.bf16 %v5103_v45, %v5102_v44 }
0x17ff   : > { %v2775_v12 = vpop.xlane.xlu1 %2774 }
0x1800   : > { %v2776_v0 = vmul.f32 0.03125, %v2775_v12 }
0x1802   : > { %v2777_v2 = vadd.f32 1e-05, %v2776_v0 }
0x1804   : > { %6075 = vrsqrt.f32 %v2777_v2 }
0x180e   : > { %v6076_v5 = vpop.eup %6075 }
0x180f   : > { %v2779_v7 = vmul.f32 %v6076_v5, %v2771_v43 }
0x1811   : > { %v2784_v39 = vmul.f32 %v2783_v57, %v2779_v7 }
0x1813   : > { %v2789_v9 = vadd.f32 %v2788_v8, %v2784_v39 }
0x1815   : > { %v2794_v63 = vpack.c.bf16 %v2789_v9, %v2789_v9 }
0x1817   : > { %5678 = vmatmul.mubr.msk.bf16.vlgmr.msra.gmra.mrb[80].mxu1 %vm1107_vm3, %v2794_v63 }
0x1818   : > { %5697 = vmatprep.mubr.msk.bf16.mxu1 %vm6157_vm1, %v6156_v1  ;;  %5694 = vmatpush3.bf16.msra.mxu1 %v2946_v46 }
0x1819   : > { %5695 = vmatprep.subr.bf16.mxu1 %v6156_v1 }
0x181c   : > { %5696 = vmatpush3.bf16.msra.mxu1 %v2947_v48 }
0x181d   : > { %5701 = vmatprep.subr.bf16.mxu1 %v6156_v1 }
0x18ea   : > { %v2841_v13 = vpop.f32.mrb[80].mxu1 }
0x18eb   : > { %v2842_v16 = vadd.f32 %v5096_v15, %v2841_v13  ;;  %v5679_v17 = vpop.f32.mrb[81].mxu1 }
0x18ec   : > { %v2844_v18 = vpop.f32.mrb[82].mxu1 }
0x18ed   : > { %v2847_v19 = vmax.f32 %v2842_v16, 0.0  ;;  %v5680_v22 = vpop.f32.mrb[83].mxu1 }
0x18ef   : > { %v2856_v23 = vpack.c.bf16 %v2847_v19, %v2847_v19 }
0x18f1   : > { %5690 = vmatmul.mubr.msk.bf16.vlgmr.msra.gmra.mrb[56].mxu0 %vm2868_vm8, %v2856_v23 }
0x18f2   : > { %5709 = vmatprep.mubr.msk.bf16.mxu0 %vm6157_vm1, %v6156_v1 }
0x19c4   : > { %v2906_v25 = vpop.f32.mrb[56].mxu0 }
0x19c5   : > { %v2907_v27 = vadd.f32 %v5098_v24, %v2906_v25  ;;  %v5691_v54 = vpop.f32.mrb[57].mxu0 }
0x19c6   : > { %v2909_v28 = vpop.f32.mrb[58].mxu0 }
0x19c7   : > { %v5692_v30 = vpop.f32.mrb[59].mxu0  ;;  %v2912_v31 = vadd.f32 %v2907_v27, %v2789_v9 }
0x19c9   : > { %v2913_v32 = vsel %vm1107_vm3, %v2912_v31, 0.0 }
0x19ca   : > { %2914 = vadd.xlane.f32.xlu0 %v2913_v32 }
0x1a57   : > { %v2915_v33 = vpop.xlane.xlu0 %2914 }
0x1a58   : > { %v2916_v34 = vmul.f32 0.03125, %v2915_v33 }
0x1a5a   : > { %v2917_v35 = vsub.f32 %v2912_v31, %v2916_v34 }
0x1a5c   : > { %v2918_v38 = vmul.f32 %v2917_v35, %v2917_v35 }
0x1a5e   : > { %v2919_v43 = vsel %vm1107_vm3, %v2918_v38, 0.0 }
0x1a5f   : > { %2920 = vadd.xlane.f32.xlu0 %v2919_v43 }
0x1aec   : > { %v2921_v50 = vpop.xlane.xlu0 %2920 }
0x1aed   : > { %v2922_v51 = vmul.f32 0.03125, %v2921_v50 }
0x1aef   : > { %v2923_v52 = vadd.f32 1e-05, %v2922_v51 }
0x1af1   : > { %6077 = vrsqrt.f32 %v2923_v52 }
0x1afb   : > { %v6078_v58 = vpop.eup %6077 }
0x1afc   : > { %v2925_v61 = vmul.f32 %v6078_v58, %v2917_v35 }
0x1afe   : > { %v2930_v12 = vmul.f32 %v2929_v56, %v2925_v61  ;;  %v5109_v56 = vld [vmem:[%s6228_s19 + $0x20] sm:$0xff]  ;;  %v5110_v61 = vld [vmem:[%s6228_s19 + $0x28] sm:$0xff] }
0x1aff   : > { %v3117_v58 = vpack.c.bf16 %v5109_v56, %v5109_v56 }
0x1b00   : > { %v6829_v0 = vadd.f32 %v2934_v62, %v2930_v12  ;;  %v3230_v12 = vpack.c.bf16 %v5110_v61, %v5110_v61 }
0x1b01   : > { %v3281_v62 = vsel %vm1028_vm0, %v3117_v58, 0 }
0x1b02   : > { %v2945_v2 = vpack.c.bf16 %v6829_v0, %v6829_v0 }
0x1b04   : > { %5698 = vmatmul.mubr.msk.bf16.vlgmr.msra.gmra.mrb[84].mxu1 %vm1107_vm3, %v2945_v2  ;;  %v3235_v2 = vsel %vm1028_vm0, %v3230_v12, 0 }
0x1b05   : > { %5703 = vmatprep.mubr.msk.bf16.mxu1 %vm6157_vm1, %v6156_v1 }
0x1bd7   : > { %v2993_v57 = vpop.f32.mrb[84].mxu1 }
0x1bd8   : > { %v2994_v5 = vadd.f32 %v5107_v40, %v2993_v57  ;;  %v5699_v42 = vpop.f32.mrb[85].mxu1 }
0x1bd9   : > { %v2996_v7 = vpop.f32.mrb[86].mxu1 }
0x1bda   : > { %v2999_v8 = vmul.f32 0.35355338, %v2994_v5  ;;  %v6837_v39 = vpack.c.bf16 %v2994_v5, %v2994_v5  ;;  %v5700_v41 = vpop.f32.mrb[87].mxu1 }
0x1bdc   : > { %3121 = vrot.lane.b32.xlu0 %v6837_v39, %s7314_s22  ;;  %3008 = vrot.lane.b32.xlu1 %v6837_v39, %s7352_s3  ;;  %v6843_v9 = vpack.c.bf16 %v2999_v8, %v2999_v8  ;;  %s7354_s22 = smov 64  }
0x1be0   : > { %3119 = vrot.lane.b32.xlu1 %v6843_v9, %s7353_s5 }
0x1c4e   : > { %v3009_v63 = vpop.permute.xlu1 %3008  ;;  %v3122_v26 = vpop.permute.xlu0 %3121 }
0x1c4f   : > { %v3014_v6 = vsel %vm1024_vm2, %v3009_v63, 0  ;;  %v3127_v10 = vsel %vm1024_vm2, %v3122_v26, 0 }
0x1c50   : > { %5702 = vmatpush3.bf16.xpose.msra.mxu1 %v3014_v6 }
0x1c51   : > { %5713 = vmatprep.subr.bf16.mxu1 %v6156_v1 }
0x1c52   : > { %v3120_v11 = vpop.permute.xlu1 %3119 }
0x1c57   : > { %5704 = vmatmul.mubr.msk.bf16.vlgmr.msra.gmra.mrb[88].mxu1 %vm1024_vm2, %v6843_v9 }
0x1c58   : > { %5714 = vmatpush3.bf16.xpose.msra.mxu1 %v3127_v10  ;;  %5715 = vmatprep.mubr.msk.bf16.mxu1 %vm6157_vm1, %v6156_v1 }
0x1c59   : > { %5725 = vmatprep.subr.bf16.mxu1 %v6156_v1 }
0x1c5f   : > { %5716 = vmatmul.mubr.msk.bf16.vlgmr.msra.gmra.mrb[92].mxu1 %vm1024_vm2, %v3120_v11 }
0x1c60   : > { %5727 = vmatprep.mubr.msk.bf16.mxu1 %vm6157_vm1, %v6156_v1  ;;  %5726 = vmatpush3.bf16.msra.mxu1 %v3235_v2 }
0x1c61   : > { %5737 = vmatprep.subr.bf16.mxu1 %v6156_v1 }
0x1d2a   : > { %v3050_v14 = vpop.f32.mrb[88].mxu1 }
0x1d2b   : > { %v5705_v3 = vpop.f32.mrb[89].mxu1  ;;  %v3056_v15 = vsel %vm1024_vm2, %v3050_v14, -inf }
0x1d2c   : > { %3057 = vmax.xlane.f32.xlu1 %v3056_v15  ;;  %v3053_v13 = vpop.f32.mrb[90].mxu1 }
0x1d2d   : > { %v5706_v16 = vpop.f32.mrb[91].mxu1 }
0x1d32   : > { %v3163_v17 = vpop.f32.mrb[92].mxu1 }
0x1d33   : > { %v5717_v18 = vpop.f32.mrb[93].mxu1  ;;  %v3169_v19 = vsel %vm1024_vm2, %v3163_v17, -inf }
0x1d34   : > { %3170 = vmax.xlane.f32.xlu0 %v3169_v19  ;;  %v3166_v22 = vpop.f32.mrb[94].mxu1 }
0x1d35   : > { %v5718_v23 = vpop.f32.mrb[95].mxu1 }
0x1db9   : > { %v3058_v24 = vpop.xlane.xlu1 %3057 }
0x1dba   : > { %v3059_v25 = vsub.f32 %v3050_v14, %v3058_v24 }
0x1dbc   : > { %v3060_v27 = vmul.f32 1.442695, %v3059_v25 }
0x1dbe   : > { %6079 = vpow2.f32 %v3060_v27 }
0x1dc1   : > { %v3171_v54 = vpop.xlane.xlu0 %3170 }
0x1dc2   : > { %v3172_v28 = vsub.f32 %v3163_v17, %v3171_v54 }
0x1dc4   : > { %v3173_v30 = vmul.f32 1.442695, %v3172_v28 }
0x1dc6   : > { %6081 = vpow2.f32 %v3173_v30 }
0x1dc8   : > { %v6080_v31 = vpop.eup %6079 }
0x1dc9   : > { %v3062_v32 = vsel %vm1024_vm2, %v6080_v31, 0.0 }
0x1dca   : > { %3063 = vadd.xlane.f32.xlu0 %v3062_v32 }
0x1dd0   : > { %v6082_v33 = vpop.eup %6081 }
0x1dd1   : > { %v3175_v34 = vsel %vm1024_vm2, %v6082_v33, 0.0 }
0x1dd2   : > { %3176 = vadd.xlane.f32.xlu1 %v3175_v34 }
0x1de0   : > { %3068 = vrot.lane.b32.xlu0 %v6837_v39, %s7354_s22  ;;  %s7359_s22 = smov 104  }
0x1de3   : > { %3181 = vrot.lane.b32.xlu1 %v6837_v39, %s7355_s8  ;;  %s7358_s8 = smov 72  }
0x1de4   : > { %3323 = vrot.lane.b32.xlu0 %v6843_v9, %s7356_s9 }
0x1de7   : > { %3325 = vrot.lane.b32.xlu1 %v6837_v39, %s7357_s13 }
0x1e57   : > { %v3064_v35 = vpop.xlane.xlu0 %3063 }
0x1e58   : > { %6083 = vrcp.f32 %v3064_v35 }
0x1e5b   : > { %v3069_v38 = vpop.permute.xlu0 %3068 }
0x1e5c   : > { %v3074_v43 = vsel %vm1028_vm0, %v3069_v38, 0 }
0x1e5d   : > { %5708 = vmatpush3.bf16.msra.mxu0 %v3074_v43 }
0x1e5e   : > { %5719 = vmatprep.subr.bf16.mxu0 %v6156_v1 }
0x1e5f   : > { %v3177_v44 = vpop.xlane.xlu1 %3176  ;;  %v3324_v14 = vpop.permute.xlu0 %3323 }
0x1e60   : > { %6085 = vrcp.f32 %v3177_v44 }
0x1e62   : > { %v6084_v45 = vpop.eup %6083 }
0x1e63   : > { %v3066_v46 = vmul.f32 %v6084_v45, %v6080_v31  ;;  %v3182_v47 = vpop.permute.xlu1 %3181 }
0x1e64   : > { %v3187_v48 = vsel %vm1028_vm0, %v3182_v47, 0 }
0x1e65   : > { %v3067_v49 = vpack.c.bf16 %v3066_v46, %v3066_v46 }
0x1e67   : > { %5710 = vmatmul.mubr.msk.bf16.vlgmr.msra.gmra.mrb[60].mxu0 %vm1024_vm2, %v3067_v49  ;;  %v3326_v8 = vpop.permute.xlu1 %3325 }
0x1e68   : > { %5720 = vmatpush3.bf16.msra.mxu0 %v3187_v48  ;;  %5721 = vmatprep.mubr.msk.bf16.mxu0 %vm6157_vm1, %v6156_v1  ;;  %v3331_v10 = vsel %vm1024_vm2, %v3326_v8, 0  ;;  %v5111_v48 = vld [vmem:[%s6228_s19 + $0x30] sm:$0xff] }
0x1e69   : > { %5731 = vmatprep.subr.bf16.mxu0 %v6156_v1 }
0x1e6a   : > { %v6086_v50 = vpop.eup %6085 }
0x1e6b   : > { %v3179_v51 = vmul.f32 %v6086_v50, %v6082_v33  ;;  %v3434_v50 = vpack.c.bf16 %v5111_v48, %v5111_v48 }
0x1e6d   : > { %v3180_v52 = vpack.c.bf16 %v3179_v51, %v3179_v51  ;;  %v3439_v51 = vsel %vm1028_vm0, %v3434_v50, 0 }
0x1e6f   : > { %5722 = vmatmul.mubr.msk.bf16.vlgmr.msra.gmra.mrb[64].mxu0 %vm1024_vm2, %v3180_v52 }
0x1e70   : > { %5733 = vmatprep.mubr.msk.bf16.mxu0 %vm6157_vm1, %v6156_v1  ;;  %5732 = vmatpush3.bf16.msra.mxu0 %v3281_v62 }
0x1e71   : > { %5743 = vmatprep.subr.bf16.mxu0 %v6156_v1 }
0x1f3a   : > { %v3110_v40 = vpop.f32.mrb[60].mxu0 }
0x1f3b   : > { %v3116_v57 = vpack.c.bf16 %v3110_v40, %v3110_v40  ;;  %v5711_v5 = vpop.f32.mrb[61].mxu0 }
0x1f3c   : > { %v3113_v42 = vpop.f32.mrb[62].mxu0 }
0x1f3d   : > { %v5712_v7 = vpop.f32.mrb[63].mxu0  ;;  %5734 = vmatmul.mubr.msk.bf16.vlgmr.msra.gmra.mrb[68].mxu0 %vm1024_vm2, %v3116_v57 }
0x1f3e   : > { %5745 = vmatprep.mubr.msk.bf16.mxu0 %vm6157_vm1, %v6156_v1 }
0x1f42   : > { %v3223_v41 = vpop.f32.mrb[64].mxu0 }
0x1f43   : > { %v3229_v63 = vpack.c.bf16 %v3223_v41, %v3223_v41  ;;  %v5723_v6 = vpop.f32.mrb[65].mxu0 }
0x1f44   : > { %v3226_v26 = vpop.f32.mrb[66].mxu0 }
0x1f45   : > { %v5724_v11 = vpop.f32.mrb[67].mxu0  ;;  %5728 = vmatmul.mubr.msk.bf16.vlgmr.msra.gmra.mrb[96].mxu1 %vm1024_vm2, %v3229_v63 }
0x1f46   : > { %5738 = vmatpush3.bf16.xpose.msra.mxu1 %v3331_v10  ;;  %5739 = vmatprep.mubr.msk.bf16.mxu1 %vm6157_vm1, %v6156_v1 }
0x1f47   : > { %5749 = vmatprep.subr.bf16.mxu1 %v6156_v1 }
0x1f4d   : > { %5740 = vmatmul.mubr.msk.bf16.vlgmr.msra.gmra.mrb[100].mxu1 %vm1024_vm2, %v3324_v14 }
0x1f4e   : > { %5751 = vmatprep.mubr.msk.bf16.mxu1 %vm6157_vm1, %v6156_v1  ;;  %5750 = vmatpush3.bf16.msra.mxu1 %v3439_v51 }
0x1f4f   : > { %5761 = vmatprep.subr.bf16.mxu1 %v6156_v1 }
0x2010   : > { %v3317_v3 = vpop.f32.mrb[68].mxu0 }
0x2011   : > { %v5735_v15 = vpop.f32.mrb[69].mxu0 }
0x2012   : > { %v3320_v13 = vpop.f32.mrb[70].mxu0 }
0x2013   : > { %v5736_v16 = vpop.f32.mrb[71].mxu0 }
0x2018   : > { %v3271_v17 = vpop.f32.mrb[96].mxu1 }
0x2019   : > { %v6897_v18 = vadd.f32 %v3317_v3, %v3271_v17  ;;  %v5729_v19 = vpop.f32.mrb[97].mxu1 }
0x201a   : > { %v3274_v22 = vpop.f32.mrb[98].mxu1  ;;  %v5112_v19 = vld [vmem:[%s6228_s19 + $0x38] sm:$0xff] }
0x201b   : > { %v5730_v23 = vpop.f32.mrb[99].mxu1  ;;  %v3593_v22 = vpack.c.bf16 %v5112_v19, %v5112_v19 }
0x201c   : > { %v5134_v23 = vld [vmem:[%s6248_s12 + $0x20] sm:$0xff] }
0x2020   : > { %v3367_v24 = vpop.f32.mrb[100].mxu1 }
0x2021   : > { %v5741_v25 = vpop.f32.mrb[101].mxu1  ;;  %v3373_v27 = vsel %vm1024_vm2, %v3367_v24, -inf }
0x2022   : > { %3374 = vmax.xlane.f32.xlu1 %v3373_v27  ;;  %v3370_v54 = vpop.f32.mrb[102].mxu1 }
0x2023   : > { %v5742_v28 = vpop.f32.mrb[103].mxu1 }
0x2033   : > { %3484 = vrot.lane.b32.xlu1 %v6837_v39, %s7358_s8 }
0x2037   : > { %3482 = vrot.lane.b32.xlu1 %v6843_v9, %s7359_s22 }
0x20af   : > { %v3375_v30 = vpop.xlane.xlu1 %3374 }
0x20b0   : > { %v3376_v31 = vsub.f32 %v3367_v24, %v3375_v30  ;;  %v5135_v24 = vld [vmem:[%s6248_s12 + $0x28] sm:$0xff]  ;;  %v5136_v30 = vld [vmem:[%s6248_s12 + $0x30] sm:$0xff] }
0x20b1   : > { %v3739_v27 = vpack.c.bf16 %v5135_v24, %v5134_v23 }
0x20b2   : > { %v3377_v32 = vmul.f32 1.442695, %v3376_v31  ;;  %v5137_v31 = vld [vmem:[%s6248_s12 + $0x38] sm:$0xff] }
0x20b3   : > { %v3485_v45 = vpop.permute.xlu1 %3484 }
0x20b4   : > { %6087 = vpow2.f32 %v3377_v32  ;;  %v3490_v47 = vsel %vm1024_vm2, %v3485_v45, 0  ;;  %v5139_v45 = vld [vmem:[%s6253_s20 + $0x1] ss:$0 sm:$0xff] }
0x20b7   : > { %v3483_v49 = vpop.permute.xlu1 %3482 }
0x20be   : > { %v6088_v33 = vpop.eup %6087 }
0x20bf   : > { %v3379_v34 = vsel %vm1024_vm2, %v6088_v33, 0.0 }
0x20c0   : > { %3380 = vadd.xlane.f32.xlu0 %v3379_v34  ;;  %v3740_v34 = vpack.c.bf16 %v5137_v31, %v5136_v30  ;;  %v5130_v30 = vld [vmem:[%s7342_s15 + $0x38] sm:$0xff] }
0x20d6   : > { %3385 = vrot.lane.b32.xlu0 %v6837_v39, %s7360_s14  ;;  %s7361_s14 = smov 40  }
0x214d   : > { %v3381_v35 = vpop.xlane.xlu0 %3380 }
0x214e   : > { %6089 = vrcp.f32 %v3381_v35 }
0x2151   : > { %v3386_v38 = vpop.permute.xlu0 %3385 }
0x2152   : > { %v3391_v43 = vsel %vm1028_vm0, %v3386_v38, 0 }
0x2153   : > { %5744 = vmatpush3.bf16.msra.mxu0 %v3391_v43 }
0x2154   : > { %5755 = vmatprep.subr.bf16.mxu0 %v6156_v1 }
0x2158   : > { %v6090_v9 = vpop.eup %6089 }
0x2159   : > { %v3383_v44 = vmul.f32 %v6090_v9, %v6088_v33 }
0x215b   : > { %v3384_v46 = vpack.c.bf16 %v3383_v44, %v3383_v44 }
0x215d   : > { %5746 = vmatmul.mubr.msk.bf16.vlgmr.msra.gmra.mrb[72].mxu0 %vm1024_vm2, %v3384_v46 }
0x215e   : > { %5756 = vmatpush3.bf16.xpose.msra.mxu0 %v3490_v47  ;;  %5757 = vmatprep.mubr.msk.bf16.mxu0 %vm6157_vm1, %v6156_v1 }
0x215f   : > { %5767 = vmatprep.subr.bf16.mxu0 %v6156_v1 }
0x2165   : > { %5758 = vmatmul.mubr.msk.bf16.vlgmr.msra.gmra.mrb[76].mxu0 %vm1024_vm2, %v3483_v49 }
0x2166   : > { %5769 = vmatprep.mubr.msk.bf16.mxu0 %vm6157_vm1, %v6156_v1 }
0x2230   : > { %v3427_v52 = vpop.f32.mrb[72].mxu0 }
0x2231   : > { %v3433_v56 = vpack.c.bf16 %v3427_v52, %v3427_v52  ;;  %v5747_v58 = vpop.f32.mrb[73].mxu0 }
0x2232   : > { %v3430_v61 = vpop.f32.mrb[74].mxu0 }
0x2233   : > { %v5748_v62 = vpop.f32.mrb[75].mxu0  ;;  %5752 = vmatmul.mubr.msk.bf16.vlgmr.msra.gmra.mrb[104].mxu1 %vm1024_vm2, %v3433_v56 }
0x2234   : > { %5763 = vmatprep.mubr.msk.bf16.mxu1 %vm6157_vm1, %v6156_v1 }
0x2238   : > { %v3526_v12 = vpop.f32.mrb[76].mxu0 }
0x2239   : > { %v5759_v2 = vpop.f32.mrb[77].mxu0  ;;  %v3532_v40 = vsel %vm1024_vm2, %v3526_v12, -inf }
0x223a   : > { %3533 = vmax.xlane.f32.xlu0 %v3532_v40  ;;  %v3529_v57 = vpop.f32.mrb[78].mxu0 }
0x223b   : > { %v5760_v5 = vpop.f32.mrb[79].mxu0 }
0x2250   : > { %3544 = vrot.lane.b32.xlu0 %v6837_v39, %s7361_s14 }
0x22c7   : > { %v3534_v42 = vpop.xlane.xlu0 %3533 }
0x22c8   : > { %v3535_v7 = vsub.f32 %v3526_v12, %v3534_v42 }
0x22ca   : > { %v3536_v8 = vmul.f32 1.442695, %v3535_v7 }
0x22cb   : > { %v3545_v41 = vpop.permute.xlu0 %3544 }
0x22cc   : > { %6091 = vpow2.f32 %v3536_v8  ;;  %v3550_v63 = vsel %vm1028_vm0, %v3545_v41, 0 }
0x22cd   : > { %5762 = vmatpush3.bf16.msra.mxu1 %v3550_v63 }
0x22ce   : > { %5773 = vmatprep.subr.bf16.mxu1 %v6156_v1 }
0x22d6   : > { %v6092_v6 = vpop.eup %6091 }
0x22d7   : > { %v3538_v26 = vsel %vm1024_vm2, %v6092_v6, 0.0 }
0x22d8   : > { %3539 = vadd.xlane.f32.xlu1 %v3538_v26 }
0x2306   : > { %v3475_v10 = vpop.f32.mrb[104].mxu1 }
0x2307   : > { %v3481_v11 = vadd.f32 %v3475_v10, %v6897_v18  ;;  %v5753_v39 = vpop.f32.mrb[105].mxu1  ;;  %v3598_v18 = vsel %vm1028_vm0, %v3593_v22, 0 }
0x2308   : > { %v3478_v14 = vpop.f32.mrb[106].mxu1  ;;  %5768 = vmatpush3.bf16.msra.mxu0 %v3598_v18 }
0x2309   : > { %v5754_v3 = vpop.f32.mrb[107].mxu1  ;;  %5781 = vmatprep.subr.bf16.mxu0 %v6156_v1 }
0x2365   : > { %v3540_v15 = vpop.xlane.xlu1 %3539 }
0x2366   : > { %6093 = vrcp.f32 %v3540_v15 }
0x2370   : > { %v6094_v13 = vpop.eup %6093 }
0x2371   : > { %v3542_v16 = vmul.f32 %v6094_v13, %v6092_v6 }
0x2373   : > { %v3543_v17 = vpack.c.bf16 %v3542_v16, %v3542_v16 }
0x2375   : > { %5764 = vmatmul.mubr.msk.bf16.vlgmr.msra.gmra.mrb[108].mxu1 %vm1024_vm2, %v3543_v17 }
0x2376   : > { %5777 = vmatprep.mubr.msk.bf16.mxu1 %vm6157_vm1, %v6156_v1 }
0x2448   : > { %v3586_v25 = vpop.f32.mrb[108].mxu1 }
0x2449   : > { %v3592_v54 = vpack.c.bf16 %v3586_v25, %v3586_v25  ;;  %v5765_v28 = vpop.f32.mrb[109].mxu1  ;;  %v5127_v25 = vld [vmem:[%s7342_s15 + $0x20] sm:$0xff] }
0x244a   : > { %v3589_v32 = vpop.f32.mrb[110].mxu1  ;;  %v5129_v28 = vld [vmem:[%s7342_s15 + $0x30] sm:$0xff] }
0x244b   : > { %v5766_v33 = vpop.f32.mrb[111].mxu1  ;;  %5770 = vmatmul.mubr.msk.bf16.vlgmr.msra.gmra.mrb[80].mxu0 %vm1024_vm2, %v3592_v54  ;;  %v3681_v31 = vpack.c.bf16 %v5130_v30, %v5129_v28 }
0x244c   : > { %5782 = vmatpush3.bf16.msra.mxu0 %v3739_v27  ;;  %5785 = vmatprep.mubr.msk.bf16.mxu0 %vm6157_vm1, %v6156_v1  ;;  %v5128_v27 = vld [vmem:[%s7342_s15 + $0x28] sm:$0xff] }
0x244d   : > { %5783 = vmatprep.subr.bf16.mxu0 %v6156_v1  ;;  %v3680_v54 = vpack.c.bf16 %v5128_v27, %v5127_v25 }
0x244f   : > { %5774 = vmatpush3.bf16.msra.mxu1 %v3680_v54 }
0x2450   : > { %5784 = vmatpush3.bf16.msra.mxu0 %v3740_v34  ;;  %5775 = vmatprep.subr.bf16.mxu1 %v6156_v1 }
0x2451   : > { %5819 = vmatprep.subr.bf16.mxu0 %v6156_v1 }
0x2453   : > { %5786 = vmatmul.mubr.msk.bf16.vlgmr.msra.gmra.mrb[84].mxu0 %vm1107_vm3, %v6390_v60  ;;  %v5126_v60 = vld [vmem:[%s6233_s24 + $0x1] ss:$0 sm:$0xff]  ;;  %5776 = vmatpush3.bf16.msra.mxu1 %v3681_v31 }
0x2454   : > { %5789 = vmatprep.mubr.msk.bf16.mxu0 %vm6157_vm1, %v6156_v1  ;;  %5805 = vmatprep.subr.bf16.mxu1 %v6156_v1 }
0x245b   : > { %5790 = vmatmul.mubr.msk.bf16.gmra.mrb[88].mxu0 %vm1107_vm3, %v6388_v59 }
0x245c   : > { %5793 = vmatprep.mubr.msk.bf16.mxu0 %vm6157_vm1, %v6156_v1 }
0x2463   : > { %5794 = vmatmul.mubr.msk.bf16.gmra.mrb[92].mxu0 %vm1107_vm3, %v6409_v21 }
0x2464   : > { %5797 = vmatprep.mubr.msk.bf16.mxu0 %vm6157_vm1, %v6156_v1 }
0x246b   : > { %5798 = vmatmul.mubr.msk.bf16.gmra.mrb[96].mxu0 %vm1107_vm3, %v6407_v20 }
0x246c   : > { %5801 = vmatprep.mubr.msk.bf16.mxu0 %vm6157_vm1, %v6156_v1 }
0x2473   : > { %5802 = vmatmul.mubr.msk.bf16.gmra.mrb[100].mxu0 %vm1107_vm3, %v6517_v37 }
0x2474   : > { %5829 = vmatprep.mubr.msk.bf16.mxu0 %vm6157_vm1, %v6156_v1 }
0x251e   : > { %v3634_v59 = vpop.f32.mrb[80].mxu0 }
0x251f   : > { %v3640_v35 = vadd.f32 %v3634_v59, %v3481_v11  ;;  %v5771_v38 = vpop.f32.mrb[81].mxu0  ;;  %v6997_v59 = vld [vmem:[%s7343_s11 + $0x4] sm:$0x7] }
0x2520   : > { %v3637_v21 = vpop.f32.mrb[82].mxu0 }
0x2521   : > { %v3649_v43 = vadd.f32 %v5126_v60, %v3640_v35  ;;  %v5772_v9 = vpop.f32.mrb[83].mxu0  ;;  %v7000_v60 = vld [vmem:[%s7344_s26 + $0x4] sm:$0x7]  ;;  %v3667_v35 = vrot.slane %v6997_v59, %v6558_v29 }
0x2523   : > { %v3650_v44 = vadd.f32 %v3649_v43, %v6829_v0  ;;  %v3672_v43 = vrot.slane %v7000_v60, %v6558_v29 }
0x2525   : > { %v3651_v20 = vsel %vm1107_vm3, %v3650_v44, 0.0 }
0x2526   : > { %3652 = vadd.xlane.f32.xlu1 %v3651_v20  ;;  %v3783_v46 = vpop.f32.mrb[84].mxu0 }
0x2527   : > { %v3784_v47 = vadd.f32 %v5139_v45, %v3783_v46  ;;  %v5787_v49 = vpop.f32.mrb[85].mxu0 }
0x2528   : > { %v3786_v37 = vpop.f32.mrb[86].mxu0 }
0x2529   : > { %v3787_v48 = vadd.f32 %v5139_v45, %v3786_v37  ;;  %v5788_v50 = vpop.f32.mrb[87].mxu0  ;;  %v5132_v37 = vld [vmem:[%s7345_s23 + $0x1] ss:$0 sm:$0xff] }
0x252b   : > { %v6969_v51 = vpack.c.bf16 %v3787_v48, %v3784_v47 }
0x252d   : > { %v3836_v20 = vsel %vm1024_vm2, %v6969_v51, 0 }
0x252e   : > { %v3791_v52 = vpop.f32.mrb[88].mxu0 }
0x252f   : > { %v5791_v56 = vpop.f32.mrb[89].mxu0  ;;  %v3792_v61 = vadd.f32 %v5139_v45, %v3791_v52 }
0x2530   : > { %v3794_v58 = vpop.f32.mrb[90].mxu0 }
0x2531   : > { %v3795_v62 = vadd.f32 %v5139_v45, %v3794_v58  ;;  %v5792_v12 = vpop.f32.mrb[91].mxu0 }
0x2533   : > { %v6971_v2 = vpack.c.bf16 %v3795_v62, %v3792_v61 }
0x2535   : > { %3974 = vrot.lane.b32.xlu0 %v6971_v2, %s7353_s5  ;;  %v3839_v29 = vsel %vm1024_vm2, %v6971_v2, 0 }
0x2536   : > { %v3799_v0 = vpop.f32.mrb[92].mxu0 }
0x2537   : > { %v5795_v40 = vpop.f32.mrb[93].mxu0  ;;  %v3800_v5 = vadd.f32 %v5139_v45, %v3799_v0 }
0x2538   : > { %v3802_v57 = vpop.f32.mrb[94].mxu0 }
0x2539   : > { %v3803_v42 = vadd.f32 %v5139_v45, %v3802_v57  ;;  %v5796_v7 = vpop.f32.mrb[95].mxu0 }
0x253b   : > { %v6975_v8 = vpack.c.bf16 %v3803_v42, %v3800_v5 }
0x253d   : > { %3976 = vrot.lane.b32.xlu0 %v6975_v8, %s7353_s5  ;;  %v3842_v46 = vsel %vm1024_vm2, %v6975_v8, 0 }
0x253e   : > { %v3807_v41 = vpop.f32.mrb[96].mxu0 }
0x253f   : > { %v5799_v63 = vpop.f32.mrb[97].mxu0  ;;  %v3808_v26 = vadd.f32 %v5139_v45, %v3807_v41 }
0x2540   : > { %v3810_v6 = vpop.f32.mrb[98].mxu0 }
0x2541   : > { %v3811_v10 = vadd.f32 %v5139_v45, %v3810_v6  ;;  %v5800_v11 = vpop.f32.mrb[99].mxu0 }
0x2543   : > { %v6979_v39 = vpack.c.bf16 %v3811_v10, %v3808_v26 }
0x2545   : > { %3978 = vrot.lane.b32.xlu0 %v6979_v39, %s7353_s5  ;;  %v3845_v47 = vsel %vm1024_vm2, %v6979_v39, 0 }
0x2546   : > { %v3815_v14 = vpop.f32.mrb[100].mxu0 }
0x2547   : > { %v3816_v3 = vadd.f32 %v5139_v45, %v3815_v14  ;;  %v5803_v15 = vpop.f32.mrb[101].mxu0 }
0x2548   : > { %v3818_v13 = vpop.f32.mrb[102].mxu0 }
0x2549   : > { %v5804_v16 = vpop.f32.mrb[103].mxu0  ;;  %v6986_v24 = vpack.c.bf16 %v3816_v3, %v3816_v3 }
0x254b   : > { %v3848_v49 = vsel %vm1024_vm2, %v6986_v24, 0 }
0x25a7   : > { %v3975_v40 = vpop.permute.xlu0 %3974 }
0x25a8   : > { %v3989_v57 = vsel %vm1024_vm2, %v3975_v40, 0 }
0x25af   : > { %v3977_v5 = vpop.permute.xlu0 %3976 }
0x25b0   : > { %v3992_v42 = vsel %vm1024_vm2, %v3977_v5, 0 }
0x25b3   : > { %v3653_v17 = vpop.xlane.xlu1 %3652 }
0x25b4   : > { %v3654_v19 = vmul.f32 0.03125, %v3653_v17 }
0x25b6   : > { %v3655_v22 = vsub.f32 %v3650_v44, %v3654_v19 }
0x25b7   : > { %v3979_v7 = vpop.permute.xlu0 %3978 }
0x25b8   : > { %v3656_v18 = vmul.f32 %v3655_v22, %v3655_v22  ;;  %v3995_v41 = vsel %vm1024_vm2, %v3979_v7, 0 }
0x25ba   : > { %v3657_v23 = vsel %vm1107_vm3, %v3656_v18, 0.0 }
0x25bb   : > { %3658 = vadd.xlane.f32.xlu1 %v3657_v23 }
0x25cc   : > { %3972 = vrot.lane.b32.xlu1 %v6969_v51, %s7353_s5 }
0x25d0   : > { %3980 = vrot.lane.b32.xlu1 %v6986_v24, %s7353_s5 }
0x2648   : > { %v3659_v32 = vpop.xlane.xlu1 %3658 }
0x2649   : > { %v3660_v33 = vmul.f32 0.03125, %v3659_v32 }
0x264b   : > { %v3661_v34 = vadd.f32 1e-05, %v3660_v33 }
0x264c   : > { %v3973_v62 = vpop.permute.xlu1 %3972 }
0x264d   : > { %6095 = vrsqrt.f32 %v3661_v34  ;;  %v3986_v0 = vsel %vm1024_vm2, %v3973_v62, 0 }
0x2650   : > { %v3981_v63 = vpop.permute.xlu1 %3980 }
0x2651   : > { %v3998_v6 = vsel %vm1024_vm2, %v3981_v63, 0  ;;  %v5145_v63 = vld [vmem:[%s7346_s28 + $0x20] sm:$0xff] }
0x2657   : > { %v6096_v38 = vpop.eup %6095 }
0x2658   : > { %v3663_v21 = vmul.f32 %v6096_v38, %v3655_v22 }
0x265a   : > { %v3668_v9 = vmul.f32 %v3667_v35, %v3663_v21 }
0x265c   : > { %v7006_v44 = vadd.f32 %v3672_v43, %v3668_v9 }
0x265e   : > { %v3679_v45 = vpack.c.bf16 %v7006_v44, %v7006_v44 }
0x2660   : > { %5778 = vmatmul.mubr.msk.bf16.vlgmr.msra.gmra.mrb[112].mxu1 %vm1107_vm3, %v3679_v45 }
0x2661   : > { %5806 = vmatpush3.bf16.xpose.msra.mxu1 %v3836_v20  ;;  %5815 = vmatprep.mubr.msk.bf16.mxu1 %vm6157_vm1, %v6156_v1 }
0x2662   : > { %5807 = vmatprep.subr.bf16.mxu1 %v6156_v1 }
0x2669   : > { %5808 = vmatpush3.bf16.xpose.msra.mxu1 %v3839_v29 }
0x266a   : > { %5809 = vmatprep.subr.bf16.mxu1 %v6156_v1 }
0x2671   : > { %5810 = vmatpush3.bf16.xpose.msra.mxu1 %v3842_v46 }
0x2672   : > { %5811 = vmatprep.subr.bf16.mxu1 %v6156_v1 }
0x2679   : > { %5812 = vmatpush3.bf16.xpose.msra.mxu1 %v3845_v47 }
0x267a   : > { %5813 = vmatprep.subr.bf16.mxu1 %v6156_v1 }
0x2681   : > { %5814 = vmatpush3.bf16.xpose.msra.mxu1 %v3848_v49 }
0x2682   : > { %5833 = vmatprep.subr.bf16.mxu1 %v6156_v1 }
0x2733   : > { %v3727_v48 = vpop.f32.mrb[112].mxu1 }
0x2734   : > { %v3728_v50 = vadd.f32 %v5132_v37, %v3727_v48  ;;  %v5779_v52 = vpop.f32.mrb[113].mxu1 }
0x2735   : > { %v3730_v56 = vpop.f32.mrb[114].mxu1 }
0x2736   : > { %v3733_v58 = vmul.f32 0.35355338, %v3728_v50  ;;  %v5780_v61 = vpop.f32.mrb[115].mxu1 }
0x2738   : > { %v7029_v12 = vpack.c.bf16 %v3733_v58, %v3733_v58  ;;  %v5146_v58 = vld [vmem:[%s7346_s28 + $0x28] sm:$0xff] }
0x2739   : > { %v4113_v61 = vpack.c.bf16 %v5146_v58, %v5146_v58 }
0x273a   : > { %3970 = vrot.lane.b32.xlu0 %v7029_v12, %s7353_s5  ;;  %5816 = vmatmul.mubr.msk.bf16.vlgmr.msra.gmra.mrb[116].mxu1 %vm1024_vm2, %v7029_v12  ;;  %s7362_s5 = smov 88  }
0x273b   : > { %5834 = vmatpush3.bf16.xpose.msra.mxu1 %v3986_v0  ;;  %5843 = vmatprep.mubr.msk.bf16.mxu1 %vm6157_vm1, %v6156_v1 }
0x273c   : > { %5835 = vmatprep.subr.bf16.mxu1 %v6156_v1 }
0x2743   : > { %5836 = vmatpush3.bf16.xpose.msra.mxu1 %v3989_v57  ;;  %v4118_v57 = vsel %vm1028_vm0, %v4113_v61, 0 }
0x2744   : > { %5837 = vmatprep.subr.bf16.mxu1 %v6156_v1 }
0x274b   : > { %5838 = vmatpush3.bf16.xpose.msra.mxu1 %v3992_v42 }
0x274c   : > { %5839 = vmatprep.subr.bf16.mxu1 %v6156_v1 }
0x2753   : > { %5840 = vmatpush3.bf16.xpose.msra.mxu1 %v3995_v41 }
0x2754   : > { %5841 = vmatprep.subr.bf16.mxu1 %v6156_v1 }
0x275b   : > { %5842 = vmatpush3.bf16.xpose.msra.mxu1 %v3998_v6  ;;  %v3968_v6 = vpack.c.bf16 %v5145_v63, %v5145_v63 }
0x275c   : > { %5887 = vmatprep.subr.bf16.mxu1 %v6156_v1 }
0x27ac   : > { %v3971_v26 = vpop.permute.xlu0 %3970 }
0x27ad   : > { %5844 = vmatmul.mubr.msk.bf16.vlgmr.msra.gmra.mrb[120].mxu1 %vm1024_vm2, %v3971_v26 }
0x27ae   : > { %5897 = vmatprep.mubr.msk.bf16.mxu1 %vm6157_vm1, %v6156_v1 }
0x280d   : > { %v3884_v10 = vpop.f32.mrb[116].mxu1 }
0x280e   : > { %v5817_v11 = vpop.f32.mrb[117].mxu1  ;;  %v3890_v14 = vsel %vm2056_vm6, %v3884_v10, -inf }
0x280f   : > { %3891 = vmax.xlane.f32.xlu1 %v3890_v14  ;;  %v3887_v3 = vpop.f32.mrb[118].mxu1  ;;  %v4164_v14 = vsel %vm1028_vm0, %v3968_v6, 0 }
0x2810   : > { %v5818_v15 = vpop.f32.mrb[119].mxu1 }
0x2820   : > { %3907 = vrot.lane.b32.xlu1 %v6969_v51, %s7352_s3 }
0x2824   : > { %3911 = vrot.lane.b32.xlu1 %v6975_v8, %s7352_s3 }
0x2880   : > { %v4034_v13 = vpop.f32.mrb[120].mxu1 }
0x2881   : > { %v5845_v16 = vpop.f32.mrb[121].mxu1  ;;  %v4040_v17 = vsel %vm2056_vm6, %v4034_v13, -inf }
0x2882   : > { %4041 = vmax.xlane.f32.xlu0 %v4040_v17  ;;  %v4037_v19 = vpop.f32.mrb[122].mxu1 }
0x2883   : > { %v5846_v22 = vpop.f32.mrb[123].mxu1 }
0x2898   : > { %3909 = vrot.lane.b32.xlu0 %v6971_v2, %s7352_s3 }
0x289c   : > { %v3892_v18 = vpop.xlane.xlu1 %3891 }
0x289d   : > { %v3893_v25 = vsub.f32 %v3884_v10, %v3892_v18 }
0x289f   : > { %v3894_v27 = vmul.f32 1.442695, %v3893_v25 }
0x28a0   : > { %v3908_v23 = vpop.permute.xlu1 %3907 }
0x28a1   : > { %5820 = vmatpush3.bf16.msra.mxu0 %v3908_v23  ;;  %6097 = vpow2.f32 %v3894_v27 }
0x28a2   : > { %5821 = vmatprep.subr.bf16.mxu0 %v6156_v1 }
0x28a4   : > { %v3912_v34 = vpop.permute.xlu1 %3911 }
0x28ab   : > { %v6098_v54 = vpop.eup %6097 }
0x28ac   : > { %v3896_v28 = vsel %vm2056_vm6, %v6098_v54, 0.0 }
0x28b7   : > { %3897 = vadd.xlane.f32.xlu0 %v3896_v28 }
0x28cd   : > { %3913 = vrot.lane.b32.xlu0 %v6979_v39, %s7352_s3 }
0x28d1   : > { %3915 = vrot.lane.b32.xlu0 %v6986_v24, %s7352_s3  ;;  %s5053_s3 = sshll.u32 %s7366_s10, 3 }
0x28d5   : > { %4052 = vrot.lane.b32.xlu0 %v6969_v51, %s7362_s5 }
0x28d9   : > { %4054 = vrot.lane.b32.xlu0 %v6971_v2, %s7362_s5 }
0x28dd   : > { %4056 = vrot.lane.b32.xlu0 %v6975_v8, %s7362_s5 }
0x28e1   : > { %4058 = vrot.lane.b32.xlu0 %v6979_v39, %s7362_s5 }
0x28e5   : > { %4060 = vrot.lane.b32.xlu0 %v6986_v24, %s7362_s5 }
0x28e9   : > { %4208 = vrot.lane.b32.xlu0 %v6969_v51, %s7356_s9 }
0x28ed   : > { %4210 = vrot.lane.b32.xlu0 %v6971_v2, %s7356_s9 }
0x28f1   : > { %4214 = vrot.lane.b32.xlu0 %v6979_v39, %s7356_s9 }
0x28f5   : > { %4216 = vrot.lane.b32.xlu0 %v6986_v24, %s7356_s9 }
0x28f9   : > { %4206 = vrot.lane.b32.xlu0 %v7029_v12, %s7356_s9 }
0x290f   : > { %v4042_v30 = vpop.xlane.xlu0 %4041 }
0x2910   : > { %v4043_v31 = vsub.f32 %v4034_v13, %v4042_v30 }
0x2912   : > { %v4044_v32 = vmul.f32 1.442695, %v4043_v31 }
0x2913   : > { %v3910_v33 = vpop.permute.xlu0 %3909 }
0x2914   : > { %6099 = vpow2.f32 %v4044_v32  ;;  %5822 = vmatpush3.bf16.msra.mxu0 %v3910_v33 }
0x2915   : > { %5823 = vmatprep.subr.bf16.mxu0 %v6156_v1 }
0x2918   : > { %5824 = vmatpush3.bf16.msra.mxu0 %v3912_v34 }
0x2919   : > { %5825 = vmatprep.subr.bf16.mxu0 %v6156_v1 }
0x291e   : > { %v6100_v35 = vpop.eup %6099 }
0x291f   : > { %v4046_v38 = vsel %vm2056_vm6, %v6100_v35, 0.0 }
0x2920   : > { %4047 = vadd.xlane.f32.xlu1 %v4046_v38 }
0x2931   : > { %4212 = vrot.lane.b32.xlu1 %v6975_v8, %s7356_s9  ;;  %s7363_s9 = sld [smem:[#allocation18_spill]] }
0x2935   : > { %4290 = vrot.lane.b32.xlu1 %v6971_v2, %s7357_s13 }
0x2944   : > { %v3898_v21 = vpop.xlane.xlu0 %3897 }
0x2945   : > { %6101 = vrcp.f32 %v3898_v21 }
0x2948   : > { %v3914_v43 = vpop.permute.xlu0 %3913 }
0x2949   : > { %5826 = vmatpush3.bf16.msra.mxu0 %v3914_v43 }
0x294a   : > { %5827 = vmatprep.subr.bf16.mxu0 %v6156_v1 }
0x294c   : > { %v3916_v9 = vpop.permute.xlu0 %3915 }
0x294d   : > { %v3925_v45 = vand.u32 %v3916_v9, %v6655_v53 }
0x294f   : > { %v6102_v20 = vpop.eup %6101  ;;  %5828 = vmatpush3.bf16.msra.mxu0 %v3925_v45 }
0x2950   : > { %v3900_v29 = vmul.f32 %v6102_v20, %v6098_v54  ;;  %v4053_v46 = vpop.permute.xlu0 %4052  ;;  %5847 = vmatprep.subr.bf16.mxu0 %v6156_v1 }
0x2952   : > { %v3901_v47 = vpack.c.bf16 %v3900_v29, %v3900_v29 }
0x2954   : > { %5830 = vmatmul.mubr.msk.bf16.vlgmr.msra.gmra.mrb[104].mxu0 %vm2056_vm6, %v3901_v47  ;;  %v4055_v49 = vpop.permute.xlu0 %4054 }
0x2955   : > { %5848 = vmatpush3.bf16.msra.mxu0 %v4053_v46  ;;  %5857 = vmatprep.mubr.msk.bf16.mxu0 %vm6157_vm1, %v6156_v1 }
0x2956   : > { %5849 = vmatprep.subr.bf16.mxu0 %v6156_v1 }
0x2958   : > { %v4057_v37 = vpop.permute.xlu0 %4056 }
0x2959   : > { %5850 = vmatpush3.bf16.msra.mxu0 %v4055_v49 }
0x295a   : > { %5851 = vmatprep.subr.bf16.mxu0 %v6156_v1 }
0x295c   : > { %v4059_v48 = vpop.permute.xlu0 %4058 }
0x295d   : > { %5852 = vmatpush3.bf16.msra.mxu0 %v4057_v37 }
0x295e   : > { %5853 = vmatprep.subr.bf16.mxu0 %v6156_v1 }
0x2960   : > { %v4061_v50 = vpop.permute.xlu0 %4060 }
0x2961   : > { %5854 = vmatpush3.bf16.msra.mxu0 %v4059_v48  ;;  %v4070_v52 = vand.u32 %v4061_v50, %v6655_v53 }
0x2962   : > { %5855 = vmatprep.subr.bf16.mxu0 %v6156_v1 }
0x2964   : > { %v4209_v13 = vpop.permute.xlu0 %4208 }
0x2965   : > { %5856 = vmatpush3.bf16.msra.mxu0 %v4070_v52  ;;  %v4222_v17 = vsel %vm1024_vm2, %v4209_v13, 0 }
0x2966   : > { %5861 = vmatprep.subr.bf16.mxu0 %v6156_v1 }
0x2968   : > { %v4211_v19 = vpop.permute.xlu0 %4210 }
0x2969   : > { %v4225_v22 = vsel %vm1024_vm2, %v4211_v19, 0 }
0x296c   : > { %v4215_v25 = vpop.permute.xlu0 %4214 }
0x296d   : > { %v4231_v27 = vsel %vm1024_vm2, %v4215_v25, 0 }
0x2970   : > { %v4217_v54 = vpop.permute.xlu0 %4216 }
0x2971   : > { %v4234_v28 = vsel %vm1024_vm2, %v4217_v54, 0 }
0x2974   : > { %v4207_v30 = vpop.permute.xlu0 %4206 }
0x29ad   : > { %v4048_v56 = vpop.xlane.xlu1 %4047 }
0x29ae   : > { %6103 = vrcp.f32 %v4048_v56 }
0x29b1   : > { %v4213_v18 = vpop.permute.xlu1 %4212 }
0x29b2   : > { %v4228_v23 = vsel %vm1024_vm2, %v4213_v18, 0 }
0x29b5   : > { %v4291_v52 = vpop.permute.xlu1 %4290 }
0x29b8   : > { %v6104_v62 = vpop.eup %6103 }
0x29b9   : > { %v4050_v0 = vmul.f32 %v6104_v62, %v6100_v35 }
0x29bb   : > { %v4051_v40 = vpack.c.bf16 %v4050_v0, %v4050_v0 }
0x29bd   : > { %5858 = vmatmul.mubr.msk.bf16.vlgmr.msra.gmra.mrb[108].mxu0 %vm2056_vm6, %v4051_v40 }
0x29be   : > { %5862 = vmatpush3.bf16.msra.mxu0 %v4118_v57  ;;  %5863 = vmatprep.mubr.msk.bf16.mxu0 %vm6157_vm1, %v6156_v1 }
0x29bf   : > { %5867 = vmatprep.subr.bf16.mxu0 %v6156_v1 }
0x2a27   : > { %v3961_v5 = vpop.f32.mrb[104].mxu0 }
0x2a28   : > { %v5831_v42 = vpop.f32.mrb[105].mxu0  ;;  %v3967_v16 = vpack.c.bf16 %v3961_v5, %v3961_v5 }
0x2a29   : > { %v3964_v7 = vpop.f32.mrb[106].mxu0 }
0x2a2a   : > { %v5832_v41 = vpop.f32.mrb[107].mxu0 }
0x2a2b   : > { %v5147_v41 = vld [vmem:[%s7346_s28 + $0x30] sm:$0xff] }
0x2a2c   : > { %v4349_v63 = vpack.c.bf16 %v5147_v41, %v5147_v41 }
0x2a90   : > { %v4106_v26 = vpop.f32.mrb[108].mxu0 }
0x2a91   : > { %v4112_v10 = vpack.c.bf16 %v4106_v26, %v4106_v26  ;;  %v5859_v11 = vpop.f32.mrb[109].mxu0 }
0x2a92   : > { %v4109_v3 = vpop.f32.mrb[110].mxu0 }
0x2a93   : > { %v5860_v15 = vpop.f32.mrb[111].mxu0  ;;  %5864 = vmatmul.mubr.msk.bf16.vlgmr.msra.gmra.mrb[112].mxu0 %vm1024_vm2, %v4112_v10  ;;  %v4354_v10 = vsel %vm1028_vm0, %v4349_v63, 0 }
0x2a94   : > { %5868 = vmatpush3.bf16.msra.mxu0 %v4164_v14  ;;  %5869 = vmatprep.mubr.msk.bf16.mxu0 %vm6157_vm1, %v6156_v1 }
0x2a95   : > { %5873 = vmatprep.subr.bf16.mxu0 %v6156_v1 }
0x2a9b   : > { %5870 = vmatmul.mubr.msk.bf16.vlgmr.msra.gmra.mrb[116].mxu0 %vm1024_vm2, %v3967_v16 }
0x2a9c   : > { %5883 = vmatprep.mubr.msk.bf16.mxu0 %vm6157_vm1, %v6156_v1 }
0x2a9d   : > { %5874 = vmatpush3.bf16.xpose.msra.mxu0 %v4222_v17 }
0x2a9e   : > { %5875 = vmatprep.subr.bf16.mxu0 %v6156_v1 }
0x2aa5   : > { %5876 = vmatpush3.bf16.xpose.msra.mxu0 %v4225_v22 }
0x2aa6   : > { %5877 = vmatprep.subr.bf16.mxu0 %v6156_v1 }
0x2aad   : > { %5878 = vmatpush3.bf16.xpose.msra.mxu0 %v4228_v23 }
0x2aae   : > { %5879 = vmatprep.subr.bf16.mxu0 %v6156_v1 }
0x2ab5   : > { %5880 = vmatpush3.bf16.xpose.msra.mxu0 %v4231_v27 }
0x2ab6   : > { %5881 = vmatprep.subr.bf16.mxu0 %v6156_v1 }
0x2abd   : > { %5882 = vmatpush3.bf16.xpose.msra.mxu0 %v4234_v28 }
0x2abe   : > { %5921 = vmatprep.subr.bf16.mxu0 %v6156_v1 }
0x2ac4   : > { %5884 = vmatmul.mubr.msk.bf16.vlgmr.msra.gmra.mrb[120].mxu0 %vm1024_vm2, %v4207_v30 }
0x2ac5   : > { %5931 = vmatprep.mubr.msk.bf16.mxu0 %vm6157_vm1, %v6156_v1 }
0x2b66   : > { %v4154_v31 = vpop.f32.mrb[112].mxu0 }
0x2b67   : > { %v5865_v32 = vpop.f32.mrb[113].mxu0 }
0x2b68   : > { %v4157_v33 = vpop.f32.mrb[114].mxu0 }
0x2b69   : > { %v5866_v34 = vpop.f32.mrb[115].mxu0 }
0x2b6e   : > { %v4200_v35 = vpop.f32.mrb[116].mxu0 }
0x2b6f   : > { %v7131_v38 = vadd.f32 %v4200_v35, %v4154_v31  ;;  %v5871_v21 = vpop.f32.mrb[117].mxu0 }
0x2b70   : > { %v4203_v43 = vpop.f32.mrb[118].mxu0 }
0x2b71   : > { %v5872_v9 = vpop.f32.mrb[119].mxu0 }
0x2b97   : > { %v4270_v45 = vpop.f32.mrb[120].mxu0 }
0x2b98   : > { %v5885_v20 = vpop.f32.mrb[121].mxu0  ;;  %v4276_v29 = vsel %vm2056_vm6, %v4270_v45, -inf }
0x2b99   : > { %4277 = vmax.xlane.f32.xlu0 %v4276_v29  ;;  %v4273_v46 = vpop.f32.mrb[122].mxu0 }
0x2b9a   : > { %v5886_v47 = vpop.f32.mrb[123].mxu0 }
0x2baf   : > { %4288 = vrot.lane.b32.xlu0 %v6969_v51, %s7357_s13 }
0x2bb3   : > { %4292 = vrot.lane.b32.xlu0 %v6975_v8, %s7357_s13 }
0x2bb7   : > { %4296 = vrot.lane.b32.xlu0 %v6986_v24, %s7357_s13 }
0x2bbb   : > { %4401 = vrot.lane.b32.xlu0 %v6971_v2, %s7359_s22 }
0x2bbf   : > { %4405 = vrot.lane.b32.xlu0 %v6979_v39, %s7359_s22 }
0x2bc3   : > { %4397 = vrot.lane.b32.xlu0 %v7029_v12, %s7359_s22 }
0x2bc7   : > { %4479 = vrot.lane.b32.xlu0 %v6969_v51, %s7358_s8 }
0x2c26   : > { %v4278_v49 = vpop.xlane.xlu0 %4277 }
0x2c27   : > { %v4279_v37 = vsub.f32 %v4270_v45, %v4278_v49 }
0x2c29   : > { %v4280_v48 = vmul.f32 1.442695, %v4279_v37 }
0x2c2a   : > { %v4289_v50 = vpop.permute.xlu0 %4288 }
0x2c2b   : > { %6105 = vpow2.f32 %v4280_v48  ;;  %5888 = vmatpush3.bf16.msra.mxu1 %v4289_v50 }
0x2c2c   : > { %5889 = vmatprep.subr.bf16.mxu1 %v6156_v1 }
0x2c2e   : > { %v4293_v56 = vpop.permute.xlu0 %4292 }
0x2c2f   : > { %5890 = vmatpush3.bf16.msra.mxu1 %v4291_v52 }
0x2c30   : > { %5891 = vmatprep.subr.bf16.mxu1 %v6156_v1 }
0x2c32   : > { %v4297_v58 = vpop.permute.xlu0 %4296 }
0x2c33   : > { %5892 = vmatpush3.bf16.msra.mxu1 %v4293_v56  ;;  %v4306_v7 = vand.u32 %v4297_v58, %v6655_v53 }
0x2c34   : > { %5893 = vmatprep.subr.bf16.mxu1 %v6156_v1 }
0x2c35   : > { %v6106_v12 = vpop.eup %6105 }
0x2c36   : > { %v4402_v61 = vpop.permute.xlu0 %4401  ;;  %v4282_v62 = vsel %vm2056_vm6, %v6106_v12, 0.0 }
0x2c37   : > { %4283 = vadd.xlane.f32.xlu1 %v4282_v62  ;;  %v4416_v19 = vsel %vm1024_vm2, %v4402_v61, 0 }
0x2c3a   : > { %v4406_v0 = vpop.permute.xlu0 %4405 }
0x2c3b   : > { %v4422_v23 = vsel %vm1024_vm2, %v4406_v0, 0 }
0x2c3e   : > { %v4398_v40 = vpop.permute.xlu0 %4397 }
0x2c42   : > { %v4480_v57 = vpop.permute.xlu0 %4479 }
0x2c43   : > { %5922 = vmatpush3.bf16.msra.mxu0 %v4480_v57 }
0x2c44   : > { %5923 = vmatprep.subr.bf16.mxu0 %v6156_v1 }
0x2c48   : > { %4294 = vrot.lane.b32.xlu1 %v6979_v39, %s7357_s13  ;;  %s7364_s13 = sld [smem:[#allocation19_spill]] }
0x2c4c   : > { %4399 = vrot.lane.b32.xlu1 %v6969_v51, %s7359_s22 }
0x2c50   : > { %4403 = vrot.lane.b32.xlu1 %v6975_v8, %s7359_s22 }
0x2c54   : > { %4407 = vrot.lane.b32.xlu1 %v6986_v24, %s7359_s22 }
0x2cc4   : > { %v4284_v5 = vpop.xlane.xlu1 %4283 }
0x2cc5   : > { %6107 = vrcp.f32 %v4284_v5 }
0x2cc8   : > { %v4295_v42 = vpop.permute.xlu1 %4294 }
0x2cc9   : > { %5894 = vmatpush3.bf16.msra.mxu1 %v4295_v42 }
0x2cca   : > { %5895 = vmatprep.subr.bf16.mxu1 %v6156_v1 }
0x2ccc   : > { %v4400_v11 = vpop.permute.xlu1 %4399 }
0x2ccd   : > { %5896 = vmatpush3.bf16.msra.mxu1 %v4306_v7  ;;  %v4413_v16 = vsel %vm1024_vm2, %v4400_v11, 0 }
0x2cce   : > { %5901 = vmatprep.subr.bf16.mxu1 %v6156_v1 }
0x2ccf   : > { %v6108_v51 = vpop.eup %6107 }
0x2cd0   : > { %v4286_v6 = vmul.f32 %v6108_v51, %v6106_v12  ;;  %v4404_v22 = vpop.permute.xlu1 %4403 }
0x2cd1   : > { %v4419_v18 = vsel %vm1024_vm2, %v4404_v22, 0  ;;  %v5171_v22 = vld [vmem:[%s7349_s1 + $0x48] sm:$0xff] }
0x2cd2   : > { %v4287_v26 = vpack.c.bf16 %v4286_v6, %v4286_v6 }
0x2cd4   : > { %5898 = vmatmul.mubr.msk.bf16.vlgmr.msra.gmra.mrb[124].mxu1 %vm2056_vm6, %v4287_v26  ;;  %v4408_v25 = vpop.permute.xlu1 %4407 }
0x2cd5   : > { %5902 = vmatpush3.bf16.msra.mxu1 %v4354_v10  ;;  %5903 = vmatprep.mubr.msk.bf16.mxu1 %vm6157_vm1, %v6156_v1  ;;  %v4425_v27 = vsel %vm1024_vm2, %v4408_v25, 0  ;;  %v5173_v25 = vld [vmem:[%s7349_s1 + $0x58] sm:$0xff] }
0x2cd6   : > { %5907 = vmatprep.subr.bf16.mxu1 %v6156_v1 }
0x2da7   : > { %v4342_v14 = vpop.f32.mrb[124].mxu1 }
0x2da8   : > { %v4348_v3 = vpack.c.bf16 %v4342_v14, %v4342_v14  ;;  %v5899_v15 = vpop.f32.mrb[125].mxu1 }
0x2da9   : > { %v4345_v13 = vpop.f32.mrb[126].mxu1  ;;  %v5164_v15 = vld [vmem:[%s7348_s2 + $0x28] sm:$0xff] }
0x2daa   : > { %v5900_v17 = vpop.f32.mrb[127].mxu1  ;;  %5904 = vmatmul.mubr.msk.bf16.vlgmr.msra.gmra.mrb[128].mxu1 %vm1024_vm2, %v4348_v3  ;;  %v5163_v3 = vld [vmem:[%s7348_s2 + $0x20] sm:$0xff] }
0x2dab   : > { %5908 = vmatpush3.bf16.xpose.msra.mxu1 %v4413_v16  ;;  %5917 = vmatprep.mubr.msk.bf16.mxu1 %vm6157_vm1, %v6156_v1  ;;  %v4627_v13 = vpack.c.bf16 %v5164_v15, %v5163_v3  ;;  %v5166_v16 = vld [vmem:[%s7348_s2 + $0x38] sm:$0xff] }
0x2dac   : > { %5909 = vmatprep.subr.bf16.mxu1 %v6156_v1  ;;  %v4838_v3 = vld [vmem:[%s6308_s6 + $0x18] sm:$0xff] }
0x2db3   : > { %5910 = vmatpush3.bf16.xpose.msra.mxu1 %v4416_v19  ;;  %v5170_v19 = vld [vmem:[%s7349_s1 + $0x40] sm:$0xff] }
0x2db4   : > { %5911 = vmatprep.subr.bf16.mxu1 %v6156_v1 }
0x2dbb   : > { %5912 = vmatpush3.bf16.xpose.msra.mxu1 %v4419_v18  ;;  %v5172_v18 = vld [vmem:[%s7349_s1 + $0x50] sm:$0xff] }
0x2dbc   : > { %5913 = vmatprep.subr.bf16.mxu1 %v6156_v1 }
0x2dc3   : > { %5914 = vmatpush3.bf16.xpose.msra.mxu1 %v4422_v23  ;;  %v4691_v23 = vpack.c.bf16 %v5171_v22, %v5170_v19  ;;  %v4768_v22 = vrot.slane %v7000_v60, %v6823_v55 }
0x2dc4   : > { %5915 = vmatprep.subr.bf16.mxu1 %v6156_v1 }
0x2dcb   : > { %5916 = vmatpush3.bf16.xpose.msra.mxu1 %v4425_v27  ;;  %v4692_v27 = vpack.c.bf16 %v5173_v25, %v5172_v18 }
0x2dcc   : > { %5949 = vmatprep.subr.bf16.mxu1 %v6156_v1 }
0x2dd2   : > { %5918 = vmatmul.mubr.msk.bf16.vlgmr.msra.gmra.mrb[132].mxu1 %vm1024_vm2, %v4398_v40  ;;  %v5162_v40 = vld [vmem:[%s7347_s0 + $0x1] ss:$0 sm:$0xff] }
0x2dd3   : > { %5957 = vmatprep.mubr.msk.bf16.mxu1 %vm6157_vm1, %v6156_v1  ;;  %5950 = vmatpush3.bf16.msra.mxu1 %v4691_v23 }
0x2dd4   : > { %5951 = vmatprep.subr.bf16.mxu1 %v6156_v1 }
0x2dd7   : > { %5952 = vmatpush3.bf16.msra.mxu1 %v4692_v27 }
0x2dd8   : > { %5953 = vmatprep.subr.bf16.mxu1 %v6156_v1 }
0x2e7d   : > { %v4390_v54 = vpop.f32.mrb[128].mxu1 }
0x2e7e   : > { %v4396_v28 = vadd.f32 %v4390_v54, %v7131_v38  ;;  %v5905_v30 = vpop.f32.mrb[129].mxu1 }
0x2e7f   : > { %v4393_v31 = vpop.f32.mrb[130].mxu1 }
0x2e80   : > { %v5906_v32 = vpop.f32.mrb[131].mxu1  ;;  %v4614_v31 = vrot.slane %v6997_v59, %v6794_v4 }
0x2ea5   : > { %v4461_v33 = vpop.f32.mrb[132].mxu1 }
0x2ea6   : > { %v5919_v34 = vpop.f32.mrb[133].mxu1  ;;  %v4467_v35 = vsel %vm2056_vm6, %v4461_v33, -inf }
0x2ea7   : > { %4468 = vmax.xlane.f32.xlu1 %v4467_v35  ;;  %v4464_v21 = vpop.f32.mrb[134].mxu1  ;;  %v4619_v34 = vrot.slane %v7000_v60, %v6794_v4  ;;  %v5168_v4 = vld [vmem:[%s7350_s18 + $0x1] ss:$0 sm:$0xff] }
0x2ea8   : > { %v5920_v43 = vpop.f32.mrb[135].mxu1  ;;  %v4839_v60 = vld [vmem:[%s6308_s6 + $0x20] sm:$0xff] }
0x2eb8   : > { %4481 = vrot.lane.b32.xlu1 %v6971_v2, %s7358_s8 }
0x2ebc   : > { %4483 = vrot.lane.b32.xlu1 %v6975_v8, %s7358_s8 }
0x2ec0   : > { %4487 = vrot.lane.b32.xlu1 %v6986_v24, %s7358_s8 }
0x2f34   : > { %v4469_v38 = vpop.xlane.xlu1 %4468 }
0x2f35   : > { %v4470_v9 = vsub.f32 %v4461_v33, %v4469_v38  ;;  %v5174_v38 = vld [vmem:[%s7349_s1 + $0x60] sm:$0xff] }
0x2f37   : > { %v4471_v45 = vmul.f32 1.442695, %v4470_v9  ;;  %v5175_v9 = vld [vmem:[%s7349_s1 + $0x68] sm:$0xff] }
0x2f38   : > { %v4482_v20 = vpop.permute.xlu1 %4481 }
0x2f39   : > { %6109 = vpow2.f32 %v4471_v45  ;;  %5924 = vmatpush3.bf16.msra.mxu0 %v4482_v20  ;;  %v4693_v45 = vpack.c.bf16 %v5175_v9, %v5174_v38  ;;  %v5176_v20 = vld [vmem:[%s7349_s1 + $0x70] sm:$0xff]  ;;  %v4842_v9 = vld [vmem:[%s6308_s6 + $0x38] sm:$0xff] }
0x2f3a   : > { %5925 = vmatprep.subr.bf16.mxu0 %v6156_v1  ;;  %v4841_v38 = vld [vmem:[%s6308_s6 + $0x30] sm:$0xff] }
0x2f3b   : > { %5954 = vmatpush3.bf16.msra.mxu1 %v4693_v45  ;;  %v4847_v45 = vpack.c.bf16 %v4842_v9, %v4841_v38 }
0x2f3c   : > { %v4484_v29 = vpop.permute.xlu1 %4483  ;;  %5955 = vmatprep.subr.bf16.mxu1 %v6156_v1 }
0x2f3d   : > { %5926 = vmatpush3.bf16.msra.mxu0 %v4484_v29  ;;  %v5177_v29 = vld [vmem:[%s7349_s1 + $0x78] sm:$0xff] }
0x2f3e   : > { %5927 = vmatprep.subr.bf16.mxu0 %v6156_v1 }
0x2f40   : > { %v4488_v24 = vpop.permute.xlu1 %4487 }
0x2f41   : > { %v4497_v49 = vand.u32 %v4488_v24, %v6655_v53 }
0x2f43   : > { %v6110_v46 = vpop.eup %6109 }
0x2f44   : > { %v4473_v2 = vsel %vm2056_vm6, %v6110_v46, 0.0 }
0x2f45   : > { %4474 = vadd.xlane.f32.xlu0 %v4473_v2 }
0x2f5b   : > { %4485 = vrot.lane.b32.xlu0 %v6979_v39, %s7358_s8  ;;  %v5148_v39 = vld [vmem:[%s7346_s28 + $0x38] sm:$0xff]  ;;  %s914_s8 = scalar_lea.vmem %s6323_s4, %s5053_s3 }
0x2f5c   : > { %v4540_v52 = vpack.c.bf16 %v5148_v39, %v5148_v39 }
0x2f5e   : > { %v4545_v56 = vsel %vm1028_vm0, %v4540_v52, 0 }
0x2fd2   : > { %v4475_v8 = vpop.xlane.xlu0 %4474 }
0x2fd3   : > { %6111 = vrcp.f32 %v4475_v8 }
0x2fd6   : > { %v4486_v47 = vpop.permute.xlu0 %4485 }
0x2fd7   : > { %5928 = vmatpush3.bf16.msra.mxu0 %v4486_v47 }
0x2fd8   : > { %5929 = vmatprep.subr.bf16.mxu0 %v6156_v1 }
0x2fdb   : > { %5930 = vmatpush3.bf16.msra.mxu0 %v4497_v49 }
0x2fdc   : > { %5935 = vmatprep.subr.bf16.mxu0 %v6156_v1 }
0x2fdd   : > { %v6112_v37 = vpop.eup %6111 }
0x2fde   : > { %v4477_v48 = vmul.f32 %v6112_v37, %v6110_v46  ;;  %v4694_v46 = vpack.c.bf16 %v5177_v29, %v5176_v20  ;;  %v5181_v20 = vld [vmem:[%s7364_s13] ss:$0 sm:$0xff] }
0x2fe0   : > { %v4478_v50 = vpack.c.bf16 %v4477_v48, %v4477_v48  ;;  %5956 = vmatpush3.bf16.msra.mxu1 %v4694_v46 }
0x2fe1   : > { %5977 = vmatprep.subr.bf16.mxu1 %v6156_v1 }
0x2fe2   : > { %5932 = vmatmul.mubr.msk.bf16.vlgmr.msra.gmra.mrb[124].mxu0 %vm2056_vm6, %v4478_v50  ;;  %v5179_v50 = vld [vmem:[%s7351_s16 + $0x1] ss:$0 sm:$0xff] }
0x2fe3   : > { %5937 = vmatprep.mubr.msk.bf16.mxu0 %vm6157_vm1, %v6156_v1  ;;  %5936 = vmatpush3.bf16.msra.mxu0 %v4545_v56 }
0x2fe4   : > { %5941 = vmatprep.subr.bf16.mxu0 %v6156_v1 }
0x30b5   : > { %v4533_v53 = vpop.f32.mrb[124].mxu0 }
0x30b6   : > { %v4539_v58 = vpack.c.bf16 %v4533_v53, %v4533_v53  ;;  %v5933_v12 = vpop.f32.mrb[125].mxu0 }
0x30b7   : > { %v4536_v61 = vpop.f32.mrb[126].mxu0 }
0x30b8   : > { %v5934_v62 = vpop.f32.mrb[127].mxu0  ;;  %5938 = vmatmul.mubr.msk.bf16.vlgmr.msra.gmra.mrb[128].mxu0 %vm1024_vm2, %v4539_v58 }
0x30b9   : > { %5945 = vmatprep.mubr.msk.bf16.mxu0 %vm6157_vm1, %v6156_v1  ;;  %5942 = vmatpush3.bf16.msra.mxu0 %v4627_v13 }
0x30ba   : > { %5943 = vmatprep.subr.bf16.mxu0 %v6156_v1 }
0x318b   : > { %v4581_v0 = vpop.f32.mrb[128].mxu0 }
0x318c   : > { %v4587_v57 = vadd.f32 %v4581_v0, %v4396_v28  ;;  %v5939_v5 = vpop.f32.mrb[129].mxu0 }
0x318d   : > { %v4584_v42 = vpop.f32.mrb[130].mxu0 }
0x318e   : > { %v4596_v7 = vadd.f32 %v5162_v40, %v4587_v57  ;;  %v5940_v41 = vpop.f32.mrb[131].mxu0  ;;  %v4770_v42 = vld [vmem:[%s7363_s9] sm:$0xff] }
0x318f   : > { %v4772_v41 = vld [vmem:[%s7363_s9 + $0x10] sm:$0xff] }
0x3190   : > { %v4597_v63 = vadd.f32 %v4596_v7, %v7006_v44  ;;  %v5165_v44 = vld [vmem:[%s7348_s2 + $0x30] sm:$0xff]  ;;  %v4771_v7 = vld [vmem:[%s7363_s9 + $0x8] sm:$0xff] }
0x3191   : > { %v4628_v17 = vpack.c.bf16 %v5166_v16, %v5165_v44 }
0x3192   : > { %v4598_v51 = vsel %vm1107_vm3, %v4597_v63, 0.0 }
0x3193   : > { %4599 = vadd.xlane.f32.xlu0 %v4598_v51  ;;  %5944 = vmatpush3.bf16.msra.mxu0 %v4628_v17  ;;  %v4773_v51 = vld [vmem:[%s7363_s9 + $0x18] sm:$0xff]  ;;  %v4763_v17 = vrot.slane %v6997_v59, %v6823_v55  ;;  %v4850_v59 = vld [vmem:[%s6313_s30 + $0x10] sm:$0xff] }
0x3194   : > { %5961 = vmatprep.subr.bf16.mxu0 %v6156_v1 }
0x3220   : > { %v4600_v6 = vpop.xlane.xlu0 %4599 }
0x3221   : > { %v4601_v26 = vmul.f32 0.03125, %v4600_v6  ;;  %v4776_v6 = vpack.c.bf16 %v4773_v51, %v4772_v41 }
0x3223   : > { %v4602_v10 = vsub.f32 %v4597_v63, %v4601_v26  ;;  %v4775_v63 = vpack.c.bf16 %v4771_v7, %v4770_v42  ;;  %v4835_v26 = vld [vmem:[%s6308_s6] sm:$0xff] }
0x3225   : > { %v4603_v11 = vmul.f32 %v4602_v10, %v4602_v10 }
0x3227   : > { %v4604_v14 = vsel %vm1107_vm3, %v4603_v11, 0.0  ;;  %v4837_v11 = vld [vmem:[%s6308_s6 + $0x10] sm:$0xff] }
0x3228   : > { %4605 = vadd.xlane.f32.xlu1 %v4604_v14  ;;  %v4845_v15 = vpack.c.bf16 %v4838_v3, %v4837_v11 }
0x32b5   : > { %v4606_v54 = vpop.xlane.xlu1 %4605 }
0x32b6   : > { %v4607_v28 = vmul.f32 0.03125, %v4606_v54 }
0x32b8   : > { %v4608_v30 = vadd.f32 1e-05, %v4607_v28  ;;  %v4848_v28 = vld [vmem:[%s6313_s30] sm:$0xff] }
0x32ba   : > { %6113 = vrsqrt.f32 %v4608_v30  ;;  %v4849_v30 = vld [vmem:[%s6313_s30 + $0x8] sm:$0xff] }
0x32c4   : > { %v6114_v32 = vpop.eup %6113 }
0x32c5   : > { %v4610_v33 = vmul.f32 %v6114_v32, %v4602_v10  ;;  %v4836_v10 = vld [vmem:[%s6308_s6 + $0x8] sm:$0xff] }
0x32c6   : > { %v4844_v14 = vpack.c.bf16 %v4836_v10, %v4835_v26 }
0x32c7   : > { %v4615_v35 = vmul.f32 %v4614_v31, %v4610_v33  ;;  %v4852_v33 = vpack.c.bf16 %v4849_v30, %v4848_v28 }
0x32c9   : > { %v4620_v21 = vadd.f32 %v4619_v34, %v4615_v35  ;;  %v4851_v35 = vld [vmem:[%s6313_s30 + $0x18] sm:$0xff] }
0x32ca   : > { %v4853_v55 = vpack.c.bf16 %v4851_v35, %v4850_v59 }
0x32cb   : > { %v4626_v43 = vpack.c.bf16 %v4620_v21, %v4620_v21 }
0x32cd   : > { %5946 = vmatmul.mubr.msk.bf16.vlgmr.msra.gmra.mrb[132].mxu0 %vm1107_vm3, %v4626_v43 }
0x32ce   : > { %5965 = vmatprep.mubr.msk.bf16.mxu0 %vm6157_vm1, %v6156_v1  ;;  %5962 = vmatpush3.bf16.msra.mxu0 %v4775_v63 }
0x32cf   : > { %5963 = vmatprep.subr.bf16.mxu0 %v6156_v1 }
0x32d2   : > { %5964 = vmatpush3.bf16.msra.mxu0 %v4776_v6 }
0x32d3   : > { %5969 = vmatprep.subr.bf16.mxu0 %v6156_v1 }
0x33a0   : > { %v4674_v2 = vpop.f32.mrb[132].mxu0 }
0x33a1   : > { %v4675_v8 = vadd.f32 %v5168_v4, %v4674_v2  ;;  %v5947_v24 = vpop.f32.mrb[133].mxu0 }
0x33a2   : > { %v4677_v47 = vpop.f32.mrb[134].mxu0 }
0x33a3   : > { %v4680_v49 = vmax.f32 %v4675_v8, 0.0  ;;  %v5948_v37 = vpop.f32.mrb[135].mxu0 }
0x33a5   : > { %v4690_v48 = vpack.c.bf16 %v4680_v49, %v4680_v49 }
0x33a7   : > { %5958 = vmatmul.mubr.msk.bf16.vlgmr.msra.gmra.mrb[136].mxu1 %vm2868_vm8, %v4690_v48 }
0x33a8   : > { %5985 = vmatprep.mubr.msk.bf16.mxu1 %vm6157_vm1, %v6156_v1  ;;  %5978 = vmatpush3.bf16.msra.mxu1 %v4844_v14 }
0x33a9   : > { %5979 = vmatprep.subr.bf16.mxu1 %v6156_v1 }
0x33ac   : > { %5980 = vmatpush3.bf16.msra.mxu1 %v4845_v15 }
0x33ad   : > { %5981 = vmatprep.subr.bf16.mxu1 %v6156_v1 }
0x347a   : > { %v4740_v39 = vpop.f32.mrb[136].mxu1 }
0x347b   : > { %v4741_v52 = vadd.f32 %v5179_v50, %v4740_v39  ;;  %v5959_v56 = vpop.f32.mrb[137].mxu1  ;;  %v5185_v39 = vld [vmem:[%s6318_s27] ss:$0 sm:$0xff] }
0x347c   : > { %v4743_v53 = vpop.f32.mrb[138].mxu1 }
0x347d   : > { %v4746_v58 = vadd.f32 %v4741_v52, %v4620_v21  ;;  %v5960_v12 = vpop.f32.mrb[139].mxu1  ;;  %v4840_v21 = vld [vmem:[%s6308_s6 + $0x28] sm:$0xff] }
0x347e   : > { %v4846_v43 = vpack.c.bf16 %v4840_v21, %v4839_v60 }
0x347f   : > { %v4747_v61 = vsel %vm1107_vm3, %v4746_v58, 0.0 }
0x3480   : > { %4748 = vadd.xlane.f32.xlu0 %v4747_v61  ;;  %5982 = vmatpush3.bf16.msra.mxu1 %v4846_v43  ;;  %v4946_v61 = vand.u32 127, %v1815_v36 }
0x3481   : > { %5983 = vmatprep.subr.bf16.mxu1 %v6156_v1 }
0x3482   : > { %vm4950_vm9 = vcmp.eq.s32.totalorder %v4946_v61, 2  ;;  %vm4948_vm10 = vcmp.lt.s32.totalorder %v4946_v61, 2 }
0x3484   : > { %5984 = vmatpush3.bf16.msra.mxu1 %v4847_v45 }
0x350d   : > { %v4749_v62 = vpop.xlane.xlu0 %4748 }
0x350e   : > { %v4750_v0 = vmul.f32 0.03125, %v4749_v62 }
0x3510   : > { %v4751_v40 = vsub.f32 %v4746_v58, %v4750_v0 }
0x3512   : > { %v4752_v57 = vmul.f32 %v4751_v40, %v4751_v40 }
0x3514   : > { %v4753_v5 = vsel %vm1107_vm3, %v4752_v57, 0.0 }
0x3515   : > { %4754 = vadd.xlane.f32.xlu0 %v4753_v5 }
0x35a2   : > { %v4755_v13 = vpop.xlane.xlu0 %4754 }
0x35a3   : > { %v4756_v44 = vmul.f32 0.03125, %v4755_v13 }
0x35a5   : > { %v4757_v16 = vadd.f32 1e-05, %v4756_v44 }
0x35a7   : > { %6115 = vrsqrt.f32 %v4757_v16 }
0x35b1   : > { %v6116_v19 = vpop.eup %6115 }
0x35b2   : > { %v4759_v18 = vmul.f32 %v6116_v19, %v4751_v40 }
0x35b4   : > { %v4764_v23 = vmul.f32 %v4763_v17, %v4759_v18 }
0x35b6   : > { %v4769_v25 = vadd.f32 %v4768_v22, %v4764_v23 }
0x35b8   : > { %v4774_v27 = vpack.c.bf16 %v4769_v25, %v4769_v25 }
0x35ba   : > { %v4787_v54 = vshll.u32 %v4774_v27, 16  ;;  %v4785_v31 = vshrl.u32 %v4774_v27, 16 }
0x35bc   : > { %v4789_v32 = vrot.slane %v4787_v54, 1 }
0x35be   : > { %v4790_v34 = vor.u32 %v4789_v32, %v4785_v31 }
0x35c0   : > { %5966 = vmatmul.mubr.msk.bf16.vlgmr.msra.gmra.mrb[136].mxu0 %vm1107_vm3, %v4790_v34 }
0x35c1   : > { %5970 = vmatpush3.bf16.msra.mxu0 %v4852_v33  ;;  %5973 = vmatprep.mubr.msk.bf16.mxu0 %vm6157_vm1, %v6156_v1 }
0x35c2   : > { %5971 = vmatprep.subr.bf16.mxu0 %v6156_v1 }
0x35c5   : > { %5972 = vmatpush3.bf16.msra.mxu0 %v4853_v55 }
0x35c8   : > { %5974 = vmatmul.mubr.msk.bf16.vlgmr.msra.gmra.mrb[140].mxu0 %vm1107_vm3, %v4790_v34 }
0x3693   : > { %v4828_v29 = vpop.f32.mrb[136].mxu0 }
0x3694   : > { %v4829_v46 = vadd.f32 %v5181_v20, %v4828_v29  ;;  %v5967_v4 = vpop.f32.mrb[137].mxu0 }
0x3695   : > { %v4831_v2 = vpop.f32.mrb[138].mxu0 }
0x3696   : > { %v4834_v8 = vmax.f32 %v4829_v46, 0.0  ;;  %v5968_v24 = vpop.f32.mrb[139].mxu0 }
0x3698   : > { %v4843_v47 = vpack.c.bf16 %v4834_v8, %v4834_v8 }
0x369a   : > { %5986 = vmatmul.mubr.msk.bf16.vlgmr.msra.gmra.mrb[140].mxu1 %vm2868_vm8, %v4843_v47 }
0x369b   : > { %v4888_v49 = vpop.f32.mrb[140].mxu0 }
0x369c   : > { %v5975_v37 = vpop.f32.mrb[141].mxu0 }
0x369d   : > { %v4891_v48 = vpop.f32.mrb[142].mxu0 }
0x369e   : > { %v5976_v1 = vpop.f32.mrb[143].mxu0 }
0x376d   : > { %v4931_v50 = vpop.f32.mrb[140].mxu1 }
0x376e   : > { %v4932_v52 = vadd.f32 %v4931_v50, %v4888_v49  ;;  %v5987_v56 = vpop.f32.mrb[141].mxu1 }
0x376f   : > { %v4934_v53 = vpop.f32.mrb[142].mxu1 }
0x3770   : > { %v4944_v58 = vadd.f32 %v5185_v39, %v4932_v52  ;;  %v5988_v12 = vpop.f32.mrb[143].mxu1 }
0x3772   : > { %6117 = vtanh.f32 %v4944_v58 }
0x377c   : > { %v6118_v62 = vpop.eup %6117 }
0x377d   : > { %v4949_v0 = vmul.f32 32.0, %v6118_v62  ;;  %v4951_v40 = vmul.f32 3.1415927, %v6118_v62 }
0x377f   : > { %v4952_v57 = vsel %vm4950_vm9, %v4951_v40, %v4944_v58 }
0x3780   : > { %v4953_v5 = vsel %vm4948_vm10, %v4949_v0, %v4952_v57 }
0x3781   : > { %4954 = vst [vmem:[%s914_s8] sm:$0x7f] %v4953_v5 }
0x3782 PF: > { %s69_s7 = sadd.s32 1, %s6125_s7  }
0x3783   : > { %p66_p4 = scmp.ge.s32.totalorder %s69_s7, 4  }
0x3785   :  { %68 = sbr.rel (!%p66_p4) target bundleno = 52 (0x34), region = 214 }

</bundles_post_ra>
